<compile_context>
chip_gen: v5e
topology: v5e:2x2
jax: 0.10.0
libtpu: 0.0.40
codegen_flags: <defaults>
</compile_context>

<pallas_src>
import functools

import jax
import jax.numpy as jnp
from jax.experimental import pallas as pl
from jax.experimental.pallas import tpu as pltpu

_LANES = 128


def _convblock_kernel(x_ref, w_ref, bias_ref, out_ref, *, H, W, C_in, C_out_p):
    # x_ref   : (1, H, W, C_in)        one image, NHWC, native dtype
    # w_ref   : (9 * C_in, C_out_p)    conv weights, taps stacked along K, BN scale folded
    # bias_ref: (1, C_out_p)           folded conv-bias + BN bias (f32)
    # out_ref : (1, H//2, W//2, C_out_p)
    x = x_ref[0]                                               # (H, W, C_in)

    # In-kernel 1-pixel halo (zero padding) on the VMEM-resident tile.
    zc = jnp.zeros((H, 1, C_in), x.dtype)
    xp = jnp.concatenate([zc, x, zc], axis=1)                  # (H, W+2, C_in)
    zr = jnp.zeros((1, W + 2, C_in), x.dtype)
    xp = jnp.concatenate([zr, xp, zr], axis=0)                 # (H+2, W+2, C_in)

    # K-concat the nine 3x3 taps -> one (H*W, 9*C_in) @ (9*C_in, C_out_p) matmul.
    taps = [xp[dy:dy + H, dx:dx + W, :] for dy in range(3) for dx in range(3)]
    lhs = jnp.concatenate(taps, axis=-1).reshape(H * W, 9 * C_in)
    acc = jnp.dot(lhs, w_ref[...], preferred_element_type=jnp.float32)

    # Folded conv-bias + BN bias, then ReLU (BN scale already in the weights).
    y = jnp.maximum(acc + bias_ref[...], 0.0)                  # (H*W, C_out_p) f32

    # MaxPool 2x2 stride 2: elementwise max of the four pooling phases.
    y = y.reshape(H // 2, 2, W // 2, 2, C_out_p)
    p = jnp.maximum(jnp.maximum(y[:, 0, :, 0, :], y[:, 0, :, 1, :]),
                    jnp.maximum(y[:, 1, :, 0, :], y[:, 1, :, 1, :]))

    out_ref[0] = p.astype(out_ref.dtype)


def conv_block_forward(x, conv_w, conv_b, gamma, beta,
                       running_mean, running_var, eps=1e-5):
    """Pallas TPU forward of ConvBlock.

    x: (B, C_in, H, W) (PyTorch NCHW). Returns (B, C_out, H//2, W//2).
    """
    B, C_in, H, W = x.shape
    C_out = conv_w.shape[0]
    assert conv_w.shape == (C_out, C_in, 3, 3)
    assert H % 2 == 0 and W % 2 == 0

    C_out_p = ((C_out + _LANES - 1) // _LANES) * _LANES

    # Layout plumbing: channels -> lane axis (NCHW -> NHWC). No spatial padding
    # here; the halo is built in-kernel.
    x_nhwc = jnp.transpose(x, (0, 2, 3, 1))                    # (B, H, W, C_in)

    # Fold eval-mode BatchNorm: scale into the weights, bias applied in-kernel.
    scale = gamma / jnp.sqrt(running_var + eps)                # (C_out,)
    bias = beta + (conv_b - running_mean) * scale              # (C_out,)

    # (C_out, C_in, 3, 3) -> (ky, kx, C_in, C_out) -> (9*C_in, C_out); scale the
    # columns by the BN scale, pad C_out to a lane-dense width, cast to the
    # activation dtype so the MXU runs at the native (bf16-capable) rate.
    w = jnp.transpose(conv_w, (2, 3, 1, 0)).reshape(9 * C_in, C_out)
    w = w * scale[None, :]
    w = jnp.pad(w, ((0, 0), (0, C_out_p - C_out))).astype(x.dtype)
    bias_p = jnp.pad(bias, (0, C_out_p - C_out)).reshape(1, C_out_p)
    bias_p = bias_p.astype(jnp.float32)

    kernel = functools.partial(_convblock_kernel,
                               H=H, W=W, C_in=C_in, C_out_p=C_out_p)

    # Explicit VMEM budget from the chosen block sizes (with headroom, and kept
    # well under v7x's 64 MiB physical VMEM).
    itemsize = x.dtype.itemsize
    in_block = H * W * C_in * itemsize
    out_block = (H // 2) * (W // 2) * C_out_p * itemsize
    w_bytes = 9 * C_in * C_out_p * itemsize + C_out_p * 4
    tmp_bytes = (((H + 2) * (W + 2) * C_in + H * W * 9 * C_in) * itemsize
                 + 2 * H * W * C_out_p * 4)
    needed = 2 * (in_block + out_block) + 2 * w_bytes + 2 * tmp_bytes
    vmem_limit = int(min(max(2 * needed, 16 * 2 ** 20), 48 * 2 ** 20))

    flops = 2 * B * H * W * 9 * C_in * C_out_p + 5 * B * H * W * C_out_p
    bytes_accessed = (x_nhwc.size * itemsize
                      + 9 * C_in * C_out_p * itemsize + C_out_p * 4
                      + B * (H // 2) * (W // 2) * C_out_p * itemsize)

    out_nhwc = pl.pallas_call(
        kernel,
        out_shape=jax.ShapeDtypeStruct((B, H // 2, W // 2, C_out_p), x.dtype),
        grid_spec=pltpu.PrefetchScalarGridSpec(
            num_scalar_prefetch=0,
            grid=(B,),
            in_specs=[
                pl.BlockSpec((1, H, W, C_in), lambda b: (b, 0, 0, 0)),
                pl.BlockSpec((9 * C_in, C_out_p), lambda b: (0, 0)),
                pl.BlockSpec((1, C_out_p), lambda b: (0, 0)),
            ],
            out_specs=pl.BlockSpec((1, H // 2, W // 2, C_out_p),
                                   lambda b: (b, 0, 0, 0)),
        ),
        compiler_params=pltpu.CompilerParams(
            dimension_semantics=("parallel",),
            vmem_limit_bytes=vmem_limit),
        cost_estimate=pl.CostEstimate(flops=flops, transcendentals=0,
                                      bytes_accessed=bytes_accessed),
    )(x_nhwc, w, bias_p)

    # Strip the channel padding, back to PyTorch NCHW layout.
    out = out_nhwc[..., :C_out]
    return jnp.transpose(out, (0, 3, 1, 2))


def _reference(x, conv_w, conv_b, gamma, beta, mean, var, eps=1e-5):
    y = jax.lax.conv_general_dilated(
        x.astype(jnp.float32), conv_w.astype(jnp.float32),
        window_strides=(1, 1), padding=((1, 1), (1, 1)),
        dimension_numbers=("NCHW", "OIHW", "NCHW"))
    y = y + conv_b.reshape(1, -1, 1, 1)
    y = (y - mean.reshape(1, -1, 1, 1)) / jnp.sqrt(var.reshape(1, -1, 1, 1) + eps)
    y = y * gamma.reshape(1, -1, 1, 1) + beta.reshape(1, -1, 1, 1)
    y = jnp.maximum(y, 0.0)
    y = jax.lax.reduce_window(y, -jnp.inf, jax.lax.max,
                              window_dimensions=(1, 1, 2, 2),
                              window_strides=(1, 1, 2, 2),
                              padding="VALID")
    return y


if __name__ == "__main__":
    # Small deterministic example: batch=2, in_channels=4, out_channels=8, 16x16.
    B, C_in, C_out, H, W = 2, 4, 8, 16, 16
    key = jax.random.PRNGKey(0)
    kx, kw, kb, kg, kbeta, km, kv = jax.random.split(key, 7)

    x = jax.random.normal(kx, (B, C_in, H, W), dtype=jnp.float32)
    conv_w = 0.1 * jax.random.normal(kw, (C_out, C_in, 3, 3), dtype=jnp.float32)
    conv_b = 0.1 * jax.random.normal(kb, (C_out,), dtype=jnp.float32)
    gamma = jax.random.uniform(kg, (C_out,), minval=0.5, maxval=1.5,
                               dtype=jnp.float32)
    beta = 0.1 * jax.random.normal(kbeta, (C_out,), dtype=jnp.float32)
    running_mean = 0.1 * jax.random.normal(km, (C_out,), dtype=jnp.float32)
    running_var = jax.random.uniform(kv, (C_out,), minval=0.5, maxval=1.5,
                                     dtype=jnp.float32)

    out = conv_block_forward(x, conv_w, conv_b, gamma, beta,
                             running_mean, running_var)
    out = jax.block_until_ready(out)

    ref = _reference(x, conv_w, conv_b, gamma, beta, running_mean, running_var)
    assert out.shape == (B, C_out, H // 2, W // 2), out.shape
    assert jnp.allclose(out, ref, rtol=1e-4, atol=1e-4), (
        float(jnp.max(jnp.abs(out - ref))))

    print("KERNEL_OK")
</pallas_src>

<mosaic_0001>
module attributes {stable_mosaic.version = 11 : i64} {
  func.func @_convblock_kernel(%arg0: i32, %arg1: memref<1x16x16x4xf32, #tpu.memory_space<vmem>>, %arg2: memref<36x128xf32, #tpu.memory_space<vmem>>, %arg3: memref<1x128xf32, #tpu.memory_space<vmem>>, %arg4: memref<1x8x8x128xf32, #tpu.memory_space<vmem>>) attributes {dimension_semantics = [#tpu.dimension_semantics<parallel>], iteration_bounds = array<i64: 2>, scalar_prefetch = 0 : i64, scratch_operands = 0 : i64, tpu.core_type = #tpu.core_type<tc>, window_params = [{transform_indices = @transform_0, window_bounds = array<i64: 1, 16, 16, 4>}, {pipeline_mode = #tpu.pipeline_mode<synchronous>, transform_indices = @transform_1, window_bounds = array<i64: 36, 128>}, {pipeline_mode = #tpu.pipeline_mode<synchronous>, transform_indices = @transform_2, window_bounds = array<i64: 1, 128>}, {transform_indices = @transform_3, window_bounds = array<i64: 1, 8, 8, 128>}]} {
    %c0 = arith.constant 0 : index
    %c0_0 = arith.constant 0 : index
    %c0_1 = arith.constant 0 : index
    %c0_2 = arith.constant 0 : index
    %0 = vector.load %arg1[%c0, %c0_0, %c0_1, %c0_2] : memref<1x16x16x4xf32, #tpu.memory_space<vmem>>, vector<1x16x16x4xf32>
    %1 = vector.shape_cast %0 : vector<1x16x16x4xf32> to vector<16x16x4xf32>
    %cst = arith.constant 0.000000e+00 : f32
    %2 = vector.broadcast %cst : f32 to vector<16x1x4xf32>
    %3 = tpu.concatenate %2, %1, %2 in 1 : vector<16x1x4xf32>, vector<16x16x4xf32>, vector<16x1x4xf32> -> vector<16x18x4xf32>
    %cst_3 = arith.constant 0.000000e+00 : f32
    %4 = vector.broadcast %cst_3 : f32 to vector<1x18x4xf32>
    %5 = tpu.concatenate %4, %3, %4 in 0 : vector<1x18x4xf32>, vector<16x18x4xf32>, vector<1x18x4xf32> -> vector<18x18x4xf32>
    %6 = vector.extract_strided_slice %5 {offsets = [0, 0, 0], sizes = [16, 16, 4], strides = [1, 1, 1]} : vector<18x18x4xf32> to vector<16x16x4xf32>
    %7 = vector.extract_strided_slice %5 {offsets = [0, 1, 0], sizes = [16, 16, 4], strides = [1, 1, 1]} : vector<18x18x4xf32> to vector<16x16x4xf32>
    %8 = vector.extract_strided_slice %5 {offsets = [0, 2, 0], sizes = [16, 16, 4], strides = [1, 1, 1]} : vector<18x18x4xf32> to vector<16x16x4xf32>
    %9 = vector.extract_strided_slice %5 {offsets = [1, 0, 0], sizes = [16, 16, 4], strides = [1, 1, 1]} : vector<18x18x4xf32> to vector<16x16x4xf32>
    %10 = vector.extract_strided_slice %5 {offsets = [1, 1, 0], sizes = [16, 16, 4], strides = [1, 1, 1]} : vector<18x18x4xf32> to vector<16x16x4xf32>
    %11 = vector.extract_strided_slice %5 {offsets = [1, 2, 0], sizes = [16, 16, 4], strides = [1, 1, 1]} : vector<18x18x4xf32> to vector<16x16x4xf32>
    %12 = vector.extract_strided_slice %5 {offsets = [2, 0, 0], sizes = [16, 16, 4], strides = [1, 1, 1]} : vector<18x18x4xf32> to vector<16x16x4xf32>
    %13 = vector.extract_strided_slice %5 {offsets = [2, 1, 0], sizes = [16, 16, 4], strides = [1, 1, 1]} : vector<18x18x4xf32> to vector<16x16x4xf32>
    %14 = vector.extract_strided_slice %5 {offsets = [2, 2, 0], sizes = [16, 16, 4], strides = [1, 1, 1]} : vector<18x18x4xf32> to vector<16x16x4xf32>
    %15 = tpu.concatenate %6, %7, %8, %9, %10, %11, %12, %13, %14 in 2 : vector<16x16x4xf32>, vector<16x16x4xf32>, vector<16x16x4xf32>, vector<16x16x4xf32>, vector<16x16x4xf32>, vector<16x16x4xf32>, vector<16x16x4xf32>, vector<16x16x4xf32>, vector<16x16x4xf32> -> vector<16x16x36xf32>
    %16 = vector.shape_cast %15 : vector<16x16x36xf32> to vector<256x36xf32>
    %c0_4 = arith.constant 0 : index
    %c0_5 = arith.constant 0 : index
    %17 = vector.load %arg2[%c0_4, %c0_5] : memref<36x128xf32, #tpu.memory_space<vmem>>, vector<36x128xf32>
    %cst_6 = arith.constant dense<0.000000e+00> : vector<256x128xf32>
    %18 = tpu.matmul %16, %17, %cst_6 {dimension_numbers = #tpu.dot_dimension_numbers<[1], [0], [0], [1], [0, 0, 1, 1], [], []>} : vector<256x36xf32>, vector<36x128xf32>, vector<256x128xf32> -> vector<256x128xf32>
    %c0_7 = arith.constant 0 : index
    %c0_8 = arith.constant 0 : index
    %19 = vector.load %arg3[%c0_7, %c0_8] : memref<1x128xf32, #tpu.memory_space<vmem>>, vector<1x128xf32>
    %20 = vector.broadcast %19 : vector<1x128xf32> to vector<256x128xf32>
    %21 = arith.addf %18, %20 : vector<256x128xf32>
    %cst_9 = arith.constant 0.000000e+00 : f32
    %22 = vector.broadcast %cst_9 : f32 to vector<256x128xf32>
    %23 = arith.maximumf %21, %22 : vector<256x128xf32>
    %24 = vector.shape_cast %23 : vector<256x128xf32> to vector<8x2x8x2x128xf32>
    %25 = vector.extract_strided_slice %24 {offsets = [0, 0, 0, 0, 0], sizes = [8, 1, 8, 1, 128], strides = [1, 1, 1, 1, 1]} : vector<8x2x8x2x128xf32> to vector<8x1x8x1x128xf32>
    %26 = vector.shape_cast %25 : vector<8x1x8x1x128xf32> to vector<8x8x128xf32>
    %27 = vector.extract_strided_slice %24 {offsets = [0, 0, 0, 1, 0], sizes = [8, 1, 8, 1, 128], strides = [1, 1, 1, 1, 1]} : vector<8x2x8x2x128xf32> to vector<8x1x8x1x128xf32>
    %28 = vector.shape_cast %27 : vector<8x1x8x1x128xf32> to vector<8x8x128xf32>
    %29 = arith.maximumf %26, %28 : vector<8x8x128xf32>
    %30 = vector.extract_strided_slice %24 {offsets = [0, 1, 0, 0, 0], sizes = [8, 1, 8, 1, 128], strides = [1, 1, 1, 1, 1]} : vector<8x2x8x2x128xf32> to vector<8x1x8x1x128xf32>
    %31 = vector.shape_cast %30 : vector<8x1x8x1x128xf32> to vector<8x8x128xf32>
    %32 = vector.extract_strided_slice %24 {offsets = [0, 1, 0, 1, 0], sizes = [8, 1, 8, 1, 128], strides = [1, 1, 1, 1, 1]} : vector<8x2x8x2x128xf32> to vector<8x1x8x1x128xf32>
    %33 = vector.shape_cast %32 : vector<8x1x8x1x128xf32> to vector<8x8x128xf32>
    %34 = arith.maximumf %31, %33 : vector<8x8x128xf32>
    %35 = arith.maximumf %29, %34 : vector<8x8x128xf32>
    %c0_10 = arith.constant 0 : index
    %c0_11 = arith.constant 0 : index
    %c0_12 = arith.constant 0 : index
    %c0_13 = arith.constant 0 : index
    %36 = vector.load %arg4[%c0_10, %c0_11, %c0_12, %c0_13] : memref<1x8x8x128xf32, #tpu.memory_space<vmem>>, vector<1x8x8x128xf32>
    %37 = vector.shape_cast %36 : vector<1x8x8x128xf32> to vector<8x8x128xf32>
    %38 = vector.shape_cast %35 : vector<8x8x128xf32> to vector<1x8x8x128xf32>
    tpu.vector_store %arg4[%c0_10, %c0_11, %c0_12, %c0_13], %38 {strides = array<i32>} : memref<1x8x8x128xf32, #tpu.memory_space<vmem>>, vector<1x8x8x128xf32>,
    return
  }
  func.func @transform_0(%arg0: i32) -> (i32, i32, i32, i32) {
    %c0_i32 = arith.constant 0 : i32
    %c0_i32_0 = arith.constant 0 : i32
    %c0_i32_1 = arith.constant 0 : i32
    %c0_i32_2 = arith.constant 0 : i32
    return %arg0, %c0_i32, %c0_i32_0, %c0_i32_1 : i32, i32, i32, i32
  }
  func.func @transform_1(%arg0: i32) -> (i32, i32) {
    %c0_i32 = arith.constant 0 : i32
    %c0_i32_0 = arith.constant 0 : i32
    %c0_i32_1 = arith.constant 0 : i32
    return %c0_i32, %c0_i32_0 : i32, i32
  }
  func.func @transform_2(%arg0: i32) -> (i32, i32) {
    %c0_i32 = arith.constant 0 : i32
    %c0_i32_0 = arith.constant 0 : i32
    %c0_i32_1 = arith.constant 0 : i32
    return %c0_i32, %c0_i32_0 : i32, i32
  }
  func.func @transform_3(%arg0: i32) -> (i32, i32, i32, i32) {
    %c0_i32 = arith.constant 0 : i32
    %c0_i32_0 = arith.constant 0 : i32
    %c0_i32_1 = arith.constant 0 : i32
    %c0_i32_2 = arith.constant 0 : i32
    return %arg0, %c0_i32, %c0_i32_0, %c0_i32_1 : i32, i32, i32, i32
  }
}

</mosaic_0001>

<bundles_post_ra>
// kernel: tpu_custom_call.1
= control target key start
LH: loop header
LB: loop body
LE: loop exit
PB: predicated region body
PF: predicated region fallthrough
CT: control target
= control target key end

     0   :  { %8 = vsyncpa [#allocation3], 0  ;;  %s5621_s0 = inlined_call_operand.vmem [shape: f32[2,16,16,4], index: 0, kind: input, shape index: {}]   ;;  %s5622_s1 = inlined_call_operand.vmem [shape: f32[36,128], index: 1, kind: input, shape index: {}]   ;;  %s5623_s2 = inlined_call_operand.vmem [shape: f32[1,128], index: 2, kind: input, shape index: {}]   ;;  %s5624_s3 = inlined_call_operand.hbm [shape: f32[2,8,8,128], index: 3, kind: output, shape index: {}]  }
   0x1   :  { %10 = vsyncpa [#allocation3 + $0x1], 0  ;;  %s3250_s12 = smov 0   ;;  %s3252_s13 = smov 0  }
   0x2   :  { %s3254_s14 = smov 0   ;;  %s3256_s15 = smov 0  }
   0x3 LB: > { %s3271_s16 = sadd.s32 4294967295, %s3218_s15   ;;  %s2915_s17 = sadd.s32 4294967294, %s3218_s15   ;;  %s3218_s15 = sphi %s3256_s15, %s6134_s15   ;;  %s3214_s14 = sphi %s3254_s14, %s6133_s14   ;;  %s3210_s13 = sphi %s3252_s13, %s6132_s13   ;;  %s3206_s12 = sphi %s3250_s12, %s6131_s12  }
   0x4   : > { %s3275_s18 = sadd.s32 1, %s3218_s15   ;;  %s91_s19 = sadd.s32 1, %s3214_s14 }
   0x5   : > { %s88_s20 = ssub.s32 %s3218_s15, %s3275_s18  ;;  %p101_p0 = scmp.ne.s32.totalorder %s3214_s14, %s3210_s13 }
   0x6   : > { %p89_p1 = scmp.eq.s32.totalorder %s88_s20, 0  ;;  %p102_p2 = scmp.eq.s32.totalorder %s3271_s16, 1 }
   0x7   : > { %p107_p3 = scmp.ne.s32.totalorder %s3210_s13, %s3206_s12  ;;  %p108_p4 = scmp.eq.s32.totalorder %s2915_s17, 1 }
   0x8   : > { %s3286_s21 = scalar_select %p89_p1, %s3214_s14, %s91_s19  }
   0x9   : > { %p3288_p5 = por %p102_p2, %p101_p0  ;;  %p3292_p6 = por %p108_p4, %p107_p3 }
   0xa   : > { %p2918_p7 = scmp.ge.s32.totalorder %s3218_s15, 1  ;;  %p140_p8 = scmp.lt.s32.totalorder %s3218_s15, 3 }
   0xc   : > { %p141_p9 = pnand %p2918_p7, %p140_p8 }
   0xe   : > { %144 = sbr.rel (%p141_p9) target bundleno = 963 (0x3c3), region = 32 }
  0x13   : > { %p164_p10 = scmp.lt.s32.totalorder %s3271_s16, 1  ;;  %v5625_v0 = vmov 0.0   ;;  %s3221_s25 = smov 4   ;;  %vm233_vm0 = vcmask 1040384   ;;  %vm392_vm1 = vcmask 1046528   ;;  %vm563_vm2 = vcmask 1045504  }
  0x14   : > { %v3300_v1 = vrot.slane %v5625_v0, 1  ;;  %s3222_s30 = smov 8   ;;  %s3223_s4 = smov 12   ;;  %vm1313_vm3 = vcmask 31744   ;;  %vm1345_vm4 = vcmask 64512   ;;  %vm1377_vm5 = vcmask 97280  }
  0x15   : > { %s165_s24 = scalar_select %p164_p10, %s3271_s16, 1  ;;  %vm1410_vm6 = vcmask 130048   ;;  %vm1443_vm7 = vcmask 162816   ;;  %vm1476_vm8 = vcmask 195584   ;;  %vm1681_vm9 = vcmask 1043456  }
  0x16   : > { %5753 = vst [vmem:[#allocation5_spill] sm:$0xff] %v3300_v1  ;;  %470 = vrot.lane.b32.xlu0 %v3300_v1, %s3221_s25  ;;  %s3224_s5 = smov 16   ;;  %s3225_s6 = smov 20   ;;  %vm1542_vm10 = vcmask 261120   ;;  %vm1509_vm11 = vcmask 228352   ;;  %vm1584_vm12 = vcmask 293888  }
  0x17   : > { %s3088_s26 = sshll.u32 %s165_s24, 8  ;;  %s3226_s7 = smov 24   ;;  %vm2758_vm13 = vcmask 1041409   ;;  %vm2760_vm14 = vcmask 1042434   ;;  %vm2762_vm15 = vcmask 1043459  }
  0x18   : > { %s3308_s29 = scalar_lea.vmem %s5621_s0, %s3088_s26  ;;  %s3227_s8 = smov 28  }
  0x19   : > { %v171_v2 = vld [vmem:[%s3308_s29 + $0x10] sm:$0xff]  ;;  %v172_v3 = vld [vmem:[%s3308_s29 + $0x18] sm:$0xff]  ;;  %v169_v4 = vld [vmem:[%s3308_s29] sm:$0xff]  ;;  %s3228_s9 = smov 32   ;;  %s3089_s10 = sshll.u32 %s3271_s16, 6 }
  0x1a   : > { %v237_v5 = vrot.slane %v171_v2, 7  ;;  %v238_v6 = vrot.slane %v172_v3, 7  ;;  %v170_v7 = vld [vmem:[%s3308_s29 + $0x8] sm:$0xff]  ;;  %v234_v8 = vrot.slane %v169_v4, 7  ;;  %v173_v9 = vld [vmem:[%s3308_s29 + $0x20] sm:$0xff]  ;;  %v175_v28 = vld [vmem:[%s3308_s29 + $0x30] sm:$0xff]  ;;  %s2849_s17 = scalar_lea.hbm %s5624_s3, %s3089_s10 }
  0x1b   : > { %v174_v10 = vld [vmem:[%s3308_s29 + $0x28] sm:$0xff]  ;;  %v235_v11 = vrot.slane %v170_v7, 7  ;;  %v240_v12 = vrot.slane %v173_v9, 7  ;;  %v176_v29 = vld [vmem:[%s3308_s29 + $0x38] sm:$0xff]  ;;  %v177_v33 = vld [vmem:[%s3308_s29 + $0x40] sm:$0xff]  ;;  %v243_v39 = vrot.slane %v175_v28, 7 }
  0x1c   : > { %v241_v13 = vrot.slane %v174_v10, 7  ;;  %v3317_v14 = vsel %vm233_vm0, %v237_v5, %v238_v6  ;;  %v3320_v15 = vsel %vm233_vm0, %v238_v6, 0.0  ;;  %v3323_v16 = vsel %vm233_vm0, 0.0, %v234_v8  ;;  %v178_v34 = vld [vmem:[%s3308_s29 + $0x48] sm:$0xff]  ;;  %v179_v48 = vld [vmem:[%s3308_s29 + $0x50] sm:$0xff]  ;;  %v180_v52 = vld [vmem:[%s3308_s29 + $0x58] sm:$0xff] }
  0x1d   : > { %5754 = vst [vmem:[#allocation6_spill] sm:$0xff] %v3317_v14  ;;  %v401_v17 = vrot.slane %v3317_v14, 1  ;;  %v403_v18 = vrot.slane %v3320_v15, 1  ;;  %v3328_v19 = vsel %vm233_vm0, %v234_v8, %v235_v11  ;;  %v3331_v20 = vsel %vm233_vm0, %v235_v11, 0.0  ;;  %v181_v3 = vld [vmem:[%s3308_s29 + $0x60] sm:$0xff]  ;;  %v182_v6 = vld [vmem:[%s3308_s29 + $0x68] sm:$0xff] }
  0x1e   : > { %5755 = vst [vmem:[#allocation7_spill] sm:$0xff] %v3323_v16  ;;  %v396_v21 = vrot.slane %v3328_v19, 1  ;;  %v398_v22 = vrot.slane %v3331_v20, 1  ;;  %v395_v23 = vrot.slane %v3323_v16, 1  ;;  %v3337_v24 = vsel %vm233_vm0, %v240_v12, %v241_v13  ;;  %v183_v7 = vld [vmem:[%s3308_s29 + $0x70] sm:$0xff]  ;;  %v184_v8 = vld [vmem:[%s3308_s29 + $0x78] sm:$0xff] }
  0x1f   : > { %5756 = vst [vmem:[#allocation8_spill] sm:$0xff] %v3328_v19  ;;  %v3340_v25 = vsel %vm392_vm1, %v401_v17, %v403_v18  ;;  %v3343_v26 = vsel %vm233_vm0, 0.0, %v240_v12  ;;  %v3346_v27 = vsel %vm233_vm0, 0.0, %v237_v5  ;;  %v3359_v32 = vsel %vm233_vm0, %v241_v13, 0.0  ;;  %s2852_s20 = sshll.u32 %s2849_s17, 4  ;;  %s2853_s20 = int_to_ptr.hbm [resolvable:$true] %s2852_s20 }
  0x20   : > { %5757 = vst [vmem:[#allocation9_spill] sm:$0xff] %v3337_v24  ;;  %478 = vrot.lane.b32.xlu2 %v3340_v25, %s3221_s25  ;;  %v3353_v30 = vsel %vm392_vm1, %v396_v21, %v398_v22  ;;  %v3356_v31 = vsel %vm392_vm1, %v395_v23, %v396_v21  ;;  %v405_v35 = vrot.slane %v3343_v26, 1  ;;  %v406_v36 = vrot.slane %v3337_v24, 1 }
  0x21   : > { %5758 = vst [vmem:[#allocation10_spill] sm:$0xff] %v3340_v25  ;;  %474 = vrot.lane.b32.xlu1 %v3353_v30, %s3221_s25  ;;  %472 = vrot.lane.b32.xlu0 %v3356_v31, %s3221_s25  ;;  %v400_v37 = vrot.slane %v3346_v27, 1  ;;  %v408_v38 = vrot.slane %v3359_v32, 1  ;;  %v244_v40 = vrot.slane %v176_v29, 7  ;;  %v246_v41 = vrot.slane %v177_v33, 7 }
  0x22   : > { %5759 = vst [vmem:[#allocation11_spill] sm:$0xff] %v3346_v27  ;;  %v247_v42 = vrot.slane %v178_v34, 7  ;;  %v3372_v43 = vsel %vm392_vm1, %v405_v35, %v406_v36  ;;  %v3388_v49 = vsel %vm233_vm0, 0.0, %v243_v39  ;;  %v249_v55 = vrot.slane %v179_v48, 7 }
  0x23   : > { %5760 = vst [vmem:[#allocation12_spill] sm:$0xff] %v3372_v43  ;;  %v3375_v44 = vsel %vm392_vm1, %v400_v37, %v401_v17  ;;  %v3378_v45 = vsel %vm392_vm1, %v406_v36, %v408_v38  ;;  %v3381_v46 = vsel %vm233_vm0, %v243_v39, %v244_v40  ;;  %v3384_v47 = vsel %vm233_vm0, %v244_v40, 0.0  ;;  %v185_v37 = vld [vmem:[%s3308_s29 + $0x80] sm:$0xff]  ;;  %v186_v38 = vld [vmem:[%s3308_s29 + $0x88] sm:$0xff] }
  0x24   : > { %5761 = vst [vmem:[#allocation13_spill] sm:$0xff] %v3378_v45  ;;  %v3391_v50 = vsel %vm233_vm0, %v246_v41, %v247_v42  ;;  %v3394_v51 = vsel %vm233_vm0, 0.0, %v246_v41  ;;  %v411_v53 = vrot.slane %v3381_v46, 1  ;;  %v413_v54 = vrot.slane %v3384_v47, 1 }
  0x25   : > { %5762 = vst [vmem:[#allocation14_spill] sm:$0xff] %v3381_v46  ;;  %v410_v56 = vrot.slane %v3388_v49, 1  ;;  %v415_v57 = vrot.slane %v3394_v51, 1  ;;  %v416_v58 = vrot.slane %v3391_v50, 1  ;;  %v250_v59 = vrot.slane %v180_v52, 7 }
  0x26   : > { %5763 = vst [vmem:[#allocation15_spill] sm:$0xff] %v3388_v49  ;;  %v3409_v60 = vsel %vm392_vm1, %v411_v53, %v413_v54  ;;  %v3421_v2 = vsel %vm233_vm0, 0.0, %v249_v55  ;;  %v3425_v4 = vsel %vm233_vm0, %v247_v42, 0.0  ;;  %v252_v11 = vrot.slane %v181_v3, 7 }
  0x27   : > { %5764 = vst [vmem:[#allocation16_spill] sm:$0xff] %v3409_v60  ;;  %v3412_v61 = vsel %vm392_vm1, %v410_v56, %v411_v53  ;;  %v3415_v62 = vsel %vm392_vm1, %v415_v57, %v416_v58  ;;  %v3418_v63 = vsel %vm233_vm0, %v249_v55, %v250_v59  ;;  %v3428_v5 = vsel %vm233_vm0, %v250_v59, 0.0 }
  0x28   : > { %480 = vrot.lane.b32.xlu2 %v3372_v43, %s3221_s25  ;;  %5765 = vst [vmem:[#allocation17_spill] sm:$0xff] %v3412_v61  ;;  %v420_v9 = vrot.slane %v3421_v2, 1  ;;  %v421_v10 = vrot.slane %v3418_v63, 1  ;;  %v418_v12 = vrot.slane %v3425_v4, 1  ;;  %v423_v13 = vrot.slane %v3428_v5, 1 }
  0x29   : > { %476 = vrot.lane.b32.xlu1 %v3375_v44, %s3221_s25  ;;  %482 = vrot.lane.b32.xlu0 %v3378_v45, %s3221_s25  ;;  %5766 = vst [vmem:[#allocation18_spill] sm:$0xff] %v3415_v62  ;;  %v253_v17 = vrot.slane %v182_v6, 7  ;;  %v255_v18 = vrot.slane %v183_v7, 7  ;;  %v256_v21 = vrot.slane %v184_v8, 7  ;;  %v3447_v23 = vsel %vm233_vm0, 0.0, %v252_v11  ;;  %v187_v6 = vld [vmem:[%s3308_s29 + $0x90] sm:$0xff] }
  0x2a   : > { %v3444_v22 = vsel %vm392_vm1, %v420_v9, %v421_v10  ;;  %v3450_v28 = vsel %vm392_vm1, %v416_v58, %v418_v12  ;;  %v3453_v29 = vsel %vm392_vm1, %v421_v10, %v423_v13  ;;  %v425_v41 = vrot.slane %v3447_v23, 1  ;;  %v188_v7 = vld [vmem:[%s3308_s29 + $0x98] sm:$0xff]  ;;  %v189_v8 = vld [vmem:[%s3308_s29 + $0xa0] sm:$0xff]  ;;  %v190_v9 = vld [vmem:[%s3308_s29 + $0xa8] sm:$0xff] }
  0x2b   : > { %5767 = vst [vmem:[#allocation19_spill] sm:$0xff] %v3444_v22  ;;  %v3456_v33 = vsel %vm233_vm0, %v252_v11, %v253_v17  ;;  %v3459_v34 = vsel %vm233_vm0, %v253_v17, 0.0  ;;  %v3462_v35 = vsel %vm233_vm0, %v255_v18, %v256_v21  ;;  %v3465_v36 = vsel %vm233_vm0, 0.0, %v255_v18 }
  0x2c   : > { %5768 = vst [vmem:[#allocation20_spill] sm:$0xff] %v3450_v28  ;;  %v426_v39 = vrot.slane %v3456_v33, 1  ;;  %v428_v40 = vrot.slane %v3459_v34, 1  ;;  %v430_v42 = vrot.slane %v3465_v36, 1  ;;  %v431_v48 = vrot.slane %v3462_v35, 1 }
  0x2d   : > { %5769 = vst [vmem:[#allocation21_spill] sm:$0xff] %v3453_v29  ;;  %v258_v52 = vrot.slane %v185_v37, 7  ;;  %v259_v53 = vrot.slane %v186_v38, 7  ;;  %v3484_v55 = vsel %vm233_vm0, %v256_v21, 0.0  ;;  %v261_v17 = vrot.slane %v187_v6, 7 }
  0x2e   : > { %5770 = vst [vmem:[#allocation22_spill] sm:$0xff] %v3456_v33  ;;  %v3481_v54 = vsel %vm392_vm1, %v426_v39, %v428_v40  ;;  %v3487_v56 = vsel %vm392_vm1, %v425_v41, %v426_v39  ;;  %v3490_v57 = vsel %vm392_vm1, %v430_v42, %v431_v48  ;;  %v433_v12 = vrot.slane %v3484_v55, 1 }
  0x2f   : > { %5771 = vst [vmem:[#allocation23_spill] sm:$0xff] %v3465_v36  ;;  %v3493_v58 = vsel %vm233_vm0, %v258_v52, %v259_v53  ;;  %v3496_v59 = vsel %vm233_vm0, 0.0, %v258_v52  ;;  %v3499_v3 = vsel %vm233_vm0, %v259_v53, 0.0  ;;  %v262_v18 = vrot.slane %v188_v7, 7  ;;  %v192_v7 = vld [vmem:[%s3308_s29 + $0xb8] sm:$0xff] }
  0x30   : > { %486 = vrot.lane.b32.xlu2 %v3409_v60, %s3221_s25  ;;  %5772 = vst [vmem:[#allocation24_spill] sm:$0xff] %v3481_v54  ;;  %v435_v10 = vrot.slane %v3496_v59, 1  ;;  %v436_v11 = vrot.slane %v3493_v58, 1  ;;  %v438_v13 = vrot.slane %v3499_v3, 1  ;;  %v264_v21 = vrot.slane %v189_v8, 7 }
  0x31   : > { %484 = vrot.lane.b32.xlu1 %v3412_v61, %s3221_s25  ;;  %488 = vrot.lane.b32.xlu0 %v3415_v62, %s3221_s25  ;;  %5773 = vst [vmem:[#allocation25_spill] sm:$0xff] %v3487_v56  ;;  %v265_v37 = vrot.slane %v190_v9, 7  ;;  %v3519_v39 = vsel %vm392_vm1, %v431_v48, %v433_v12  ;;  %v3525_v41 = vsel %vm233_vm0, %v261_v17, %v262_v18  ;;  %v3528_v42 = vsel %vm233_vm0, %v262_v18, 0.0  ;;  %v191_v48 = vld [vmem:[%s3308_s29 + $0xb0] sm:$0xff] }
  0x32   : > { %5774 = vst [vmem:[#allocation26_spill] sm:$0xff] %v3490_v57  ;;  %v3516_v38 = vsel %vm392_vm1, %v435_v10, %v436_v11  ;;  %v3522_v40 = vsel %vm392_vm1, %v436_v11, %v438_v13  ;;  %v3531_v52 = vsel %vm233_vm0, 0.0, %v261_v17  ;;  %v3537_v6 = vsel %vm233_vm0, 0.0, %v264_v21 }
  0x33   : > { %5775 = vst [vmem:[#allocation27_spill] sm:$0xff] %v3493_v58  ;;  %v3534_v53 = vsel %vm233_vm0, %v264_v21, %v265_v37  ;;  %v441_v8 = vrot.slane %v3525_v41, 1  ;;  %v443_v9 = vrot.slane %v3528_v42, 1  ;;  %v440_v10 = vrot.slane %v3531_v52, 1 }
  0x34   : > { %5776 = vst [vmem:[#allocation28_spill] sm:$0xff] %v3496_v59  ;;  %v445_v11 = vrot.slane %v3537_v6, 1  ;;  %v446_v12 = vrot.slane %v3534_v53, 1  ;;  %v267_v13 = vrot.slane %v191_v48, 7  ;;  %v268_v17 = vrot.slane %v192_v7, 7  ;;  %v193_v7 = vld [vmem:[%s3308_s29 + $0xc0] sm:$0xff] }
  0x35   : > { %5777 = vst [vmem:[#allocation29_spill] sm:$0xff] %v3516_v38  ;;  %v3553_v18 = vsel %vm392_vm1, %v441_v8, %v443_v9  ;;  %v3556_v21 = vsel %vm392_vm1, %v440_v10, %v441_v8  ;;  %v194_v9 = vld [vmem:[%s3308_s29 + $0xc8] sm:$0xff]  ;;  %v195_v8 = vld [vmem:[%s3308_s29 + $0xd0] sm:$0xff]  ;;  %v196_v10 = vld [vmem:[%s3308_s29 + $0xd8] sm:$0xff] }
  0x36   : > { %5778 = vst [vmem:[#allocation30_spill] sm:$0xff] %v3519_v39  ;;  %v3559_v0 = vsel %vm392_vm1, %v445_v11, %v446_v12  ;;  %v3562_v1 = vsel %vm233_vm0, %v267_v13, %v268_v17  ;;  %v3571_v48 = vsel %vm233_vm0, %v268_v17, 0.0 }
  0x37   : > { %5779 = vst [vmem:[#allocation31_spill] sm:$0xff] %v3522_v40  ;;  %v453_v17 = vrot.slane %v3571_v48, 1 }
  0x38   : > { %492 = vrot.lane.b32.xlu2 %v3444_v22, %s3221_s25  ;;  %5780 = vst [vmem:[#allocation32_spill] sm:$0xff] %v3537_v6 }
  0x39   : > { %490 = vrot.lane.b32.xlu1 %v3450_v28, %s3221_s25  ;;  %494 = vrot.lane.b32.xlu0 %v3453_v29, %s3221_s25  ;;  %5781 = vst [vmem:[#allocation33_spill] sm:$0xff] %v3553_v18 }
  0x3a   : > { %5782 = vst [vmem:[#allocation34_spill] sm:$0xff] %v3556_v21 }
  0x3b   : > { %5783 = vst [vmem:[#allocation35_spill] sm:$0xff] %v3559_v0 }
  0x3c   : > { %5784 = vst [vmem:[#allocation36_spill] sm:$0xff] %v3562_v1 }
  0x40   : > { %498 = vrot.lane.b32.xlu2 %v3481_v54, %s3221_s25 }
  0x41   : > { %496 = vrot.lane.b32.xlu1 %v3487_v56, %s3221_s25  ;;  %500 = vrot.lane.b32.xlu0 %v3490_v57, %s3221_s25  ;;  %v273_v57 = vrot.slane %v195_v8, 7  ;;  %v274_v56 = vrot.slane %v196_v10, 7  ;;  %v198_v10 = vld [vmem:[%s3308_s29 + $0xe8] sm:$0xff] }
  0x43   : > { %v3609_v8 = vsel %vm233_vm0, 0.0, %v273_v57  ;;  %v3640_v61 = vsel %vm233_vm0, %v274_v56, 0.0 }
  0x48   : > { %504 = vrot.lane.b32.xlu2 %v3516_v38, %s3221_s25  ;;  %v270_v38 = vrot.slane %v193_v7, 7 }
  0x49   : > { %502 = vrot.lane.b32.xlu1 %v3519_v39, %s3221_s25  ;;  %506 = vrot.lane.b32.xlu0 %v3522_v40, %s3221_s25  ;;  %v3565_v40 = vsel %vm233_vm0, 0.0, %v267_v13  ;;  %v3568_v39 = vsel %vm233_vm0, %v265_v37, 0.0  ;;  %v451_v37 = vrot.slane %v3562_v1, 1 }
  0x4a   : > { %5785 = vst [vmem:[#allocation37_spill] sm:$0xff] %v3565_v40  ;;  %v450_v11 = vrot.slane %v3565_v40, 1  ;;  %v448_v13 = vrot.slane %v3568_v39, 1  ;;  %v3603_v7 = vsel %vm233_vm0, 0.0, %v270_v38 }
  0x4b   : > { %5790 = vst [vmem:[#allocation42_spill] sm:$0xff] %v3603_v7 }
  0x4c   : > { %v3588_v54 = vsel %vm392_vm1, %v450_v11, %v451_v37  ;;  %v455_v11 = vrot.slane %v3603_v7, 1 }
  0x4d   : > { %5786 = vst [vmem:[#allocation38_spill] sm:$0xff] %v3588_v54 }
  0x50   : > { %510 = vrot.lane.b32.xlu2 %v3553_v18, %s3221_s25  ;;  %v271_v18 = vrot.slane %v194_v9, 7  ;;  %v3606_v9 = vsel %vm233_vm0, %v273_v57, %v274_v56  ;;  %v460_v57 = vrot.slane %v3609_v8, 1 }
  0x51   : > { %508 = vrot.lane.b32.xlu1 %v3556_v21, %s3221_s25  ;;  %512 = vrot.lane.b32.xlu0 %v3559_v0, %s3221_s25  ;;  %v3591_v21 = vsel %vm392_vm1, %v446_v12, %v448_v13  ;;  %v3594_v0 = vsel %vm392_vm1, %v451_v37, %v453_v17  ;;  %v197_v12 = vld [vmem:[%s3308_s29 + $0xe0] sm:$0xff]  ;;  %v461_v37 = vrot.slane %v3606_v9, 1  ;;  %v277_v17 = vrot.slane %v198_v10, 7 }
  0x52   : > { %5787 = vst [vmem:[#allocation39_spill] sm:$0xff] %v3591_v21  ;;  %v3597_v29 = vsel %vm233_vm0, %v270_v38, %v271_v18  ;;  %v3600_v28 = vsel %vm233_vm0, %v271_v18, 0.0  ;;  %v276_v13 = vrot.slane %v197_v12, 7 }
  0x53   : > { %5788 = vst [vmem:[#allocation40_spill] sm:$0xff] %v3594_v0  ;;  %v456_v38 = vrot.slane %v3597_v29, 1  ;;  %v458_v18 = vrot.slane %v3600_v28, 1  ;;  %v3643_v12 = vsel %vm233_vm0, %v277_v17, 0.0 }
  0x54   : > { %5789 = vst [vmem:[#allocation41_spill] sm:$0xff] %v3597_v29  ;;  %v3634_v22 = vsel %vm233_vm0, %v276_v13, %v277_v17  ;;  %v3637_v62 = vsel %vm233_vm0, 0.0, %v276_v13  ;;  %v468_v56 = vrot.slane %v3643_v12, 1  ;;  %v566_v17 = vrot.slane %v3323_v16, 2 }
  0x55   : > { %5793 = vst [vmem:[#allocation45_spill] sm:$0xff] %v3634_v22  ;;  %v465_v10 = vrot.slane %v3637_v62, 1 }
  0x56   : > { %5794 = vst [vmem:[#allocation46_spill] sm:$0xff] %v3637_v62 }
  0x58   : > { %516 = vrot.lane.b32.xlu2 %v3588_v54, %s3221_s25  ;;  %v3625_v54 = vsel %vm392_vm1, %v456_v38, %v458_v18  ;;  %v463_v18 = vrot.slane %v3640_v61, 1 }
  0x59   : > { %514 = vrot.lane.b32.xlu1 %v3591_v21, %s3221_s25  ;;  %518 = vrot.lane.b32.xlu0 %v3594_v0, %s3221_s25  ;;  %5791 = vst [vmem:[#allocation43_spill] sm:$0xff] %v3625_v54  ;;  %v3628_v21 = vsel %vm392_vm1, %v455_v11, %v456_v38  ;;  %v3631_v0 = vsel %vm392_vm1, %v460_v57, %v461_v37  ;;  %v466_v38 = vrot.slane %v3634_v22, 1 }
  0x5a   : > { %5792 = vst [vmem:[#allocation44_spill] sm:$0xff] %v3628_v21  ;;  %v3659_v57 = vsel %vm392_vm1, %v461_v37, %v463_v18  ;;  %v569_v37 = vrot.slane %v3331_v20, 2  ;;  %v572_v20 = vrot.slane %v3317_v14, 2 }
  0x5b   : > { %v3656_v11 = vsel %vm392_vm1, %v465_v10, %v466_v38  ;;  %v3662_v13 = vsel %vm392_vm1, %v466_v38, %v468_v56  ;;  %v567_v10 = vrot.slane %v3328_v19, 2  ;;  %v5798_v38 = vmov 0.0  }
  0x5c   : > { %5795 = vst [vmem:[#allocation47_spill] sm:$0xff] %v3656_v11  ;;  %v3677_v56 = vrot.slane %v5798_v38, 2  ;;  %v571_v38 = vrot.slane %v3346_v27, 2 }
  0x5d   : > { %5796 = vst [vmem:[#allocation48_spill] sm:$0xff] %v3662_v13  ;;  %v3674_v18 = vsel %vm563_vm2, %v566_v17, %v567_v10  ;;  %v574_v17 = vrot.slane %v3320_v15, 2  ;;  %v581_v15 = vrot.slane %v3388_v49, 2 }
  0x5e   : > { %5797 = vst [vmem:[#allocation49_spill] sm:$0xff] %v3674_v18 }
  0x5f   : > { %5799 = vst [vmem:[#allocation50_spill] sm:$0xff] %v3677_v56 }
  0x60   : > { %522 = vrot.lane.b32.xlu2 %v3625_v54, %s3221_s25 }
  0x61   : > { %520 = vrot.lane.b32.xlu1 %v3628_v21, %s3221_s25  ;;  %524 = vrot.lane.b32.xlu0 %v3631_v0, %s3221_s25 }
  0x68   : > { %528 = vrot.lane.b32.xlu2 %v3656_v11, %s3221_s25  ;;  %v3680_v11 = vsel %vm563_vm2, %v567_v10, %v569_v37  ;;  %v577_v10 = vrot.slane %v3337_v24, 2  ;;  %v3694_v37 = vsel %vm563_vm2, %v572_v20, %v574_v17  ;;  %v582_v17 = vrot.slane %v3381_v46, 2 }
  0x69   : > { %526 = vrot.lane.b32.xlu1 %v3659_v57, %s3221_s25  ;;  %530 = vrot.lane.b32.xlu0 %v3662_v13, %s3221_s25  ;;  %5800 = vst [vmem:[#allocation51_spill] sm:$0xff] %v3680_v11  ;;  %v576_v13 = vrot.slane %v3343_v26, 2  ;;  %s3170_s25 = sshra.s32 %s2853_s20, 4  ;;  %s3171_s25 = int_to_ptr.hbm [resolvable:$true] %s3170_s25 }
  0x6a   : > { %5801 = vst [vmem:[#allocation52_spill] sm:$0xff] %v3694_v37  ;;  %s3172_s26 = scalar_lea.hbm %s3171_s25, 64  ;;  %p3177_p0 = scmp.lt.s32.totalorder %s3171_s25, %s5624_s3 }
  0x6b   : > { %p3173_p11 = scmp.ne.s32.totalorder %s3171_s25, %s3172_s26 }
  0x6d   : > { %p3174_p12 = pnand %p3173_p11, %p3288_p5 }
  0x6f   : > { %p3175_p13 = pneg %p3174_p12 }
  0x70   : > { %643 = vrot.lane.b32.xlu2 %v3674_v18, %s3222_s30  ;;  %v3697_v18 = vsel %vm563_vm2, %v571_v38, %v572_v20  ;;  %v579_v38 = vrot.slane %v3359_v32, 2  ;;  %v3715_v20 = vsel %vm563_vm2, %v581_v15, %v582_v17  ;;  %v587_v32 = vrot.slane %v3391_v50, 2 }
  0x71   : > { %641 = vrot.lane.b32.xlu1 %v3677_v56, %s3222_s30  ;;  %645 = vrot.lane.b32.xlu0 %v3680_v11, %s3222_s30  ;;  %5802 = vst [vmem:[#allocation53_spill] sm:$0xff] %v3697_v18  ;;  %v3700_v56 = vsel %vm563_vm2, %v576_v13, %v577_v10  ;;  %v584_v13 = vrot.slane %v3384_v47, 2  ;;  %v589_v47 = vrot.slane %v3425_v4, 2 }
  0x72   : > { %5803 = vst [vmem:[#allocation54_spill] sm:$0xff] %v3700_v56 }
  0x73   : > { %5805 = vst [vmem:[#allocation56_spill] sm:$0xff] %v3715_v20 }
  0x78   : > { %649 = vrot.lane.b32.xlu2 %v3694_v37, %s3222_s30  ;;  %v3718_v37 = vsel %vm563_vm2, %v577_v10, %v579_v38  ;;  %v586_v10 = vrot.slane %v3394_v51, 2  ;;  %v592_v38 = vrot.slane %v3418_v63, 2 }
  0x79   : > { %647 = vrot.lane.b32.xlu1 %v3697_v18, %s3222_s30  ;;  %651 = vrot.lane.b32.xlu0 %v3700_v56, %s3222_s30  ;;  %5806 = vst [vmem:[#allocation57_spill] sm:$0xff] %v3718_v37  ;;  %v3721_v18 = vsel %vm563_vm2, %v582_v17, %v584_v13  ;;  %v591_v17 = vrot.slane %v3421_v2, 2  ;;  %v3737_v13 = vsel %vm563_vm2, %v587_v32, %v589_v47  ;;  %v596_v47 = vrot.slane %v3447_v23, 2 }
  0x7a   : > { %v3710_v11 = vpop.permute.xlu2 %478  ;;  %5807 = vst [vmem:[#allocation58_spill] sm:$0xff] %v3721_v18 }
  0x7b   : > { %5804 = vst [vmem:[#allocation55_spill] sm:$0xff] %v3710_v11  ;;  %v3740_v11 = vsel %vm563_vm2, %v586_v10, %v587_v32  ;;  %v594_v10 = vrot.slane %v3428_v5, 2  ;;  %v602_v5 = vrot.slane %v3462_v35, 2 }
  0x7c   : > { %5809 = vst [vmem:[#allocation60_spill] sm:$0xff] %v3737_v13 }
  0x7d   : > { %5810 = vst [vmem:[#allocation61_spill] sm:$0xff] %v3740_v11 }
  0x80   : > { %655 = vrot.lane.b32.xlu2 %v3715_v20, %s3222_s30 }
  0x81   : > { %653 = vrot.lane.b32.xlu1 %v3718_v37, %s3222_s30  ;;  %657 = vrot.lane.b32.xlu0 %v3721_v18, %s3222_s30  ;;  %v3743_v18 = vsel %vm563_vm2, %v591_v17, %v592_v38  ;;  %v599_v17 = vrot.slane %v3459_v34, 2  ;;  %v604_v34 = vrot.slane %v3484_v55, 2 }
  0x82   : > { %v3731_v15 = vpop.permute.xlu2 %480  ;;  %5811 = vst [vmem:[#allocation62_spill] sm:$0xff] %v3743_v18 }
  0x83   : > { %5808 = vst [vmem:[#allocation59_spill] sm:$0xff] %v3731_v15  ;;  %v597_v15 = vrot.slane %v3456_v33, 2 }
  0x88   : > { %661 = vrot.lane.b32.xlu2 %v3737_v13, %s3222_s30  ;;  %v3751_v4 = vpop.permute.xlu0 %470  ;;  %v3760_v13 = vsel %vm563_vm2, %v596_v47, %v597_v15 }
  0x89   : > { %659 = vrot.lane.b32.xlu1 %v3740_v11, %s3222_s30  ;;  %663 = vrot.lane.b32.xlu0 %v3743_v18, %s3222_s30  ;;  %5812 = vst [vmem:[#allocation63_spill] sm:$0xff] %v3751_v4  ;;  %v3763_v11 = vsel %vm563_vm2, %v592_v38, %v594_v10  ;;  %v3766_v18 = vsel %vm563_vm2, %v597_v15, %v599_v17  ;;  %v601_v38 = vrot.slane %v3465_v36, 2  ;;  %v606_v15 = vrot.slane %v3496_v59, 2 }
  0x8a   : > { %v3755_v32 = vpop.permute.xlu2 %486  ;;  %5814 = vst [vmem:[#allocation65_spill] sm:$0xff] %v3760_v13  ;;  %v607_v10 = vrot.slane %v3493_v58, 2 }
  0x8b   : > { %5813 = vst [vmem:[#allocation64_spill] sm:$0xff] %v3755_v32  ;;  %v3786_v32 = vsel %vm563_vm2, %v602_v5, %v604_v34  ;;  %v612_v34 = vrot.slane %v3525_v41, 2 }
  0x8c   : > { %5815 = vst [vmem:[#allocation66_spill] sm:$0xff] %v3763_v11  ;;  %v3792_v55 = vsel %vm563_vm2, %v606_v15, %v607_v10 }
  0x8d   : > { %5816 = vst [vmem:[#allocation67_spill] sm:$0xff] %v3766_v18 }
  0x8e   : > { %5820 = vst [vmem:[#allocation71_spill] sm:$0xff] %v3786_v32 }
  0x8f   : > { %5822 = vst [vmem:[#allocation73_spill] sm:$0xff] %v3792_v55 }
  0x90   : > { %667 = vrot.lane.b32.xlu2 %v3760_v13, %s3222_s30 }
  0x91   : > { %665 = vrot.lane.b32.xlu1 %v3763_v11, %s3222_s30  ;;  %669 = vrot.lane.b32.xlu0 %v3766_v18, %s3222_s30  ;;  %v3789_v18 = vsel %vm563_vm2, %v601_v38, %v602_v5  ;;  %v609_v5 = vrot.slane %v3499_v3, 2  ;;  %v614_v38 = vrot.slane %v3528_v42, 2  ;;  %v617_v3 = vrot.slane %v3534_v53, 2 }
  0x92   : > { %v3776_v47 = vpop.permute.xlu2 %492  ;;  %5821 = vst [vmem:[#allocation72_spill] sm:$0xff] %v3789_v18  ;;  %v619_v42 = vrot.slane %v3568_v39, 2 }
  0x93   : > { %5817 = vst [vmem:[#allocation68_spill] sm:$0xff] %v3776_v47  ;;  %v3781_v17 = vpop.permute.xlu1 %474  ;;  %v3783_v4 = vpop.permute.xlu0 %472 }
  0x94   : > { %5818 = vst [vmem:[#allocation69_spill] sm:$0xff] %v3781_v17 }
  0x95   : > { %5819 = vst [vmem:[#allocation70_spill] sm:$0xff] %v3783_v4  ;;  %v611_v4 = vrot.slane %v3531_v52, 2 }
  0x98   : > { %673 = vrot.lane.b32.xlu2 %v3786_v32, %s3222_s30  ;;  %v3811_v32 = vsel %vm563_vm2, %v611_v4, %v612_v34 }
  0x99   : > { %671 = vrot.lane.b32.xlu1 %v3789_v18, %s3222_s30  ;;  %675 = vrot.lane.b32.xlu0 %v3792_v55, %s3222_s30  ;;  %v3814_v18 = vsel %vm563_vm2, %v607_v10, %v609_v5  ;;  %v3817_v55 = vsel %vm563_vm2, %v612_v34, %v614_v38  ;;  %v616_v10 = vrot.slane %v3537_v6, 2  ;;  %v621_v34 = vrot.slane %v3565_v40, 2 }
  0x9a   : > { %v3802_v17 = vpop.permute.xlu2 %498  ;;  %5826 = vst [vmem:[#allocation77_spill] sm:$0xff] %v3814_v18  ;;  %v622_v5 = vrot.slane %v3562_v1, 2 }
  0x9b   : > { %5823 = vst [vmem:[#allocation74_spill] sm:$0xff] %v3802_v17  ;;  %v3806_v15 = vpop.permute.xlu1 %476  ;;  %v3808_v47 = vpop.permute.xlu0 %482  ;;  %v3840_v17 = vsel %vm563_vm2, %v616_v10, %v617_v3  ;;  %v629_v10 = vrot.slane %v3600_v28, 2  ;;  %v632_v28 = vrot.slane %v3606_v9, 2 }
  0x9c   : > { %5824 = vst [vmem:[#allocation75_spill] sm:$0xff] %v3806_v15  ;;  %v3837_v15 = vsel %vm563_vm2, %v617_v3, %v619_v42  ;;  %v3843_v39 = vsel %vm563_vm2, %v621_v34, %v622_v5  ;;  %v627_v42 = vrot.slane %v3597_v29, 2  ;;  %v624_v3 = vrot.slane %v3571_v48, 2 }
  0x9d   : > { %5825 = vst [vmem:[#allocation76_spill] sm:$0xff] %v3808_v47  ;;  %v634_v48 = vrot.slane %v3640_v61, 2 }
  0x9e   : > { %5827 = vst [vmem:[#allocation78_spill] sm:$0xff] %v3817_v55 }
  0x9f   : > { %5831 = vst [vmem:[#allocation82_spill] sm:$0xff] %v3837_v15 }
  0xa0   : > { %679 = vrot.lane.b32.xlu2 %v3811_v32, %s3222_s30  ;;  %5832 = vst [vmem:[#allocation83_spill] sm:$0xff] %v3840_v17 }
  0xa1   : > { %677 = vrot.lane.b32.xlu1 %v3814_v18, %s3222_s30  ;;  %681 = vrot.lane.b32.xlu0 %v3817_v55, %s3222_s30  ;;  %5833 = vst [vmem:[#allocation84_spill] sm:$0xff] %v3843_v39  ;;  %v3865_v55 = vsel %vm563_vm2, %v622_v5, %v624_v3  ;;  %v631_v5 = vrot.slane %v3609_v8, 2  ;;  %v637_v3 = vrot.slane %v3634_v22, 2 }
  0xa2   : > { %v3827_v4 = vpop.permute.xlu2 %504  ;;  %5838 = vst [vmem:[#allocation89_spill] sm:$0xff] %v3865_v55 }
  0xa3   : > { %5828 = vst [vmem:[#allocation79_spill] sm:$0xff] %v3827_v4  ;;  %v3832_v38 = vpop.permute.xlu1 %484  ;;  %v3834_v47 = vpop.permute.xlu0 %488 }
  0xa4   : > { %5829 = vst [vmem:[#allocation80_spill] sm:$0xff] %v3832_v38  ;;  %v626_v38 = vrot.slane %v3603_v7, 2 }
  0xa5   : > { %5830 = vst [vmem:[#allocation81_spill] sm:$0xff] %v3834_v47 }
  0xa8   : > { %685 = vrot.lane.b32.xlu2 %v3837_v15, %s3222_s30  ;;  %v3862_v15 = vsel %vm563_vm2, %v626_v38, %v627_v42 }
  0xa9   : > { %683 = vrot.lane.b32.xlu1 %v3840_v17, %s3222_s30  ;;  %687 = vrot.lane.b32.xlu0 %v3843_v39, %s3222_s30  ;;  %5837 = vst [vmem:[#allocation88_spill] sm:$0xff] %v3862_v15  ;;  %v3868_v39 = vsel %vm563_vm2, %v627_v42, %v629_v10  ;;  %v636_v42 = vrot.slane %v3637_v62, 2 }
  0xaa   : > { %v3853_v4 = vpop.permute.xlu2 %510  ;;  %5839 = vst [vmem:[#allocation90_spill] sm:$0xff] %v3868_v39 }
  0xab   : > { %5834 = vst [vmem:[#allocation85_spill] sm:$0xff] %v3853_v4  ;;  %v3857_v34 = vpop.permute.xlu1 %490  ;;  %v3859_v47 = vpop.permute.xlu0 %494  ;;  %v3894_v61 = vsel %vm563_vm2, %v636_v42, %v637_v3 }
  0xac   : > { %5835 = vst [vmem:[#allocation86_spill] sm:$0xff] %v3857_v34  ;;  %v3891_v34 = vsel %vm563_vm2, %v631_v5, %v632_v28 }
  0xad   : > { %5836 = vst [vmem:[#allocation87_spill] sm:$0xff] %v3859_v47  ;;  %v3888_v47 = vsel %vm563_vm2, %v632_v28, %v634_v48  ;;  %v639_v48 = vrot.slane %v3643_v12, 2 }
  0xaf   : > { %v3910_v5 = vsel %vm563_vm2, %v637_v3, %v639_v48 }
  0xb0   : > { %691 = vrot.lane.b32.xlu2 %v3862_v15, %s3222_s30  ;;  %5844 = vst [vmem:[#allocation95_spill] sm:$0xff] %v3910_v5 }
  0xb1   : > { %689 = vrot.lane.b32.xlu1 %v3865_v55, %s3222_s30  ;;  %693 = vrot.lane.b32.xlu0 %v3868_v39, %s3222_s30 }
  0xb2   : > { %v3878_v38 = vpop.permute.xlu2 %516 }
  0xb3   : > { %5840 = vst [vmem:[#allocation91_spill] sm:$0xff] %v3878_v38  ;;  %v3883_v10 = vpop.permute.xlu1 %496  ;;  %v3885_v4 = vpop.permute.xlu0 %500 }
  0xb4   : > { %5841 = vst [vmem:[#allocation92_spill] sm:$0xff] %v3885_v4 }
  0xb8   : > { %697 = vrot.lane.b32.xlu2 %v3888_v47, %s3222_s30 }
  0xb9   : > { %695 = vrot.lane.b32.xlu1 %v3891_v34, %s3222_s30  ;;  %699 = vrot.lane.b32.xlu0 %v3894_v61, %s3222_s30 }
  0xba   : > { %v3902_v38 = vpop.permute.xlu2 %522 }
  0xbb   : > { %5842 = vst [vmem:[#allocation93_spill] sm:$0xff] %v3902_v38  ;;  %v3905_v4 = vpop.permute.xlu1 %502  ;;  %v3907_v28 = vpop.permute.xlu0 %506 }
  0xbc   : > { %5843 = vst [vmem:[#allocation94_spill] sm:$0xff] %v3907_v28 }
  0xc0   : > { %735 = vrot.lane.b32.xlu2 %v3323_v16, %s3223_s4 }
  0xc1   : > { %701 = vrot.lane.b32.xlu1 %v3910_v5, %s3222_s30  ;;  %737 = vrot.lane.b32.xlu0 %v3328_v19, %s3223_s4 }
  0xc2   : > { %v3918_v42 = vpop.permute.xlu2 %528 }
  0xc3   : > { %5845 = vst [vmem:[#allocation96_spill] sm:$0xff] %v3918_v42  ;;  %v3920_v12 = vpop.permute.xlu1 %508  ;;  %v3922_v38 = vpop.permute.xlu0 %512 }
  0xc4   : > { %5846 = vst [vmem:[#allocation97_spill] sm:$0xff] %v3922_v38 }
  0xc8   : > { %741 = vrot.lane.b32.xlu2 %v3317_v14, %s3223_s4 }
  0xc9   : > { %739 = vrot.lane.b32.xlu1 %v3346_v27, %s3223_s4  ;;  %743 = vrot.lane.b32.xlu0 %v3343_v26, %s3223_s4 }
  0xca   : > { %v3930_v3 = vpop.permute.xlu2 %643 }
  0xcb   : > { %5847 = vst [vmem:[#allocation98_spill] sm:$0xff] %v3930_v3  ;;  %v3932_v48 = vpop.permute.xlu1 %514  ;;  %v3934_v16 = vpop.permute.xlu0 %518 }
  0xcc   : > { %5848 = vst [vmem:[#allocation99_spill] sm:$0xff] %v3934_v16 }
  0xd0   : > { %747 = vrot.lane.b32.xlu2 %v3388_v49, %s3223_s4 }
  0xd1   : > { %745 = vrot.lane.b32.xlu1 %v3337_v24, %s3223_s4  ;;  %749 = vrot.lane.b32.xlu0 %v3381_v46, %s3223_s4 }
  0xd2   : > { %v3942_v42 = vpop.permute.xlu2 %649 }
  0xd3   : > { %5849 = vst [vmem:[#allocation100_spill] sm:$0xff] %v3942_v42  ;;  %v3944_v19 = vpop.permute.xlu1 %520  ;;  %v3946_v38 = vpop.permute.xlu0 %524 }
  0xd4   : > { %5850 = vst [vmem:[#allocation101_spill] sm:$0xff] %v3944_v19 }
  0xd5   : > { %5851 = vst [vmem:[#allocation102_spill] sm:$0xff] %v3946_v38 }
  0xd8   : > { %753 = vrot.lane.b32.xlu2 %v3391_v50, %s3223_s4 }
  0xd9   : > { %751 = vrot.lane.b32.xlu1 %v3394_v51, %s3223_s4  ;;  %755 = vrot.lane.b32.xlu0 %v3421_v2, %s3223_s4 }
  0xda   : > { %v3954_v3 = vpop.permute.xlu2 %655 }
  0xdb   : > { %5852 = vst [vmem:[#allocation103_spill] sm:$0xff] %v3954_v3  ;;  %v3956_v16 = vpop.permute.xlu1 %526  ;;  %v3958_v28 = vpop.permute.xlu0 %530 }
  0xdc   : > { %5853 = vst [vmem:[#allocation104_spill] sm:$0xff] %v3956_v16 }
  0xdd   : > { %5854 = vst [vmem:[#allocation105_spill] sm:$0xff] %v3958_v28 }
  0xe0   : > { %759 = vrot.lane.b32.xlu2 %v3447_v23, %s3223_s4 }
  0xe1   : > { %757 = vrot.lane.b32.xlu1 %v3418_v63, %s3223_s4  ;;  %761 = vrot.lane.b32.xlu0 %v3456_v33, %s3223_s4 }
  0xe2   : > { %v3966_v42 = vpop.permute.xlu2 %661 }
  0xe3   : > { %v3968_v38 = vpop.permute.xlu1 %641  ;;  %v3970_v19 = vpop.permute.xlu0 %645 }
  0xe4   : > { %5855 = vst [vmem:[#allocation106_spill] sm:$0xff] %v3968_v38 }
  0xe5   : > { %5856 = vst [vmem:[#allocation107_spill] sm:$0xff] %v3970_v19 }
  0xe8   : > { %765 = vrot.lane.b32.xlu2 %v3462_v35, %s3223_s4 }
  0xe9   : > { %763 = vrot.lane.b32.xlu1 %v3465_v36, %s3223_s4  ;;  %767 = vrot.lane.b32.xlu0 %v3496_v59, %s3223_s4  ;;  %v4022_v59 = vld [vmem:[%s3308_s29 + $0xf8] sm:$0xff] }
  0xea   : > { %v3978_v3 = vpop.permute.xlu2 %667 }
  0xeb   : > { %v3980_v28 = vpop.permute.xlu1 %647  ;;  %v3982_v16 = vpop.permute.xlu0 %651 }
  0xec   : > { %5857 = vst [vmem:[#allocation108_spill] sm:$0xff] %v3980_v28 }
  0xed   : > { %5858 = vst [vmem:[#allocation109_spill] sm:$0xff] %v3982_v16 }
  0xf0   : > { %771 = vrot.lane.b32.xlu2 %v3531_v52, %s3223_s4 }
  0xf1   : > { %769 = vrot.lane.b32.xlu1 %v3493_v58, %s3223_s4  ;;  %773 = vrot.lane.b32.xlu0 %v3525_v41, %s3223_s4 }
  0xf2   : > { %v3990_v38 = vpop.permute.xlu2 %673 }
  0xf3   : > { %v3992_v19 = vpop.permute.xlu1 %653  ;;  %v3994_v36 = vpop.permute.xlu0 %657 }
  0xf4   : > { %5859 = vst [vmem:[#allocation110_spill] sm:$0xff] %v3992_v19 }
  0xf5   : > { %5860 = vst [vmem:[#allocation111_spill] sm:$0xff] %v3994_v36 }
  0xf8   : > { %777 = vrot.lane.b32.xlu2 %v3534_v53, %s3223_s4 }
  0xf9   : > { %775 = vrot.lane.b32.xlu1 %v3537_v6, %s3223_s4  ;;  %779 = vrot.lane.b32.xlu0 %v3565_v40, %s3223_s4  ;;  %v199_v6 = vld [vmem:[%s3308_s29 + $0xf0] sm:$0xff]  ;;  %s3176_s29 = scalar_lea.hbm %s5624_s3, 128 }
  0xfa   : > { %v4002_v28 = vpop.permute.xlu2 %679  ;;  %p3178_p1 = scmp.lt.s32.totalorder %s3176_s29, %s3172_s26 }
  0xfb   : > { %v4004_v16 = vpop.permute.xlu1 %659  ;;  %v4006_v58 = vpop.permute.xlu0 %663 }
  0xfc   : > { %p3179_p2 = por %p3178_p1, %p3177_p0 }
  0xfe   : > { %p3180_p3 = pnand %p3179_p2, %p3175_p13 }
 0x100   : > { %783 = vrot.lane.b32.xlu2 %v3603_v7, %s3223_s4  ;;  %v5717_v7 = vrot.slane %v4022_v59, 7 }
 0x101   : > { %781 = vrot.lane.b32.xlu1 %v3562_v1, %s3223_s4  ;;  %785 = vrot.lane.b32.xlu0 %v3597_v29, %s3223_s4  ;;  %v279_v1 = vrot.slane %v199_v6, 7 }
 0x102   : > { %v4014_v19 = vpop.permute.xlu2 %685 }
 0x103   : > { %5861 = vst [vmem:[#allocation112_spill] sm:$0xff] %v4014_v19  ;;  %v4016_v36 = vpop.permute.xlu1 %665  ;;  %v4018_v40 = vpop.permute.xlu0 %669  ;;  %v4038_v19 = vsel %vm233_vm0, 0.0, %v279_v1  ;;  %v4043_v33 = vsel %vm233_vm0, %v279_v1, %v5717_v7 }
 0x104   : > { %5862 = vst [vmem:[#allocation113_spill] sm:$0xff] %v4016_v36 }
 0x105   : > { %5863 = vst [vmem:[#allocation114_spill] sm:$0xff] %v4018_v40 }
 0x106   : > { %5867 = vst [vmem:[#allocation118_spill] sm:$0xff] %v4038_v19 }
 0x107   : > { %5868 = vst [vmem:[#allocation119_spill] sm:$0xff] %v4043_v33 }
 0x108   : > { %789 = vrot.lane.b32.xlu2 %v3606_v9, %s3223_s4 }
 0x109   : > { %787 = vrot.lane.b32.xlu1 %v3609_v8, %s3223_s4  ;;  %791 = vrot.lane.b32.xlu0 %v3637_v62, %s3223_s4 }
 0x10a   : > { %v4030_v29 = vpop.permute.xlu2 %691 }
 0x10b   : > { %5864 = vst [vmem:[#allocation115_spill] sm:$0xff] %v4030_v29  ;;  %v4033_v36 = vpop.permute.xlu1 %671  ;;  %v4035_v40 = vpop.permute.xlu0 %675 }
 0x10c   : > { %5865 = vst [vmem:[#allocation116_spill] sm:$0xff] %v4033_v36  ;;  %v5905_v36 = vld [vmem:[#allocation38_spill] sm:$0xff] }
 0x10d   : > { %5866 = vst [vmem:[#allocation117_spill] sm:$0xff] %v4035_v40 }
 0x110   : > { %795 = vrot.lane.b32.xlu2 %v4038_v19, %s3223_s4 }
 0x111   : > { %793 = vrot.lane.b32.xlu1 %v3634_v22, %s3223_s4  ;;  %797 = vrot.lane.b32.xlu0 %v4043_v33, %s3223_s4 }
 0x112   : > { %v4051_v6 = vpop.permute.xlu2 %697 }
 0x113   : > { %5869 = vst [vmem:[#allocation120_spill] sm:$0xff] %v4051_v6  ;;  %v4053_v62 = vpop.permute.xlu1 %677  ;;  %v4055_v40 = vpop.permute.xlu0 %681 }
 0x114   : > { %5870 = vst [vmem:[#allocation121_spill] sm:$0xff] %v4053_v62 }
 0x115   : > { %5871 = vst [vmem:[#allocation122_spill] sm:$0xff] %v4055_v40 }
 0x118   : > { %839 = vrot.lane.b32.xlu2 %v3353_v30, %s3224_s5 }
 0x119   : > { %837 = vrot.lane.b32.xlu1 %v3356_v31, %s3224_s5  ;;  %841 = vrot.lane.b32.xlu0 %v3375_v44, %s3224_s5 }
 0x11a   : > { %v4063_v1 = vpop.permute.xlu2 %735 }
 0x11b   : > { %5872 = vst [vmem:[#allocation123_spill] sm:$0xff] %v4063_v1  ;;  %v4065_v7 = vpop.permute.xlu1 %683  ;;  %v4067_v22 = vpop.permute.xlu0 %687  ;;  %v5878_v1 = vld [vmem:[#allocation17_spill] sm:$0xff] }
 0x11c   : > { %5873 = vst [vmem:[#allocation124_spill] sm:$0xff] %v4065_v7 }
 0x11d   : > { %5874 = vst [vmem:[#allocation125_spill] sm:$0xff] %v4067_v22  ;;  %v5879_v22 = vld [vmem:[#allocation18_spill] sm:$0xff] }
 0x120   : > { %845 = vrot.lane.b32.xlu2 %v3372_v43, %s3224_s5 }
 0x121   : > { %843 = vrot.lane.b32.xlu1 %v3340_v25, %s3224_s5  ;;  %847 = vrot.lane.b32.xlu0 %v3378_v45, %s3224_s5 }
 0x122   : > { %v4075_v30 = vpop.permute.xlu2 %741 }
 0x123   : > { %5875 = vst [vmem:[#allocation126_spill] sm:$0xff] %v4075_v30  ;;  %v4077_v31 = vpop.permute.xlu1 %689  ;;  %v4079_v40 = vpop.permute.xlu0 %693  ;;  %v5883_v30 = vld [vmem:[#allocation19_spill] sm:$0xff] }
 0x124   : > { %5876 = vst [vmem:[#allocation127_spill] sm:$0xff] %v4077_v31 }
 0x125   : > { %5877 = vst [vmem:[#allocation128_spill] sm:$0xff] %v4079_v40  ;;  %v5884_v40 = vld [vmem:[#allocation20_spill] sm:$0xff] }
 0x128   : > { %851 = vrot.lane.b32.xlu2 %v3409_v60, %s3224_s5  ;;  %v5885_v60 = vld [vmem:[#allocation21_spill] sm:$0xff] }
 0x129   : > { %849 = vrot.lane.b32.xlu1 %v5878_v1, %s3224_s5  ;;  %853 = vrot.lane.b32.xlu0 %v5879_v22, %s3224_s5 }
 0x12a   : > { %v4087_v43 = vpop.permute.xlu2 %747 }
 0x12b   : > { %5880 = vst [vmem:[#allocation129_spill] sm:$0xff] %v4087_v43  ;;  %v4089_v7 = vpop.permute.xlu1 %695  ;;  %v4091_v45 = vpop.permute.xlu0 %699  ;;  %v5889_v43 = vld [vmem:[#allocation24_spill] sm:$0xff] }
 0x12c   : > { %5881 = vst [vmem:[#allocation130_spill] sm:$0xff] %v4089_v7  ;;  %v5891_v7 = vld [vmem:[#allocation26_spill] sm:$0xff] }
 0x12d   : > { %5882 = vst [vmem:[#allocation131_spill] sm:$0xff] %v4091_v45  ;;  %v5890_v45 = vld [vmem:[#allocation25_spill] sm:$0xff] }
 0x130   : > { %857 = vrot.lane.b32.xlu2 %v5883_v30, %s3224_s5 }
 0x131   : > { %855 = vrot.lane.b32.xlu1 %v5884_v40, %s3224_s5  ;;  %859 = vrot.lane.b32.xlu0 %v5885_v60, %s3224_s5  ;;  %v5900_v60 = vld [vmem:[#allocation33_spill] sm:$0xff] }
 0x132   : > { %v4099_v31 = vpop.permute.xlu2 %753 }
 0x133   : > { %5886 = vst [vmem:[#allocation19_spill] sm:$0xff] %v4099_v31  ;;  %v4101_v1 = vpop.permute.xlu1 %701  ;;  %v4103_v22 = vpop.permute.xlu0 %737  ;;  %v5894_v31 = vld [vmem:[#allocation29_spill] sm:$0xff] }
 0x134   : > { %5887 = vst [vmem:[#allocation132_spill] sm:$0xff] %v4101_v1 }
 0x135   : > { %5888 = vst [vmem:[#allocation133_spill] sm:$0xff] %v4103_v22  ;;  %v5895_v22 = vld [vmem:[#allocation30_spill] sm:$0xff] }
 0x138   : > { %863 = vrot.lane.b32.xlu2 %v5889_v43, %s3224_s5  ;;  %v5896_v43 = vld [vmem:[#allocation31_spill] sm:$0xff] }
 0x139   : > { %861 = vrot.lane.b32.xlu1 %v5890_v45, %s3224_s5  ;;  %865 = vrot.lane.b32.xlu0 %v5891_v7, %s3224_s5 }
 0x13a   : > { %v4111_v62 = vpop.permute.xlu2 %759 }
 0x13b   : > { %v4113_v40 = vpop.permute.xlu1 %739  ;;  %v4115_v6 = vpop.permute.xlu0 %743 }
 0x13c   : > { %5892 = vst [vmem:[#allocation134_spill] sm:$0xff] %v4113_v40 }
 0x13d   : > { %5893 = vst [vmem:[#allocation135_spill] sm:$0xff] %v4115_v6  ;;  %v5901_v6 = vld [vmem:[#allocation34_spill] sm:$0xff] }
 0x140   : > { %869 = vrot.lane.b32.xlu2 %v5894_v31, %s3224_s5  ;;  %v5902_v31 = vld [vmem:[#allocation35_spill] sm:$0xff] }
 0x141   : > { %867 = vrot.lane.b32.xlu1 %v5895_v22, %s3224_s5  ;;  %871 = vrot.lane.b32.xlu0 %v5896_v43, %s3224_s5 }
 0x142   : > { %v4123_v1 = vpop.permute.xlu2 %765 }
 0x143   : > { %5897 = vst [vmem:[#allocation136_spill] sm:$0xff] %v4123_v1  ;;  %v4125_v45 = vpop.permute.xlu1 %745  ;;  %v4127_v7 = vpop.permute.xlu0 %749 }
 0x144   : > { %5898 = vst [vmem:[#allocation137_spill] sm:$0xff] %v4125_v45  ;;  %v5907_v45 = vld [vmem:[#allocation40_spill] sm:$0xff] }
 0x145   : > { %5899 = vst [vmem:[#allocation138_spill] sm:$0xff] %v4127_v7  ;;  %v5906_v7 = vld [vmem:[#allocation39_spill] sm:$0xff] }
 0x148   : > { %875 = vrot.lane.b32.xlu2 %v5900_v60, %s3224_s5 }
 0x149   : > { %873 = vrot.lane.b32.xlu1 %v5901_v6, %s3224_s5  ;;  %877 = vrot.lane.b32.xlu0 %v5902_v31, %s3224_s5 }
 0x14a   : > { %v4135_v40 = vpop.permute.xlu2 %771 }
 0x14b   : > { %5903 = vst [vmem:[#allocation34_spill] sm:$0xff] %v4135_v40  ;;  %v4137_v22 = vpop.permute.xlu1 %751  ;;  %v4139_v43 = vpop.permute.xlu0 %755  ;;  %v5913_v40 = vld [vmem:[#allocation47_spill] sm:$0xff] }
 0x14c   : > { %5904 = vst [vmem:[#allocation139_spill] sm:$0xff] %v4137_v22 }
 0x150   : > { %881 = vrot.lane.b32.xlu2 %v5905_v36, %s3224_s5 }
 0x151   : > { %879 = vrot.lane.b32.xlu1 %v5906_v7, %s3224_s5  ;;  %883 = vrot.lane.b32.xlu0 %v5907_v45, %s3224_s5  ;;  %v5912_v7 = vrot.slane %v4022_v59, 7  ;;  %v832_v59 = vrot.slane %v4038_v19, 1 }
 0x152   : > { %v4147_v25 = vpop.permute.xlu2 %777 }
 0x153   : > { %5908 = vst [vmem:[#allocation140_spill] sm:$0xff] %v4147_v25  ;;  %v4149_v29 = vpop.permute.xlu1 %757  ;;  %v4151_v31 = vpop.permute.xlu0 %761  ;;  %v4168_v25 = vsel %vm233_vm0, %v5912_v7, 0.0  ;;  %vm2764_vm0 = vcmask 1044484  }
 0x154   : > { %5909 = vst [vmem:[#allocation141_spill] sm:$0xff] %v4151_v31 }
 0x158   : > { %887 = vrot.lane.b32.xlu2 %v3625_v54, %s3224_s5  ;;  %v5914_v54 = vld [vmem:[#allocation48_spill] sm:$0xff] }
 0x159   : > { %885 = vrot.lane.b32.xlu1 %v3628_v21, %s3224_s5  ;;  %889 = vrot.lane.b32.xlu0 %v3631_v0, %s3224_s5  ;;  %v833_v21 = vrot.slane %v4043_v33, 1 }
 0x15a   : > { %v4159_v22 = vpop.permute.xlu2 %783 }
 0x15b   : > { %5910 = vst [vmem:[#allocation142_spill] sm:$0xff] %v4159_v22  ;;  %v4161_v36 = vpop.permute.xlu1 %763  ;;  %v4163_v45 = vpop.permute.xlu0 %767  ;;  %v835_v22 = vrot.slane %v4168_v25, 1  ;;  %v4189_v1 = vsel %vm392_vm1, %v832_v59, %v833_v21  ;;  %v5924_v59 = vld [vmem:[#allocation52_spill] sm:$0xff] }
 0x15c   : > { %5911 = vst [vmem:[#allocation143_spill] sm:$0xff] %v4163_v45 }
 0x15d   : > { %5918 = vst [vmem:[#allocation147_spill] sm:$0xff] %v4189_v1 }
 0x160   : > { %893 = vrot.lane.b32.xlu2 %v5913_v40, %s3224_s5  ;;  %v4186_v40 = vsel %vm392_vm1, %v833_v21, %v835_v22  ;;  %v5922_v22 = vld [vmem:[#allocation53_spill] sm:$0xff]  ;;  %v5923_v21 = vld [vmem:[#allocation51_spill] sm:$0xff]  ;;  %vm2766_vm1 = vcmask 1045509  }
 0x161   : > { %891 = vrot.lane.b32.xlu1 %v3659_v57, %s3224_s5  ;;  %895 = vrot.lane.b32.xlu0 %v5914_v54, %s3224_s5  ;;  %5917 = vst [vmem:[#allocation146_spill] sm:$0xff] %v4186_v40  ;;  %v5919_v54 = vld [vmem:[#allocation49_spill] sm:$0xff] }
 0x162   : > { %v4178_v31 = vpop.permute.xlu2 %789 }
 0x163   : > { %5915 = vst [vmem:[#allocation144_spill] sm:$0xff] %v4178_v31  ;;  %v4181_v45 = vpop.permute.xlu1 %769  ;;  %v4183_v7 = vpop.permute.xlu0 %773 }
 0x164   : > { %5916 = vst [vmem:[#allocation145_spill] sm:$0xff] %v4183_v7 }
 0x168   : > { %899 = vrot.lane.b32.xlu2 %v4186_v40, %s3224_s5 }
 0x169   : > { %897 = vrot.lane.b32.xlu1 %v4189_v1, %s3224_s5  ;;  %938 = vrot.lane.b32.xlu0 %v5919_v54, %s3225_s6  ;;  %s161_s5 = sand.u32 1, %s3210_s13  }
 0x16a   : > { %v4197_v31 = vpop.permute.xlu2 %795  ;;  %s2838_s24 = scalar_lea.sflag [#allocation3], %s161_s5 }
 0x16b   : > { %5920 = vst [vmem:[#allocation49_spill] sm:$0xff] %v4197_v31  ;;  %v4199_v60 = vpop.permute.xlu1 %775  ;;  %v4201_v7 = vpop.permute.xlu0 %779 }
 0x16c   : > { %5921 = vst [vmem:[#allocation148_spill] sm:$0xff] %v4201_v7 }
 0x170   : > { %942 = vrot.lane.b32.xlu2 %v5922_v22, %s3225_s6 }
 0x171   : > { %940 = vrot.lane.b32.xlu1 %v5923_v21, %s3225_s6  ;;  %944 = vrot.lane.b32.xlu0 %v5924_v59, %s3225_s6 }
 0x172   : > { %v4209_v40 = vpop.permute.xlu2 %839 }
 0x173   : > { %5925 = vst [vmem:[#allocation53_spill] sm:$0xff] %v4209_v40  ;;  %v4211_v1 = vpop.permute.xlu1 %781  ;;  %v4213_v54 = vpop.permute.xlu0 %785  ;;  %v5929_v40 = vld [vmem:[#allocation61_spill] sm:$0xff] }
 0x174   : > { %5926 = vst [vmem:[#allocation51_spill] sm:$0xff] %v4213_v54  ;;  %v5930_v54 = vld [vmem:[#allocation58_spill] sm:$0xff] }
 0x178   : > { %948 = vrot.lane.b32.xlu2 %v3718_v37, %s3225_s6  ;;  %v5931_v37 = vld [vmem:[#allocation60_spill] sm:$0xff] }
 0x179   : > { %946 = vrot.lane.b32.xlu1 %v3700_v56, %s3225_s6  ;;  %950 = vrot.lane.b32.xlu0 %v3715_v20, %s3225_s6 }
 0x17a   : > { %v4221_v31 = vpop.permute.xlu2 %845 }
 0x17b   : > { %5927 = vst [vmem:[#allocation149_spill] sm:$0xff] %v4221_v31  ;;  %v4223_v21 = vpop.permute.xlu1 %787  ;;  %v4225_v7 = vpop.permute.xlu0 %791  ;;  %v5935_v31 = vld [vmem:[#allocation62_spill] sm:$0xff] }
 0x17c   : > { %5928 = vst [vmem:[#allocation150_spill] sm:$0xff] %v4225_v7  ;;  %v5940_v7 = vld [vmem:[#allocation71_spill] sm:$0xff] }
 0x180   : > { %954 = vrot.lane.b32.xlu2 %v5929_v40, %s3225_s6 }
 0x181   : > { %952 = vrot.lane.b32.xlu1 %v5930_v54, %s3225_s6  ;;  %956 = vrot.lane.b32.xlu0 %v5931_v37, %s3225_s6 }
 0x182   : > { %v4233_v59 = vpop.permute.xlu2 %851 }
 0x183   : > { %5932 = vst [vmem:[#allocation151_spill] sm:$0xff] %v4233_v59  ;;  %v4235_v56 = vpop.permute.xlu1 %793  ;;  %v4237_v20 = vpop.permute.xlu0 %797  ;;  %v5938_v59 = vld [vmem:[#allocation72_spill] sm:$0xff] }
 0x184   : > { %5933 = vst [vmem:[#allocation152_spill] sm:$0xff] %v4235_v56 }
 0x185   : > { %5934 = vst [vmem:[#allocation153_spill] sm:$0xff] %v4237_v20  ;;  %v5939_v20 = vld [vmem:[#allocation67_spill] sm:$0xff] }
 0x188   : > { %960 = vrot.lane.b32.xlu2 %v3763_v11, %s3225_s6 }
 0x189   : > { %958 = vrot.lane.b32.xlu1 %v5935_v31, %s3225_s6  ;;  %962 = vrot.lane.b32.xlu0 %v3760_v13, %s3225_s6 }
 0x18a   : > { %v4245_v40 = vpop.permute.xlu2 %857 }
 0x18b   : > { %v4247_v54 = vpop.permute.xlu1 %837  ;;  %v4249_v37 = vpop.permute.xlu0 %841 }
 0x18c   : > { %5936 = vst [vmem:[#allocation62_spill] sm:$0xff] %v4247_v54  ;;  %v5943_v54 = vld [vmem:[#allocation73_spill] sm:$0xff] }
 0x18d   : > { %5937 = vst [vmem:[#allocation154_spill] sm:$0xff] %v4249_v37 }
 0x190   : > { %966 = vrot.lane.b32.xlu2 %v5938_v59, %s3225_s6 }
 0x191   : > { %964 = vrot.lane.b32.xlu1 %v5939_v20, %s3225_s6  ;;  %968 = vrot.lane.b32.xlu0 %v5940_v7, %s3225_s6 }
 0x192   : > { %v4257_v11 = vpop.permute.xlu2 %863 }
 0x193   : > { %v4259_v56 = vpop.permute.xlu1 %843  ;;  %v4261_v13 = vpop.permute.xlu0 %847 }
 0x194   : > { %5941 = vst [vmem:[#allocation155_spill] sm:$0xff] %v4259_v56 }
 0x195   : > { %5942 = vst [vmem:[#allocation156_spill] sm:$0xff] %v4261_v13  ;;  %v5947_v13 = vld [vmem:[#allocation78_spill] sm:$0xff] }
 0x198   : > { %972 = vrot.lane.b32.xlu2 %v3814_v18, %s3225_s6  ;;  %v5948_v18 = vld [vmem:[#allocation82_spill] sm:$0xff] }
 0x199   : > { %970 = vrot.lane.b32.xlu1 %v5943_v54, %s3225_s6  ;;  %974 = vrot.lane.b32.xlu0 %v3811_v32, %s3225_s6 }
 0x19a   : > { %v4269_v59 = vpop.permute.xlu2 %869 }
 0x19b   : > { %5944 = vst [vmem:[#allocation157_spill] sm:$0xff] %v4269_v59  ;;  %v4271_v20 = vpop.permute.xlu1 %849  ;;  %v4273_v7 = vpop.permute.xlu0 %853 }
 0x19c   : > { %5945 = vst [vmem:[#allocation158_spill] sm:$0xff] %v4271_v20  ;;  %v5950_v20 = vld [vmem:[#allocation84_spill] sm:$0xff] }
 0x19d   : > { %5946 = vst [vmem:[#allocation159_spill] sm:$0xff] %v4273_v7 }
 0x1a0   : > { %978 = vrot.lane.b32.xlu2 %v3840_v17, %s3225_s6 }
 0x1a1   : > { %976 = vrot.lane.b32.xlu1 %v5947_v13, %s3225_s6  ;;  %980 = vrot.lane.b32.xlu0 %v5948_v18, %s3225_s6 }
 0x1a2   : > { %v4281_v37 = vpop.permute.xlu2 %875 }
 0x1a3   : > { %v4283_v54 = vpop.permute.xlu1 %855  ;;  %v860_v56 = vpop.permute.xlu0 %859 }
 0x1a4   : > { %5949 = vst [vmem:[#allocation78_spill] sm:$0xff] %v4283_v54 }
 0x1a8   : > { %984 = vrot.lane.b32.xlu2 %v3865_v55, %s3225_s6  ;;  %v933_v55 = vrot.slane %v4038_v19, 2 }
 0x1a9   : > { %982 = vrot.lane.b32.xlu1 %v5950_v20, %s3225_s6  ;;  %986 = vrot.lane.b32.xlu0 %v3862_v15, %s3225_s6  ;;  %v934_v20 = vrot.slane %v4043_v33, 2  ;;  %v936_v33 = vrot.slane %v4168_v25, 2 }
 0x1aa   : > { %v4291_v7 = vpop.permute.xlu2 %881 }
 0x1ab   : > { %5951 = vst [vmem:[#allocation160_spill] sm:$0xff] %v4291_v7  ;;  %v4293_v17 = vpop.permute.xlu1 %861  ;;  %v4295_v59 = vpop.permute.xlu0 %865  ;;  %v4312_v7 = vsel %vm563_vm2, %v933_v55, %v934_v20  ;;  %v4328_v55 = vsel %vm563_vm2, %v934_v20, %v936_v33  ;;  %vm2768_vm2 = vcmask 1046534  }
 0x1ac   : > { %5953 = vst [vmem:[#allocation162_spill] sm:$0xff] %v4312_v7 }
 0x1ad   : > { %5954 = vst [vmem:[#allocation163_spill] sm:$0xff] %v4328_v55 }
 0x1b0   : > { %990 = vrot.lane.b32.xlu2 %v3891_v34, %s3225_s6 }
 0x1b1   : > { %988 = vrot.lane.b32.xlu1 %v3868_v39, %s3225_s6  ;;  %992 = vrot.lane.b32.xlu0 %v3888_v47, %s3225_s6 }
 0x1b2   : > { %v4305_v15 = vpop.permute.xlu2 %887 }
 0x1b3   : > { %5952 = vst [vmem:[#allocation161_spill] sm:$0xff] %v4305_v15  ;;  %v4307_v18 = vpop.permute.xlu1 %867  ;;  %v4309_v54 = vpop.permute.xlu0 %871 }
 0x1b8   : > { %996 = vrot.lane.b32.xlu2 %v3910_v5, %s3225_s6 }
 0x1b9   : > { %994 = vrot.lane.b32.xlu1 %v3894_v61, %s3225_s6  ;;  %998 = vrot.lane.b32.xlu0 %v4312_v7, %s3225_s6 }
 0x1ba   : > { %v4320_v39 = vpop.permute.xlu2 %893 }
 0x1bb   : > { %v4323_v19 = vpop.permute.xlu1 %873  ;;  %v4325_v15 = vpop.permute.xlu0 %877 }
 0x1c0   : > { %1034 = vrot.lane.b32.xlu2 %v3346_v27, %s3226_s7 }
 0x1c1   : > { %1000 = vrot.lane.b32.xlu1 %v4328_v55, %s3225_s6  ;;  %1036 = vrot.lane.b32.xlu0 %v3317_v14, %s3226_s7  ;;  %s2919_s6 = sshll.u32 %s161_s5, 6 }
 0x1c2   : > { %v4336_v7 = vpop.permute.xlu2 %899 }
 0x1c3   : > { %5955 = vst [vmem:[#allocation164_spill] sm:$0xff] %v4336_v7  ;;  %v4338_v25 = vpop.permute.xlu1 %879  ;;  %v4340_v5 = vpop.permute.xlu0 %883 }
 0x1c8   : > { %1040 = vrot.lane.b32.xlu2 %v3337_v24, %s3226_s7 }
 0x1c9   : > { %1038 = vrot.lane.b32.xlu1 %v3343_v26, %s3226_s7  ;;  %1042 = vrot.lane.b32.xlu0 %v3388_v49, %s3226_s7 }
 0x1ca   : > { %v4348_v33 = vpop.permute.xlu2 %942 }
 0x1cb   : > { %5956 = vst [vmem:[#allocation165_spill] sm:$0xff] %v4348_v33  ;;  %v4350_v20 = vpop.permute.xlu1 %885  ;;  %v4352_v55 = vpop.permute.xlu0 %889 }
 0x1cc   : > { %5957 = vst [vmem:[#allocation166_spill] sm:$0xff] %v4350_v20 }
 0x1d0   : > { %1046 = vrot.lane.b32.xlu2 %v3394_v51, %s3226_s7 }
 0x1d1   : > { %1044 = vrot.lane.b32.xlu1 %v3381_v46, %s3226_s7  ;;  %1048 = vrot.lane.b32.xlu0 %v3391_v50, %s3226_s7 }
 0x1d2   : > { %v4360_v24 = vpop.permute.xlu2 %948 }
 0x1d3   : > { %5958 = vst [vmem:[#allocation167_spill] sm:$0xff] %v4360_v24  ;;  %v4362_v14 = vpop.permute.xlu1 %891  ;;  %v4364_v49 = vpop.permute.xlu0 %895  ;;  %v5961_v24 = vld [vmem:[#allocation86_spill] sm:$0xff] }
 0x1d4   : > { %v1324_v7 = vsel %vm1313_vm3, %v3391_v50, %v5961_v24 }
 0x1d5   : > { %v1356_v46 = vsel %vm1345_vm4, %v1324_v7, %v3966_v42 }
 0x1d8   : > { %1052 = vrot.lane.b32.xlu2 %v3418_v63, %s3226_s7 }
 0x1d9   : > { %1050 = vrot.lane.b32.xlu1 %v3421_v2, %s3226_s7  ;;  %1054 = vrot.lane.b32.xlu0 %v3447_v23, %s3226_s7 }
 0x1da   : > { %v4372_v20 = vpop.permute.xlu2 %954 }
 0x1db   : > { %5959 = vst [vmem:[#allocation168_spill] sm:$0xff] %v4372_v20  ;;  %v4374_v33 = vpop.permute.xlu1 %897  ;;  %v4376_v27 = vpop.permute.xlu0 %938  ;;  %v1389_v20 = vsel %vm1377_vm5, %v1356_v46, %v4149_v29  ;;  %v1327_v46 = vsel %vm1313_vm3, %v3447_v23, %v3883_v10 }
 0x1dc   : > { %5960 = vst [vmem:[#allocation169_spill] sm:$0xff] %v4376_v27  ;;  %v1422_v24 = vsel %vm1410_vm6, %v1389_v20, %v860_v56  ;;  %v1359_v29 = vsel %vm1345_vm4, %v1327_v46, %v3978_v3 }
 0x1dd   : > { %v1392_v56 = vsel %vm1377_vm5, %v1359_v29, %v4161_v36  ;;  %v1330_v36 = vsel %vm1313_vm3, %v3462_v35, %v3905_v4 }
 0x1e0   : > { %1082 = vrot.lane.b32.xlu2 %v3609_v8, %s3226_s7 }
 0x1e1   : > { %1066 = vrot.lane.b32.xlu1 %v3531_v52, %s3226_s7  ;;  %1159 = vrot.lane.b32.xlu0 %v5901_v6, %s3227_s8  ;;  %v1425_v6 = vsel %vm1410_vm6, %v1392_v56, %v4295_v59 }
 0x1e2   : > { %v961_v50 = vpop.permute.xlu2 %960 }
 0x1e3   : > { %v4393_v42 = vsel %vm1443_vm7, %v1422_v24, %v961_v50  ;;  %v4395_v7 = vpop.permute.xlu1 %940  ;;  %v4397_v27 = vpop.permute.xlu0 %944  ;;  %v5963_v50 = vld [vmem:[#allocation81_spill] sm:$0xff] }
 0x1e8   : > { %1252 = vrot.lane.b32.xlu2 %v3811_v32, %s3228_s9 }
 0x1e9   : > { %1175 = vrot.lane.b32.xlu1 %v3631_v0, %s3227_s8  ;;  %1268 = vrot.lane.b32.xlu0 %v3891_v34, %s3228_s9  ;;  %v1362_v0 = vsel %vm1345_vm4, %v1330_v36, %v3990_v38 }
 0x1ea   : > { %v967_v23 = vpop.permute.xlu2 %966  ;;  %v1395_v32 = vsel %vm1377_vm5, %v1362_v0, %v4181_v45  ;;  %v1333_v45 = vsel %vm1313_vm3, %v3531_v52, %v3920_v12  ;;  %v5967_v0 = vld [vmem:[#allocation112_spill] sm:$0xff] }
 0x1eb   : > { %v4415_v10 = vsel %vm1443_vm7, %v1425_v6, %v967_v23  ;;  %v4417_v3 = vpop.permute.xlu1 %946  ;;  %v4419_v20 = vpop.permute.xlu0 %950  ;;  %v1428_v34 = vsel %vm1410_vm6, %v1395_v32, %v4309_v54  ;;  %v1323_v54 = vsel %vm1313_vm3, %v3394_v51, %v5963_v50  ;;  %v1365_v46 = vsel %vm1345_vm4, %v1333_v45, %v4002_v28  ;;  %v5964_v6 = vld [vmem:[#allocation74_spill] sm:$0xff] }
 0x1ec   : > { %v1355_v29 = vsel %vm1345_vm4, %v1323_v54, %v4004_v16  ;;  %v1398_v12 = vsel %vm1377_vm5, %v1365_v46, %v4199_v60  ;;  %v5969_v45 = vld [vmem:[#allocation114_spill] sm:$0xff]  ;;  %v5972_v54 = vld [vmem:[#allocation141_spill] sm:$0xff] }
 0x1ed   : > { %v1431_v16 = vsel %vm1410_vm6, %v1398_v12, %v4325_v15  ;;  %v1336_v15 = vsel %vm1313_vm3, %v3534_v53, %v3932_v48 }
 0x1ee   : > { %v1368_v32 = vsel %vm1345_vm4, %v1336_v15, %v5967_v0 }
 0x1f0   : > { %1143 = vrot.lane.b32.xlu2 %v5883_v30, %s3227_s8  ;;  %v5962_v30 = vld [vmem:[#allocation68_spill] sm:$0xff] }
 0x1f1   : > { %1127 = vrot.lane.b32.xlu1 %v3375_v44, %s3227_s8  ;;  %1068 = vrot.lane.b32.xlu0 %v3525_v41, %s3226_s7  ;;  %v1325_v44 = vsel %vm1313_vm3, %v3421_v2, %v5962_v30  ;;  %v1388_v2 = vsel %vm1377_vm5, %v1355_v29, %v4139_v43  ;;  %v1401_v30 = vsel %vm1377_vm5, %v1368_v32, %v4211_v1  ;;  %v5982_v32 = vld [vmem:[#allocation117_spill] sm:$0xff] }
 0x1f2   : > { %v973_v59 = vpop.permute.xlu2 %972  ;;  %v1357_v52 = vsel %vm1345_vm4, %v1325_v44, %v4006_v58  ;;  %v1421_v58 = vsel %vm1410_vm6, %v1388_v2, %v4245_v40  ;;  %v5965_v40 = vld [vmem:[#allocation22_spill] sm:$0xff]  ;;  %v5970_v44 = vld [vmem:[#allocation33_spill] sm:$0xff]  ;;  %v1434_v46 = vsel %vm1410_vm6, %v1401_v30, %v4340_v5 }
 0x1f3   : > { %v4437_v4 = vsel %vm1443_vm7, %v1428_v34, %v973_v59  ;;  %v4439_v38 = vpop.permute.xlu1 %952  ;;  %v4441_v24 = vpop.permute.xlu0 %956  ;;  %v1390_v51 = vsel %vm1377_vm5, %v1357_v52, %v4111_v62  ;;  %v1328_v23 = vsel %vm1313_vm3, %v5965_v40, %v5964_v6  ;;  %v5968_v34 = vld [vmem:[#allocation113_spill] sm:$0xff]  ;;  %v5974_v5 = vld [vmem:[#allocation42_spill] sm:$0xff]  ;;  %v5979_v6 = vld [vmem:[#allocation115_spill] sm:$0xff] }
 0x1f4   : > { %v1423_v60 = vsel %vm1410_vm6, %v1390_v51, %v4293_v17  ;;  %v5966_v17 = vld [vmem:[#allocation87_spill] sm:$0xff]  ;;  %v1360_v48 = vsel %vm1345_vm4, %v1328_v23, %v5969_v45  ;;  %v5983_v45 = vld [vmem:[#allocation21_spill] sm:$0xff] }
 0x1f5   : > { %v1326_v36 = vsel %vm1313_vm3, %v3418_v63, %v5966_v17  ;;  %v5971_v63 = vld [vmem:[#allocation136_spill] sm:$0xff]  ;;  %v5980_v17 = vld [vmem:[#allocation10_spill] sm:$0xff] }
 0x1f6   : > { %v1358_v59 = vsel %vm1345_vm4, %v1326_v36, %v5968_v34  ;;  %v1393_v50 = vsel %vm1377_vm5, %v1360_v48, %v5971_v63  ;;  %v5981_v36 = vld [vmem:[#allocation116_spill] sm:$0xff]  ;;  %v5984_v48 = vld [vmem:[#allocation34_spill] sm:$0xff] }
 0x1f7   : > { %v1426_v1 = vsel %vm1410_vm6, %v1393_v50, %v4307_v18  ;;  %v5977_v18 = vld [vmem:[#allocation92_spill] sm:$0xff] }
 0x1f8   : > { %1220 = vrot.lane.b32.xlu2 %v5922_v22, %s3228_s9 }
 0x1f9   : > { %1084 = vrot.lane.b32.xlu1 %v3606_v9, %s3226_s7  ;;  %1236 = vrot.lane.b32.xlu0 %v5935_v31, %s3228_s9 }
 0x1fa   : > { %v979_v28 = vpop.permute.xlu2 %978 }
 0x1fb   : > { %v4477_v22 = vsel %vm1443_vm7, %v1431_v16, %v979_v28  ;;  %v959_v31 = vpop.permute.xlu1 %958  ;;  %v963_v56 = vpop.permute.xlu0 %962  ;;  %v5973_v28 = vld [vmem:[#allocation101_spill] sm:$0xff] }
 0x1fc   : > { %v4480_v62 = vsel %vm1443_vm7, %v1421_v58, %v959_v31  ;;  %v4483_v43 = vsel %vm1443_vm7, %v1423_v60, %v963_v56  ;;  %v1339_v58 = vsel %vm1313_vm3, %v5974_v5, %v5973_v28  ;;  %v5975_v60 = vld [vmem:[#allocation79_spill] sm:$0xff]  ;;  %v5988_v28 = vld [vmem:[#allocation85_spill] sm:$0xff] }
 0x1fd   : > { %v5978_v56 = vld [vmem:[#allocation23_spill] sm:$0xff]  ;;  %v1371_v23 = vsel %vm1345_vm4, %v1339_v58, %v5979_v6  ;;  %v1334_v58 = vsel %vm1313_vm3, %v3525_v41, %v5988_v28  ;;  %v5992_v6 = vld [vmem:[#allocation46_spill] sm:$0xff]  ;;  %v5996_v41 = vld [vmem:[#allocation32_spill] sm:$0xff] }
 0x1fe   : > { %v1329_v15 = vsel %vm1313_vm3, %v5978_v56, %v5977_v18  ;;  %v5991_v18 = vld [vmem:[#allocation120_spill] sm:$0xff]  ;;  %v6003_v28 = vld [vmem:[#allocation66_spill] sm:$0xff] }
 0x1ff   : > { %v1361_v0 = vsel %vm1345_vm4, %v1329_v15, %v5981_v36  ;;  %v5994_v36 = vld [vmem:[#allocation122_spill] sm:$0xff] }
 0x200   : > { %1177 = vrot.lane.b32.xlu2 %v3659_v57, %s3227_s8  ;;  %v1391_v57 = vsel %vm1377_vm5, %v1358_v59, %v5972_v54  ;;  %v1404_v59 = vsel %vm1377_vm5, %v1371_v23, %v4223_v21  ;;  %v5993_v23 = vld [vmem:[#allocation121_spill] sm:$0xff] }
 0x201   : > { %1161 = vrot.lane.b32.xlu1 %v5970_v44, %s3227_s8  ;;  %1254 = vrot.lane.b32.xlu0 %v5947_v13, %s3228_s9  ;;  %v1424_v52 = vsel %vm1410_vm6, %v1391_v57, %v4257_v11  ;;  %v5976_v11 = vld [vmem:[#allocation28_spill] sm:$0xff]  ;;  %v5985_v44 = vld [vmem:[#allocation143_spill] sm:$0xff]  ;;  %v1437_v50 = vsel %vm1410_vm6, %v1404_v59, %v4352_v55  ;;  %v5986_v57 = vld [vmem:[#allocation157_spill] sm:$0xff] }
 0x202   : > { %v985_v29 = vpop.permute.xlu2 %984  ;;  %v1331_v31 = vsel %vm1313_vm3, %v5976_v11, %v5975_v60  ;;  %v1394_v63 = vsel %vm1377_vm5, %v1361_v0, %v5985_v44  ;;  %v5990_v60 = vld [vmem:[#allocation27_spill] sm:$0xff]  ;;  %v5995_v0 = vld [vmem:[#allocation152_spill] sm:$0xff] }
 0x203   : > { %v4519_v12 = vsel %vm1443_vm7, %v1434_v46, %v985_v29  ;;  %v965_v13 = vpop.permute.xlu1 %964  ;;  %v969_v51 = vpop.permute.xlu0 %968  ;;  %v1363_v34 = vsel %vm1345_vm4, %v1331_v31, %v5982_v32  ;;  %v1427_v46 = vsel %vm1410_vm6, %v1394_v63, %v5986_v57  ;;  %v5998_v59 = vld [vmem:[#allocation140_spill] sm:$0xff] }
 0x204   : > { %v4522_v2 = vsel %vm1443_vm7, %v1424_v52, %v965_v13  ;;  %v4525_v16 = vsel %vm1443_vm7, %v1426_v1, %v969_v51  ;;  %v1396_v30 = vsel %vm1377_vm5, %v1363_v34, %v5984_v48  ;;  %v5987_v51 = vld [vmem:[#allocation104_spill] sm:$0xff]  ;;  %v5999_v48 = vld [vmem:[#allocation145_spill] sm:$0xff] }
 0x205   : > { %v1429_v21 = vsel %vm1410_vm6, %v1396_v30, %v4323_v19  ;;  %v1342_v55 = vsel %vm1313_vm3, %v3606_v9, %v5987_v51  ;;  %v5989_v19 = vld [vmem:[#allocation94_spill] sm:$0xff]  ;;  %v1366_v9 = vsel %vm1345_vm4, %v1334_v58, %v5994_v36  ;;  %v5997_v34 = vld [vmem:[#allocation52_spill] sm:$0xff]  ;;  %v6000_v51 = vld [vmem:[#allocation97_spill] sm:$0xff] }
 0x206   : > { %v1332_v31 = vsel %vm1313_vm3, %v5990_v60, %v5989_v19  ;;  %v1374_v15 = vsel %vm1345_vm4, %v1342_v55, %v5991_v18  ;;  %v6002_v55 = vld [vmem:[#allocation124_spill] sm:$0xff]  ;;  %v6004_v58 = vld [vmem:[#allocation47_spill] sm:$0xff] }
 0x207   : > { %v1407_v32 = vsel %vm1377_vm5, %v1374_v15, %v5995_v0  ;;  %v6005_v19 = vld [vmem:[#allocation148_spill] sm:$0xff]  ;;  %v6007_v0 = vld [vmem:[#allocation69_spill] sm:$0xff] }
 0x208   : > { %1129 = vrot.lane.b32.xlu2 %v5980_v17, %s3227_s8  ;;  %v1364_v17 = vsel %vm1345_vm4, %v1332_v31, %v5993_v23  ;;  %v1440_v44 = vsel %vm1410_vm6, %v1407_v32, %v4364_v49  ;;  %v1335_v49 = vsel %vm1313_vm3, %v5996_v41, %v6000_v51  ;;  %v6006_v15 = vld [vmem:[#allocation160_spill] sm:$0xff] }
 0x209   : > { %1270 = vrot.lane.b32.xlu1 %v3888_v47, %s3228_s9  ;;  %1145 = vrot.lane.b32.xlu0 %v5983_v45, %s3227_s8  ;;  %v1399_v45 = vsel %vm1377_vm5, %v1366_v9, %v5998_v59  ;;  %v1397_v30 = vsel %vm1377_vm5, %v1364_v17, %v5999_v48  ;;  %v6008_v32 = vld [vmem:[#allocation8_spill] sm:$0xff]  ;;  %v6011_v48 = vld [vmem:[#allocation41_spill] sm:$0xff] }
 0x20a   : > { %v991_v54 = vpop.permute.xlu2 %990 }
 0x20b   : > { %v4561_v47 = vsel %vm1443_vm7, %v1437_v50, %v991_v54  ;;  %v971_v29 = vpop.permute.xlu1 %970  ;;  %v975_v52 = vpop.permute.xlu0 %974  ;;  %v1430_v50 = vsel %vm1410_vm6, %v1397_v30, %v4281_v37  ;;  %v1432_v54 = vsel %vm1410_vm6, %v1399_v45, %v4338_v25  ;;  %v6001_v37 = vld [vmem:[#allocation35_spill] sm:$0xff]  ;;  %v1367_v25 = vsel %vm1345_vm4, %v1335_v49, %v6002_v55  ;;  %v6010_v45 = vld [vmem:[#allocation93_spill] sm:$0xff]  ;;  %v6016_v49 = vld [vmem:[#allocation128_spill] sm:$0xff] }
 0x20c   : > { %v4564_v1 = vsel %vm1443_vm7, %v1427_v46, %v971_v29  ;;  %v4567_v13 = vsel %vm1443_vm7, %v1429_v21, %v975_v52  ;;  %v1400_v31 = vsel %vm1377_vm5, %v1367_v25, %v6005_v19  ;;  %v1340_v30 = vsel %vm1313_vm3, %v6011_v48, %v6010_v45  ;;  %v6017_v55 = vld [vmem:[#allocation155_spill] sm:$0xff]  ;;  %v6020_v19 = vld [vmem:[#allocation144_spill] sm:$0xff] }
 0x20d   : > { %v1433_v23 = vsel %vm1410_vm6, %v1400_v31, %v6006_v15  ;;  %v6021_v15 = vld [vmem:[#allocation51_spill] sm:$0xff] }
 0x210   : > { %1086 = vrot.lane.b32.xlu2 %v5992_v6, %s3226_s7 }
 0x211   : > { %1070 = vrot.lane.b32.xlu1 %v5996_v41, %s3226_s7  ;;  %1222 = vrot.lane.b32.xlu0 %v5997_v34, %s3228_s9  ;;  %v1316_v41 = vsel %vm1313_vm3, %v6008_v32, %v6007_v0  ;;  %v6009_v34 = vld [vmem:[#allocation107_spill] sm:$0xff]  ;;  %v6022_v0 = vld [vmem:[#allocation161_spill] sm:$0xff] }
 0x212   : > { %v997_v63 = vpop.permute.xlu2 %996  ;;  %v1348_v59 = vsel %vm1345_vm4, %v1316_v41, %v6009_v34 }
 0x213   : > { %v4603_v57 = vsel %vm1443_vm7, %v1440_v44, %v997_v63  ;;  %v977_v46 = vpop.permute.xlu1 %976  ;;  %v981_v21 = vpop.permute.xlu0 %980  ;;  %v6012_v44 = vld [vmem:[#allocation99_spill] sm:$0xff]  ;;  %v6013_v63 = vld [vmem:[#allocation36_spill] sm:$0xff] }
 0x214   : > { %v4606_v29 = vsel %vm1443_vm7, %v1430_v50, %v977_v46  ;;  %v4609_v52 = vsel %vm1443_vm7, %v1432_v54, %v981_v21  ;;  %v1338_v50 = vsel %vm1313_vm3, %v6013_v63, %v6012_v44  ;;  %v6014_v54 = vld [vmem:[#allocation126_spill] sm:$0xff]  ;;  %v6015_v21 = vld [vmem:[#allocation127_spill] sm:$0xff] }
 0x215   : > { %v1381_v46 = vsel %vm1377_vm5, %v1348_v59, %v6014_v54  ;;  %v1370_v51 = vsel %vm1345_vm4, %v1338_v50, %v6015_v21  ;;  %v6024_v54 = vld [vmem:[#allocation109_spill] sm:$0xff]  ;;  %v6025_v21 = vld [vmem:[#allocation96_spill] sm:$0xff] }
 0x216   : > { %v1414_v25 = vsel %vm1410_vm6, %v1381_v46, %v6017_v55 }
 0x218   : > { %1163 = vrot.lane.b32.xlu2 %v6001_v37, %s3227_s8  ;;  %v1372_v37 = vsel %vm1345_vm4, %v1340_v30, %v6016_v49 }
 0x219   : > { %1238 = vrot.lane.b32.xlu1 %v6003_v28, %s3228_s9  ;;  %1179 = vrot.lane.b32.xlu0 %v6004_v58, %s3227_s8  ;;  %v6018_v28 = vld [vmem:[#allocation83_spill] sm:$0xff]  ;;  %v6019_v58 = vld [vmem:[#allocation12_spill] sm:$0xff]  ;;  %v1405_v31 = vsel %vm1377_vm5, %v1372_v37, %v6020_v19  ;;  %v6027_v37 = vld [vmem:[#allocation129_spill] sm:$0xff] }
 0x21a   : > { %v4624_v18 = vpop.permute.xlu2 %1034  ;;  %v1438_v41 = vsel %vm1410_vm6, %v1405_v31, %v4362_v14  ;;  %v1343_v14 = vsel %vm1313_vm3, %v5992_v6, %v6025_v21  ;;  %v6030_v19 = vld [vmem:[#allocation158_spill] sm:$0xff]  ;;  %v6031_v6 = vld [vmem:[#allocation25_spill] sm:$0xff] }
 0x21b   : > { %v983_v17 = vpop.permute.xlu1 %982  ;;  %v4628_v36 = vpop.permute.xlu0 %986 }
 0x21c   : > { %v4631_v9 = vsel %vm1443_vm7, %v1433_v23, %v983_v17  ;;  %v1447_v23 = vsel %vm1443_vm7, %v1414_v25, %v4397_v27  ;;  %v6023_v27 = vld [vmem:[#allocation59_spill] sm:$0xff]  ;;  %v6028_v25 = vld [vmem:[#allocation130_spill] sm:$0xff] }
 0x21d   : > { %v1319_v50 = vsel %vm1313_vm3, %v3343_v26, %v6023_v27 }
 0x21e   : > { %v1351_v46 = vsel %vm1345_vm4, %v1319_v50, %v6024_v54 }
 0x21f   : > { %v1384_v55 = vsel %vm1377_vm5, %v1351_v46, %v6027_v37  ;;  %v6036_v46 = vld [vmem:[#allocation14_spill] sm:$0xff] }
 0x220   : > { %1272 = vrot.lane.b32.xlu2 %v3894_v61, %s3228_s9  ;;  %v1403_v61 = vsel %vm1377_vm5, %v1370_v51, %v6021_v15  ;;  %v6026_v51 = vld [vmem:[#allocation102_spill] sm:$0xff]  ;;  %v1417_v31 = vsel %vm1410_vm6, %v1384_v55, %v6030_v19  ;;  %v6033_v15 = vld [vmem:[#allocation49_spill] sm:$0xff] }
 0x221   : > { %1256 = vrot.lane.b32.xlu1 %v6018_v28, %s3228_s9  ;;  %1131 = vrot.lane.b32.xlu0 %v6019_v58, %s3227_s8  ;;  %v1436_v32 = vsel %vm1410_vm6, %v1403_v61, %v6022_v0  ;;  %v1341_v49 = vsel %vm1313_vm3, %v3609_v8, %v6026_v51  ;;  %v6029_v28 = vld [vmem:[#allocation131_spill] sm:$0xff]  ;;  %v6032_v8 = vld [vmem:[#allocation45_spill] sm:$0xff] }
 0x222   : > { %v1041_v17 = vpop.permute.xlu2 %1040  ;;  %v1373_v26 = vsel %vm1345_vm4, %v1341_v49, %v6028_v25  ;;  %v1375_v58 = vsel %vm1345_vm4, %v1343_v14, %v6029_v28  ;;  %v6037_v14 = vld [vmem:[#allocation63_spill] sm:$0xff]  ;;  %v6039_v55 = vld [vmem:[#allocation105_spill] sm:$0xff] }
 0x223   : > { %v4669_v34 = vsel %vm1476_vm8, %v1447_v23, %v1041_v17  ;;  %v989_v59 = vpop.permute.xlu1 %988  ;;  %v993_v45 = vpop.permute.xlu0 %992  ;;  %v1408_v61 = vsel %vm1377_vm5, %v1375_v58, %v6033_v15  ;;  %v6034_v23 = vld [vmem:[#allocation150_spill] sm:$0xff]  ;;  %v1450_v17 = vsel %vm1443_vm7, %v1417_v31, %v4419_v20  ;;  %v1579_v20 = vld [vmem:[%s5622_s1 + $0x20] sm:$0xf]  ;;  %v1314_v51 = vsel %vm1313_vm3, 0.0, %v6037_v14  ;;  %v6038_v49 = vld [vmem:[#allocation111_spill] sm:$0xff] }
 0x224   : > { %v4672_v30 = vsel %vm1443_vm7, %v1436_v32, %v989_v59  ;;  %v4675_v44 = vsel %vm1443_vm7, %v1438_v41, %v993_v45  ;;  %v1441_v41 = vsel %vm1410_vm6, %v1408_v61, %v4374_v33  ;;  %3091 = vmatpush.msk.msra.mxu2 %vm1681_vm9, %v1579_v20  ;;  %3092 = vmatpush.msk.msra.mxu3 %vm1681_vm9, %v1579_v20  ;;  %v6035_v33 = vld [vmem:[#allocation64_spill] sm:$0xff]  ;;  %v6041_v58 = vld [vmem:[#allocation19_spill] sm:$0xff]  ;;  %v6042_v31 = vld [vmem:[#allocation65_spill] sm:$0xff] }
 0x225   : > { %v1322_v21 = vsel %vm1313_vm3, %v6036_v46, %v6035_v33  ;;  %2922 = vmatpush.msk.msra.mxu0 %vm1681_vm9, %v1579_v20  ;;  %3090 = vmatpush.msk.msra.mxu1 %vm1681_vm9, %v1579_v20  ;;  %v1344_v25 = vsel %vm1313_vm3, %v6032_v8, %v6039_v55  ;;  %v6044_v61 = vld [vmem:[#allocation133_spill] sm:$0xff] }
 0x226   : > { %v1354_v37 = vsel %vm1345_vm4, %v1322_v21, %v6038_v49  ;;  %v6050_v21 = vld [vmem:[#allocation164_spill] sm:$0xff] }
 0x227   : > { %v1387_v19 = vsel %vm1377_vm5, %v1354_v37, %v6041_v58  ;;  %v6051_v58 = vld [vmem:[#allocation70_spill] sm:$0xff] }
 0x228   : > { %1072 = vrot.lane.b32.xlu2 %v3534_v53, %s3226_s7  ;;  %v1406_v53 = vsel %vm1377_vm5, %v1373_v26, %v6034_v23  ;;  %v6040_v26 = vld [vmem:[#allocation106_spill] sm:$0xff] }
 0x229   : > { %1147 = vrot.lane.b32.xlu1 %v6031_v6, %s3227_s8  ;;  %1088 = vrot.lane.b32.xlu0 %v6032_v8, %s3226_s7  ;;  %v1439_v32 = vsel %vm1410_vm6, %v1406_v53, %v4320_v39  ;;  %v1578_v39 = vld [vmem:[%s5622_s1 + $0x18] sm:$0xff]  ;;  %v4739_v28 = vsel %vm1345_vm4, %v1314_v51, %v6040_v26  ;;  %v6045_v53 = vld [vmem:[#allocation78_spill] sm:$0xff] }
 0x22a   : > { %v1047_v0 = vpop.permute.xlu2 %1046  ;;  %3094 = vmatpush.msra.mxu2 %v1578_v39  ;;  %3095 = vmatpush.msra.mxu3 %v1578_v39  ;;  %v6043_v6 = vld [vmem:[#allocation132_spill] sm:$0xff]  ;;  %v1379_v23 = vsel %vm1377_vm5, %v4739_v28, %v6044_v61  ;;  %v1420_v8 = vsel %vm1410_vm6, %v1387_v19, %v6045_v53  ;;  %v6052_v19 = vld [vmem:[#allocation7_spill] sm:$0xff]  ;;  %v6055_v61 = vld [vmem:[#allocation98_spill] sm:$0xff] }
 0x22b   : > { %v4713_v59 = vsel %vm1476_vm8, %v1450_v17, %v1047_v0  ;;  %v995_v45 = vpop.permute.xlu1 %994  ;;  %v999_v27 = vpop.permute.xlu0 %998  ;;  %1697 = vmatpush.msra.mxu0 %v1578_v39  ;;  %v1376_v15 = vsel %vm1345_vm4, %v1344_v25, %v6043_v6  ;;  %v6046_v17 = vld [vmem:[#allocation54_spill] sm:$0xff]  ;;  %v6047_v0 = vld [vmem:[#allocation39_spill] sm:$0xff]  ;;  %v1453_v33 = vsel %vm1443_vm7, %v1420_v8, %v4441_v24  ;;  %3093 = vmatpush.msra.mxu1 %v1578_v39  ;;  %v6056_v53 = vld [vmem:[#allocation108_spill] sm:$0xff] }
 0x22c   : > { %v4716_v50 = vsel %vm1443_vm7, %v1439_v32, %v995_v45  ;;  %v4719_v54 = vsel %vm1443_vm7, %v1441_v41, %v999_v27  ;;  %v1577_v32 = vld [vmem:[%s5622_s1 + $0x10] sm:$0xff]  ;;  %v6048_v41 = vld [vmem:[#allocation53_spill] sm:$0xff]  ;;  %v1576_v25 = vld [vmem:[%s5622_s1 + $0x8] sm:$0xff]  ;;  %v1315_v39 = vsel %vm1313_vm3, %v6052_v19, %v6051_v58 }
 0x22d   : > { %v1412_v45 = vsel %vm1410_vm6, %v1379_v23, %v6048_v41  ;;  %v6049_v27 = vld [vmem:[#allocation153_spill] sm:$0xff]  ;;  %3097 = vmatpush.msra.mxu2 %v1577_v32  ;;  %3098 = vmatpush.msra.mxu3 %v1577_v32  ;;  %v6054_v6 = vld [vmem:[#allocation11_spill] sm:$0xff]  ;;  %v1347_v23 = vsel %vm1345_vm4, %v1315_v39, %v6055_v61 }
 0x22e   : > { %v1409_v20 = vsel %vm1377_vm5, %v1376_v15, %v6049_v27  ;;  %v1445_v51 = vsel %vm1443_vm7, %v1412_v45, %v4395_v7  ;;  %1698 = vmatpush.msra.mxu0 %v1577_v32  ;;  %v1575_v7 = vld [vmem:[%s5622_s1] sm:$0xff]  ;;  %3096 = vmatpush.msra.mxu1 %v1577_v32  ;;  %v6059_v41 = vld [vmem:[#allocation135_spill] sm:$0xff]  ;;  %v6060_v27 = vld [vmem:[#allocation48_spill] sm:$0xff] }
 0x22f   : > { %v1442_v14 = vsel %vm1410_vm6, %v1409_v20, %v6050_v21  ;;  %3100 = vmatpush.msra.mxu2 %v1576_v25  ;;  %3101 = vmatpush.msra.mxu3 %v1576_v25  ;;  %v6061_v20 = vld [vmem:[#allocation95_spill] sm:$0xff]  ;;  %v6063_v21 = vld [vmem:[#allocation154_spill] sm:$0xff] }
 0x230   : > { %1240 = vrot.lane.b32.xlu2 %v6042_v31, %s3228_s9  ;;  %1699 = vmatpush.msra.mxu0 %v1576_v25  ;;  %v6053_v31 = vld [vmem:[#allocation75_spill] sm:$0xff] }
 0x231   : > { %1224 = vrot.lane.b32.xlu1 %v6046_v17, %s3228_s9  ;;  %1165 = vrot.lane.b32.xlu0 %v6047_v0, %s3227_s8  ;;  %v1317_v15 = vsel %vm1313_vm3, %v6054_v6, %v6053_v31  ;;  %v6057_v17 = vld [vmem:[#allocation82_spill] sm:$0xff]  ;;  %v6065_v6 = vld [vmem:[#allocation55_spill] sm:$0xff] }
 0x232   : > { %v1053_v46 = vpop.permute.xlu2 %1052  ;;  %3103 = vmatpush.msra.mxu2 %v1575_v7  ;;  %3104 = vmatpush.msra.mxu3 %v1575_v7  ;;  %v1349_v8 = vsel %vm1345_vm4, %v1317_v15, %v6056_v53  ;;  %v6058_v0 = vld [vmem:[#allocation134_spill] sm:$0xff] }
 0x233   : > { %v4770_v49 = vsel %vm1476_vm8, %v1453_v33, %v1053_v46  ;;  %v1001_v37 = vpop.permute.xlu1 %1000  ;;  %v1037_v55 = vpop.permute.xlu0 %1036  ;;  %1700 = vmatpush.msra.mxu0 %v1575_v7  ;;  %3099 = vmatpush.msra.mxu1 %v1576_v25  ;;  %v1380_v32 = vsel %vm1377_vm5, %v1347_v23, %v6058_v0  ;;  %v1382_v45 = vsel %vm1377_vm5, %v1349_v8, %v6059_v41  ;;  %v6062_v33 = vld [vmem:[#allocation149_spill] sm:$0xff]  ;;  %v6066_v15 = vld [vmem:[#allocation6_spill] sm:$0xff]  ;;  %v6067_v23 = vld [vmem:[#allocation76_spill] sm:$0xff] }
 0x234   : > { %v4776_v24 = vsel %vm1443_vm7, %v1442_v14, %v1001_v37  ;;  %v4779_v26 = vsel %vm1476_vm8, %v1445_v51, %v1037_v55  ;;  %v1415_v46 = vsel %vm1410_vm6, %v1382_v45, %v6062_v33  ;;  %v1413_v14 = vsel %vm1410_vm6, %v1380_v32, %v6063_v21  ;;  %v6064_v37 = vld [vmem:[#allocation165_spill] sm:$0xff]  ;;  %v6069_v8 = vld [vmem:[#allocation100_spill] sm:$0xff] }
 0x235   : > { %3102 = vmatpush.msra.mxu1 %v1575_v7  ;;  %v1446_v55 = vsel %vm1443_vm7, %v1413_v14, %v6064_v37  ;;  %v1448_v25 = vsel %vm1443_vm7, %v1415_v46, %v4417_v3  ;;  %v1318_v61 = vsel %vm1313_vm3, %v6066_v15, %v6065_v6  ;;  %v6068_v7 = vld [vmem:[#allocation9_spill] sm:$0xff]  ;;  %v6070_v3 = vld [vmem:[#allocation110_spill] sm:$0xff]  ;;  %v6074_v33 = vld [vmem:[#allocation24_spill] sm:$0xff] }
 0x236   : > { %v1320_v53 = vsel %vm1313_vm3, %v6068_v7, %v6067_v23  ;;  %v6071_v32 = vld [vmem:[#allocation13_spill] sm:$0xff]  ;;  %v6075_v46 = vld [vmem:[#allocation151_spill] sm:$0xff]  ;;  %v6076_v14 = vld [vmem:[#allocation156_spill] sm:$0xff] }
 0x237   : > { %v1352_v0 = vsel %vm1345_vm4, %v1320_v53, %v6070_v3  ;;  %v6072_v41 = vld [vmem:[#allocation137_spill] sm:$0xff]  ;;  %v6078_v23 = vld [vmem:[#allocation118_spill] sm:$0xff] }
 0x238   : > { %1258 = vrot.lane.b32.xlu2 %v6057_v17, %s3228_s9  ;;  %v1350_v17 = vsel %vm1345_vm4, %v1318_v61, %v6069_v8  ;;  %v6079_v7 = vld [vmem:[#allocation37_spill] sm:$0xff] }
 0x239   : > { %1181 = vrot.lane.b32.xlu1 %v6060_v27, %s3227_s8  ;;  %1274 = vrot.lane.b32.xlu0 %v6061_v20, %s3228_s9  ;;  %v1383_v45 = vsel %vm1377_vm5, %v1350_v17, %v6072_v41  ;;  %v6073_v27 = vld [vmem:[#allocation138_spill] sm:$0xff]  ;;  %v6080_v53 = vld [vmem:[#allocation57_spill] sm:$0xff]  ;;  %v6083_v41 = vld [vmem:[#allocation147_spill] sm:$0xff] }
 0x23a   : > { %v1083_v51 = vpop.permute.xlu2 %1082  ;;  %v1385_v20 = vsel %vm1377_vm5, %v1352_v0, %v6073_v27  ;;  %v1416_v37 = vsel %vm1410_vm6, %v1383_v45, %v6076_v14  ;;  %v6081_v0 = vld [vmem:[#allocation38_spill] sm:$0xff] }
 0x23b   : > { %v1039_v58 = vpop.permute.xlu1 %1038  ;;  %v1043_v19 = vpop.permute.xlu0 %1042  ;;  %v1418_v21 = vsel %vm1410_vm6, %v1385_v20, %v6075_v46  ;;  %v6084_v46 = vld [vmem:[#allocation91_spill] sm:$0xff] }
 0x23c   : > { %v4813_v39 = vsel %vm1476_vm8, %v1446_v55, %v1039_v58  ;;  %v4816_v31 = vsel %vm1476_vm8, %v1448_v25, %v1043_v19  ;;  %v6077_v25 = vld [vmem:[#allocation167_spill] sm:$0xff]  ;;  %v1451_v19 = vsel %vm1443_vm7, %v1418_v21, %v4439_v38  ;;  %v1337_v21 = vsel %vm1313_vm3, %v6079_v7, %v6084_v46 }
 0x23d   : > { %v1449_v58 = vsel %vm1443_vm7, %v1416_v37, %v6077_v25  ;;  %v6085_v37 = vld [vmem:[#allocation125_spill] sm:$0xff] }
 0x23e   : > { %v1369_v25 = vsel %vm1345_vm4, %v1337_v21, %v6085_v37  ;;  %v6096_v37 = vld [vmem:[#allocation15_spill] sm:$0xff] }
 0x240   : > { %1133 = vrot.lane.b32.xlu2 %v6071_v32, %s3227_s8  ;;  %v6082_v32 = vld [vmem:[#allocation67_spill] sm:$0xff] }
 0x241   : > { %1056 = vrot.lane.b32.xlu1 %v5965_v40, %s3226_s7  ;;  %1149 = vrot.lane.b32.xlu0 %v6074_v33, %s3227_s8 }
 0x242   : > { %v1253_v55 = vpop.permute.xlu2 %1252 }
 0x243   : > { %v1045_v6 = vpop.permute.xlu1 %1044  ;;  %v1049_v15 = vpop.permute.xlu0 %1048 }
 0x244   : > { %v4847_v40 = vsel %vm1476_vm8, %v1449_v58, %v1045_v6  ;;  %v4850_v61 = vsel %vm1476_vm8, %v1451_v19, %v1049_v15  ;;  %v6086_v58 = vld [vmem:[#allocation142_spill] sm:$0xff] }
 0x245   : > { %v1402_v19 = vsel %vm1377_vm5, %v1369_v25, %v6086_v58  ;;  %v6088_v6 = vld [vmem:[#allocation166_spill] sm:$0xff] }
 0x246   : > { %v1435_v15 = vsel %vm1410_vm6, %v1402_v19, %v6088_v6 }
 0x248   : > { %1090 = vrot.lane.b32.xlu2 %v6078_v23, %s3226_s7  ;;  %v6089_v23 = vld [vmem:[#allocation84_spill] sm:$0xff] }
 0x249   : > { %1074 = vrot.lane.b32.xlu1 %v6079_v7, %s3226_s7  ;;  %1226 = vrot.lane.b32.xlu0 %v6080_v53, %s3228_s9 }
 0x24a   : > { %v1144_v8 = vpop.permute.xlu2 %1143 }
 0x24b   : > { %v1051_v17 = vpop.permute.xlu1 %1050  ;;  %v1055_v38 = vpop.permute.xlu0 %1054 }
 0x24c   : > { %v4860_v3 = vsel %vm1476_vm8, %v4480_v62, %v1055_v38 }
 0x250   : > { %1167 = vrot.lane.b32.xlu2 %v6081_v0, %s3227_s8 }
 0x251   : > { %1242 = vrot.lane.b32.xlu1 %v6082_v32, %s3228_s9  ;;  %1183 = vrot.lane.b32.xlu0 %v6083_v41, %s3227_s8 }
 0x252   : > { %v1221_v45 = vpop.permute.xlu2 %1220 }
 0x253   : > { %v1067_v27 = vpop.permute.xlu1 %1066  ;;  %v1160_v20 = vpop.permute.xlu0 %1159 }
 0x254   : > { %v1493_v33 = vsel %vm1476_vm8, %v4564_v1, %v1067_v27  ;;  %v6087_v1 = vld [vmem:[#allocation162_spill] sm:$0xff]  ;;  %v6090_v27 = vld [vmem:[#allocation123_spill] sm:$0xff] }
 0x255   : > { %v1526_v62 = vsel %vm1509_vm11, %v1493_v33, %v1160_v20  ;;  %v1378_v20 = vsel %vm1377_vm5, %v4739_v28, %v6090_v27  ;;  %v6092_v33 = vld [vmem:[#allocation62_spill] sm:$0xff]  ;;  %v6102_v27 = vld [vmem:[#allocation119_spill] sm:$0xff] }
 0x256   : > { %v1559_v14 = vsel %vm1542_vm10, %v1526_v62, %v1253_v55  ;;  %v1468_v55 = vsel %vm1443_vm7, %v1435_v15, %v4628_v36  ;;  %v1411_v36 = vsel %vm1410_vm6, %v1378_v20, %v6092_v33  ;;  %v6094_v62 = vld [vmem:[#allocation169_spill] sm:$0xff]  ;;  %v6103_v20 = vld [vmem:[#allocation72_spill] sm:$0xff] }
 0x257   : > { %2939 = vmatmul.msk.f32.vlgmr.msra.gmra.mxu2 %vm1584_vm12, %v1559_v14  ;;  %v1501_v53 = vsel %vm1476_vm8, %v1468_v55, %v1083_v51  ;;  %v6093_v51 = vld [vmem:[#allocation17_spill] sm:$0xff]  ;;  %v1444_v46 = vsel %vm1443_vm7, %v1411_v36, %v6094_v62  ;;  %v6095_v14 = vld [vmem:[#allocation80_spill] sm:$0xff] }
 0x258   : > { %1276 = vrot.lane.b32.xlu2 %v6087_v1, %s3228_s9  ;;  %v1321_v28 = vsel %vm1313_vm3, %v6096_v37, %v6095_v14  ;;  %v1477_v25 = vsel %vm1476_vm8, %v1444_v46, %v4624_v18  ;;  %v6097_v1 = vld [vmem:[#allocation103_spill] sm:$0xff]  ;;  %v6105_v62 = vld [vmem:[#allocation40_spill] sm:$0xff]  ;;  %v6106_v46 = vld [vmem:[#allocation89_spill] sm:$0xff]  ;;  %vm2770_vm3 = vcmask 1047559  }
 0x259   : > { %1260 = vrot.lane.b32.xlu1 %v6089_v23, %s3228_s9  ;;  %1058 = vrot.lane.b32.xlu0 %v5978_v56, %s3226_s7  ;;  %v6091_v56 = vld [vmem:[#allocation26_spill] sm:$0xff]  ;;  %v1353_v6 = vsel %vm1345_vm4, %v1321_v28, %v6097_v1  ;;  %v6098_v23 = vld [vmem:[#allocation139_spill] sm:$0xff] }
 0x25a   : > { %v1178_v7 = vpop.permute.xlu2 %1177 }
 0x25b   : > { %v1176_v38 = vpop.permute.xlu1 %1175  ;;  %v1269_v0 = vpop.permute.xlu0 %1268 }
 0x25c   : > { %v1534_v32 = vsel %vm1509_vm11, %v1501_v53, %v1176_v38  ;;  %v6099_v53 = vld [vmem:[#allocation159_spill] sm:$0xff] }
 0x25d   : > { %v1567_v41 = vsel %vm1542_vm10, %v1534_v32, %v1269_v0  ;;  %v6100_v0 = vld [vmem:[#allocation168_spill] sm:$0xff] }
 0x25e   : > { %2947 = vmatmul.msk.f32.vlgmr.msra.gmra.mxu3 %vm1584_vm12, %v1567_v41  ;;  %v6101_v41 = vld [vmem:[#allocation56_spill] sm:$0xff] }
 0x260   : > { %1151 = vrot.lane.b32.xlu2 %v6091_v56, %s3227_s8 }
 0x261   : > { %1135 = vrot.lane.b32.xlu1 %v6093_v51, %s3227_s8  ;;  %1076 = vrot.lane.b32.xlu0 %v6013_v63, %s3226_s7  ;;  %v1386_v63 = vsel %vm1377_vm5, %v1353_v6, %v6098_v23  ;;  %v6107_v6 = vld [vmem:[#allocation163_spill] sm:$0xff] }
 0x262   : > { %v1130_v21 = vpop.permute.xlu2 %1129  ;;  %v1419_v38 = vsel %vm1410_vm6, %v1386_v63, %v6099_v53 }
 0x263   : > { %v1128_v58 = vpop.permute.xlu1 %1127  ;;  %v1069_v19 = vpop.permute.xlu0 %1068  ;;  %v1452_v18 = vsel %vm1443_vm7, %v1419_v38, %v6100_v0  ;;  %v1511_v38 = vsel %vm1509_vm11, %v4779_v26, %v1130_v21 }
 0x264   : > { %v1510_v15 = vsel %vm1509_vm11, %v1477_v25, %v1128_v58  ;;  %v1485_v32 = vsel %vm1476_vm8, %v1452_v18, %v1051_v17  ;;  %v6104_v17 = vld [vmem:[#allocation146_spill] sm:$0xff]  ;;  %v1494_v37 = vsel %vm1476_vm8, %v4437_v4, %v1069_v19 }
 0x265   : > { %v1543_v55 = vsel %vm1542_vm10, %v1510_v15, %v1221_v45  ;;  %v1518_v36 = vsel %vm1509_vm11, %v1485_v32, %v1144_v8  ;;  %v6108_v15 = vld [vmem:[#allocation16_spill] sm:$0xff]  ;;  %v6111_v32 = vld [vmem:[#allocation71_spill] sm:$0xff] }
 0x266   : > { %2923 = vmatmul.msk.f32.vlgmr.msra.gmra.mxu0 %vm1584_vm12, %v1543_v55 }
 0x268   : > { %1228 = vrot.lane.b32.xlu2 %v6101_v41, %s3228_s9  ;;  %v6113_v41 = vld [vmem:[#allocation44_spill] sm:$0xff] }
 0x269   : > { %1092 = vrot.lane.b32.xlu1 %v6102_v27, %s3226_s7  ;;  %1244 = vrot.lane.b32.xlu0 %v6103_v20, %s3228_s9 }
 0x26a   : > { %v1087_v45 = vpop.permute.xlu2 %1086 }
 0x26b   : > { %v1085_v56 = vpop.permute.xlu1 %1084  ;;  %v1237_v33 = vpop.permute.xlu0 %1236  ;;  %v1503_v20 = vsel %vm1476_vm8, %v4561_v47, %v1087_v45  ;;  %v6114_v47 = vld [vmem:[#allocation88_spill] sm:$0xff]  ;;  %v6116_v45 = vld [vmem:[#allocation50_spill] sm:$0xff] }
 0x26c   : > { %v1551_v51 = vsel %vm1542_vm10, %v1518_v36, %v1237_v33  ;;  %v1502_v1 = vsel %vm1476_vm8, %v4672_v30, %v1085_v56  ;;  %v6110_v30 = vmov 0.0  }
 0x26d   : > { %2931 = vmatmul.msk.f32.vlgmr.msra.gmra.mxu1 %vm1584_vm12, %v1551_v51  ;;  %v1535_v63 = vsel %vm1509_vm11, %v1502_v1, %v1178_v7 }
 0x270   : > { %1185 = vrot.lane.b32.xlu2 %v6104_v17, %s3227_s8 }
 0x271   : > { %1169 = vrot.lane.b32.xlu1 %v6105_v62, %s3227_s8  ;;  %1262 = vrot.lane.b32.xlu0 %v6106_v46, %s3228_s9 }
 0x272   : > { %v1164_v14 = vpop.permute.xlu2 %1163 }
 0x273   : > { %v1162_v28 = vpop.permute.xlu1 %1161  ;;  %v1255_v25 = vpop.permute.xlu0 %1254 }
 0x274   : > { %v1527_v8 = vsel %vm1509_vm11, %v1494_v37, %v1162_v28 }
 0x275   : > { %v1560_v58 = vsel %vm1542_vm10, %v1527_v8, %v1255_v25  ;;  %v6118_v8 = vld [vmem:[#allocation29_spill] sm:$0xff] }
 0x276   : > { %2940 = vmatmul.msk.f32.gmra.mxu2 %vm1584_vm12, %v1560_v58 }
 0x278   : > { %1060 = vrot.lane.b32.xlu2 %v3462_v35, %s3226_s7  ;;  %v6109_v35 = vld [vmem:[#allocation30_spill] sm:$0xff] }
 0x279   : > { %1278 = vrot.lane.b32.xlu1 %v6107_v6, %s3228_s9  ;;  %1137 = vrot.lane.b32.xlu0 %v6108_v15, %s3227_s8 }
 0x27a   : > { %v1273_v4 = vpop.permute.xlu2 %1272 }
 0x27b   : > { %v1271_v19 = vpop.permute.xlu1 %1270  ;;  %v1146_v23 = vpop.permute.xlu0 %1145 }
 0x27c   : > { %v1568_v55 = vsel %vm1542_vm10, %v1535_v63, %v1271_v19  ;;  %v1519_v26 = vsel %vm1509_vm11, %v4770_v49, %v1146_v23  ;;  %v6115_v49 = vld [vmem:[#allocation5_spill] sm:$0xff] }
 0x27d   : > { %2948 = vmatmul.msk.f32.gmra.mxu3 %vm1584_vm12, %v1568_v55 }
 0x280   : > { %1078 = vrot.lane.b32.xlu2 %v5974_v5, %s3226_s7  ;;  %v6112_v5 = vld [vmem:[#allocation58_spill] sm:$0xff] }
 0x281   : > { %1153 = vrot.lane.b32.xlu1 %v6109_v35, %s3227_s8  ;;  %1094 = vrot.lane.b32.xlu0 %v6110_v30, %s3226_s7 }
 0x282   : > { %v1073_v53 = vpop.permute.xlu2 %1072 }
 0x283   : > { %v1071_v0 = vpop.permute.xlu1 %1070  ;;  %v1223_v18 = vpop.permute.xlu0 %1222  ;;  %v1496_v23 = vsel %vm1476_vm8, %v4606_v29, %v1073_v53  ;;  %v6122_v29 = vld [vmem:[#allocation43_spill] sm:$0xff] }
 0x284   : > { %v1544_v7 = vsel %vm1542_vm10, %v1511_v38, %v1223_v18  ;;  %v1495_v17 = vsel %vm1476_vm8, %v4567_v13, %v1071_v0  ;;  %v6117_v13 = vld [vmem:[#allocation18_spill] sm:$0xff] }
 0x285   : > { %2924 = vmatmul.msk.f32.gmra.mxu0 %vm1584_vm12, %v1544_v7  ;;  %v1528_v28 = vsel %vm1509_vm11, %v1495_v17, %v1164_v14  ;;  %v6121_v38 = vld [vmem:[#allocation90_spill] sm:$0xff] }
 0x288   : > { %1246 = vrot.lane.b32.xlu2 %v6111_v32, %s3228_s9 }
 0x289   : > { %1230 = vrot.lane.b32.xlu1 %v6112_v5, %s3228_s9  ;;  %1171 = vrot.lane.b32.xlu0 %v6113_v41, %s3227_s8  ;;  %v6123_v5 = vld [vmem:[#allocation31_spill] sm:$0xff]  ;;  %v6124_v41 = vld [vmem:[#allocation20_spill] sm:$0xff] }
 0x28a   : > { %v1241_v27 = vpop.permute.xlu2 %1240 }
 0x28b   : > { %v1239_v21 = vpop.permute.xlu1 %1238  ;;  %v1180_v56 = vpop.permute.xlu0 %1179 }
 0x28c   : > { %v1536_v33 = vsel %vm1509_vm11, %v1503_v20, %v1180_v56  ;;  %v1552_v36 = vsel %vm1542_vm10, %v1519_v26, %v1239_v21  ;;  %v6126_v26 = vld [vmem:[#allocation77_spill] sm:$0xff] }
 0x28d   : > { %2932 = vmatmul.msk.f32.gmra.mxu1 %vm1584_vm12, %v1552_v36  ;;  %v1569_v51 = vsel %vm1542_vm10, %v1536_v33, %v1273_v4  ;;  %v6119_v4 = vld [vmem:[#allocation61_spill] sm:$0xff] }
 0x28e   : > { %2949 = vmatmul.msk.f32.gmra.mxu3 %vm1584_vm12, %v1569_v51 }
 0x290   : > { %1264 = vrot.lane.b32.xlu2 %v6114_v47, %s3228_s9 }
 0x291   : > { %1187 = vrot.lane.b32.xlu1 %v6115_v49, %s3227_s8  ;;  %1280 = vrot.lane.b32.xlu0 %v6116_v45, %s3228_s9 }
 0x292   : > { %v1259_v62 = vpop.permute.xlu2 %1258 }
 0x293   : > { %v1257_v46 = vpop.permute.xlu1 %1256  ;;  %v1132_v37 = vpop.permute.xlu0 %1131 }
 0x294   : > { %v1561_v25 = vsel %vm1542_vm10, %v1528_v28, %v1257_v46 }
 0x295   : > { %2941 = vmatmul.msk.f32.gmra.mxu2 %vm1584_vm12, %v1561_v25 }
 0x298   : > { %1139 = vrot.lane.b32.xlu2 %v6117_v13, %s3227_s8 }
 0x299   : > { %1062 = vrot.lane.b32.xlu1 %v5976_v11, %s3226_s7  ;;  %1155 = vrot.lane.b32.xlu0 %v6118_v8, %s3227_s8  ;;  %v6120_v11 = vld [vmem:[#allocation73_spill] sm:$0xff] }
 0x29a   : > { %v1134_v58 = vpop.permute.xlu2 %1133 }
 0x29b   : > { %v1148_v1 = vpop.permute.xlu1 %1147  ;;  %v1089_v6 = vpop.permute.xlu0 %1088  ;;  %v1513_v56 = vsel %vm1509_vm11, %v4669_v34, %v1134_v58 }
 0x29c   : > { %v1520_v15 = vsel %vm1509_vm11, %v4860_v3, %v1148_v1  ;;  %v1512_v3 = vsel %vm1509_vm11, %v4813_v39, %v1132_v37  ;;  %v1504_v53 = vsel %vm1476_vm8, %v4675_v44, %v1089_v6 }
 0x29d   : > { %v1553_v14 = vsel %vm1542_vm10, %v1520_v15, %v1241_v27 }
 0x29e   : > { %2933 = vmatmul.msk.f32.gmra.mxu1 %vm1584_vm12, %v1553_v14 }
 0x2a0   : > { %1232 = vrot.lane.b32.xlu2 %v6119_v4, %s3228_s9 }
 0x2a1   : > { %1080 = vrot.lane.b32.xlu1 %v6011_v48, %s3226_s7  ;;  %1248 = vrot.lane.b32.xlu0 %v6120_v11, %s3228_s9 }
 0x2a2   : > { %v1091_v19 = vpop.permute.xlu2 %1090 }
 0x2a3   : > { %v1225_v63 = vpop.permute.xlu1 %1224  ;;  %v1166_v55 = vpop.permute.xlu0 %1165  ;;  %v1505_v49 = vsel %vm1476_vm8, %v4716_v50, %v1091_v19 }
 0x2a4   : > { %v1529_v35 = vsel %vm1509_vm11, %v1496_v23, %v1166_v55  ;;  %v1545_v30 = vsel %vm1542_vm10, %v1512_v3, %v1225_v63 }
 0x2a5   : > { %2925 = vmatmul.msk.f32.gmra.mxu0 %vm1584_vm12, %v1545_v30  ;;  %v1562_v48 = vsel %vm1542_vm10, %v1529_v35, %v1259_v62 }
 0x2a6   : > { %2942 = vmatmul.msk.f32.gmra.mxu2 %vm1584_vm12, %v1562_v48 }
 0x2a8   : > { %1266 = vrot.lane.b32.xlu2 %v6121_v38, %s3228_s9 }
 0x2a9   : > { %1173 = vrot.lane.b32.xlu1 %v6122_v29, %s3227_s8  ;;  %1064 = vrot.lane.b32.xlu0 %v5990_v60, %s3226_s7  ;;  %v6125_v60 = vld [vmem:[#allocation60_spill] sm:$0xff]  ;;  %s5313_s7 = scalar_lea.vmem [#allocation2], %s2919_s6 }
 0x2aa   : > { %v1168_v39 = vpop.permute.xlu2 %1167  ;;  %s2850_s19 = sshll.u32 %s5313_s7, 4  ;;  %s2851_s19 = int_to_ptr.vmem [resolvable:$true] %s2850_s19 }
 0x2ab   : > { %v1182_v0 = vpop.permute.xlu1 %1181  ;;  %v1275_v18 = vpop.permute.xlu0 %1274 }
 0x2ac   : > { %v1537_v7 = vsel %vm1509_vm11, %v1504_v53, %v1182_v0 }
 0x2ad   : > { %v1570_v32 = vsel %vm1542_vm10, %v1537_v7, %v1275_v18 }
 0x2ae   : > { %2950 = vmatmul.msk.f32.gmra.mxu3 %vm1584_vm12, %v1570_v32 }
 0x2b0   : > { %1157 = vrot.lane.b32.xlu2 %v6123_v5, %s3227_s8 }
 0x2b1   : > { %1141 = vrot.lane.b32.xlu1 %v6124_v41, %s3227_s8  ;;  %1234 = vrot.lane.b32.xlu0 %v6125_v60, %s3228_s9 }
 0x2b2   : > { %v1277_v27 = vpop.permute.xlu2 %1276 }
 0x2b3   : > { %v1057_v20 = vpop.permute.xlu1 %1056  ;;  %v1150_v44 = vpop.permute.xlu0 %1149 }
 0x2b4   : > { %v1488_v17 = vsel %vm1476_vm8, %v4393_v42, %v1057_v20 }
 0x2b5   : > { %v1521_v45 = vsel %vm1509_vm11, %v1488_v17, %v1150_v44 }
 0x2b9   : > { %1250 = vrot.lane.b32.xlu1 %v6126_v26, %s3228_s9 }
 0x2ba   : > { %v1152_v21 = vpop.permute.xlu2 %1151 }
 0x2bb   : > { %v1075_v33 = vpop.permute.xlu1 %1074  ;;  %v1227_v36 = vpop.permute.xlu0 %1226 }
 0x2bc   : > { %v1546_v51 = vsel %vm1542_vm10, %v1513_v56, %v1227_v36  ;;  %v1497_v42 = vsel %vm1476_vm8, %v4477_v22, %v1075_v33 }
 0x2bd   : > { %2926 = vmatmul.msk.f32.gmra.mxu0 %vm1584_vm12, %v1546_v51  ;;  %v1530_v8 = vsel %vm1509_vm11, %v1497_v42, %v1168_v39 }
 0x2c2   : > { %v1229_v47 = vpop.permute.xlu2 %1228 }
 0x2c3   : > { %v1243_v62 = vpop.permute.xlu1 %1242  ;;  %v1184_v46 = vpop.permute.xlu0 %1183 }
 0x2c4   : > { %v1538_v37 = vsel %vm1509_vm11, %v1505_v49, %v1184_v46  ;;  %v1554_v34 = vsel %vm1542_vm10, %v1521_v45, %v1243_v62 }
 0x2c5   : > { %2934 = vmatmul.msk.f32.gmra.mxu1 %vm1584_vm12, %v1554_v34  ;;  %v1571_v28 = vsel %vm1542_vm10, %v1538_v37, %v1277_v27 }
 0x2c6   : > { %2951 = vmatmul.msk.f32.gmra.mxu3 %vm1584_vm12, %v1571_v28 }
 0x2ca   : > { %v1186_v25 = vpop.permute.xlu2 %1185 }
 0x2cb   : > { %v1261_v13 = vpop.permute.xlu1 %1260  ;;  %v1059_v50 = vpop.permute.xlu0 %1058 }
 0x2cc   : > { %v1563_v58 = vsel %vm1542_vm10, %v1530_v8, %v1261_v13  ;;  %v1489_v22 = vsel %vm1476_vm8, %v4483_v43, %v1059_v50 }
 0x2cd   : > { %2943 = vmatmul.msk.f32.gmra.mxu2 %vm1584_vm12, %v1563_v58  ;;  %v1522_v3 = vsel %vm1509_vm11, %v1489_v22, %v1152_v21 }
 0x2d2   : > { %v1061_v1 = vpop.permute.xlu2 %1060 }
 0x2d3   : > { %v1136_v6 = vpop.permute.xlu1 %1135  ;;  %v1077_v15 = vpop.permute.xlu0 %1076  ;;  %v1490_v7 = vsel %vm1476_vm8, %v4522_v2, %v1061_v1 }
 0x2d4   : > { %v1514_v14 = vsel %vm1509_vm11, %v4816_v31, %v1136_v6  ;;  %v1498_v55 = vsel %vm1476_vm8, %v4609_v52, %v1077_v15  ;;  %v5076_v52 = vld [vmem:[%s5623_s2] ss:$0 sm:$0xff] }
 0x2d5   : > { %v1547_v4 = vsel %vm1542_vm10, %v1514_v14, %v1229_v47 }
 0x2d6   : > { %2927 = vmatmul.msk.f32.gmra.mxu0 %vm1584_vm12, %v1547_v4 }
 0x2da   : > { %v1079_v11 = vpop.permute.xlu2 %1078  ;;  %v1750_v32 = vpop.f32.mrf.mxu2 }
 0x2db   : > { %v1093_v19 = vpop.permute.xlu1 %1092  ;;  %v1245_v23 = vpop.permute.xlu0 %1244  ;;  %v1751_v27 = vadd.f32 %v5076_v52, %v1750_v32  ;;  %v1499_v36 = vsel %vm1476_vm8, %v4631_v9, %v1079_v11 }
 0x2dc   : > { %v1555_v63 = vsel %vm1542_vm10, %v1522_v3, %v1245_v23  ;;  %v1506_v43 = vsel %vm1476_vm8, %v4603_v57, %v1093_v19 }
 0x2dd   : > { %2935 = vmatmul.msk.f32.gmra.mxu1 %vm1584_vm12, %v1555_v63  ;;  %v1539_v39 = vsel %vm1509_vm11, %v1506_v43, %v1186_v25  ;;  %v1814_v26 = vmax.f32 %v1751_v27, 0.0 }
 0x2df   : > { %v1910_v45 = vrot.slane %v1814_v26, 2  ;;  %v1911_v62 = vrot.slane %v1814_v26, 4  ;;  %v1912_v37 = vrot.slane %v1814_v26, 6  ;;  %v2987_v42 = vrot.slane %v1814_v26, 9 }
 0x2e1   : > { %v1774_v44 = vpop.f32.mrf.mxu3  ;;  %v2988_v25 = vrot.slane %v1910_v45, 9  ;;  %v2989_v13 = vrot.slane %v1911_v62, 9  ;;  %v2990_v8 = vrot.slane %v1912_v37, 9 }
 0x2e2   : > { %v1247_v31 = vpop.permute.xlu2 %1246  ;;  %v1775_v21 = vadd.f32 %v5076_v52, %v1774_v44 }
 0x2e3   : > { %v1170_v35 = vpop.permute.xlu1 %1169  ;;  %v1263_v48 = vpop.permute.xlu0 %1262 }
 0x2e4   : > { %v1531_v30 = vsel %vm1509_vm11, %v1498_v55, %v1170_v35  ;;  %v1702_v56 = vpop.f32.mrf.mxu0  ;;  %v1822_v34 = vmax.f32 %v1775_v21, 0.0  ;;  %v5110_v55 = vmax.f32 %v1814_v26, %v2987_v42 }
 0x2e5   : > { %v1564_v38 = vsel %vm1542_vm10, %v1531_v30, %v1263_v48  ;;  %v1703_v46 = vadd.f32 %v5076_v52, %v1702_v56  ;;  %v5115_v30 = vmax.f32 %v1910_v45, %v2988_v25  ;;  %v5117_v48 = vmax.f32 %v1911_v62, %v2989_v13 }
 0x2e6   : > { %2944 = vmatmul.msk.f32.gmra.mxu2 %vm1584_vm12, %v1564_v38  ;;  %v1934_v58 = vrot.slane %v1822_v34, 2  ;;  %v1935_v4 = vrot.slane %v1822_v34, 4  ;;  %v1936_v3 = vrot.slane %v1822_v34, 6  ;;  %v3003_v63 = vrot.slane %v1822_v34, 9 }
 0x2e7   : > { %v5098_v50 = vmax.f32 %v1703_v46, 0.0  ;;  %v5119_v38 = vmax.f32 %v1912_v37, %v2990_v8 }
 0x2e8   : > { %v3004_v43 = vrot.slane %v1934_v58, 9  ;;  %v5125_v32 = vmax.f32 %v1822_v34, %v3003_v63 }
 0x2ea   : > { %v1265_v18 = vpop.permute.xlu2 %1264  ;;  %v1726_v47 = vpop.f32.mrf.mxu1  ;;  %v5135_v26 = vmax.f32 %v1934_v58, %v3004_v43 }
 0x2eb   : > { %v1279_v29 = vpop.permute.xlu1 %1278  ;;  %v1138_v53 = vpop.permute.xlu0 %1137  ;;  %v1727_v28 = vadd.f32 %v5076_v52, %v1726_v47 }
 0x2ec   : > { %v1572_v0 = vsel %vm1542_vm10, %v1539_v39, %v1279_v29  ;;  %v1515_v2 = vsel %vm1509_vm11, %v4847_v40, %v1138_v53  ;;  %v3005_v29 = vrot.slane %v1935_v4, 9  ;;  %v1863_v39 = vrot.slane %v5098_v50, 4 }
 0x2ed   : > { %2952 = vmatmul.msk.f32.gmra.mxu3 %vm1584_vm12, %v1572_v0  ;;  %v5105_v22 = vmax.f32 %v1727_v28, 0.0  ;;  %v1864_v53 = vrot.slane %v5098_v50, 6 }
 0x2ee   : > { %v5141_v45 = vmax.f32 %v1935_v4, %v3005_v29 }
 0x2ef   : > { %v1886_v0 = vrot.slane %v5105_v22, 2  ;;  %v1888_v21 = vrot.slane %v5105_v22, 6 }
 0x2f1   : > { %v2972_v47 = vrot.slane %v1886_v0, 9  ;;  %v2974_v28 = vrot.slane %v1888_v21, 9 }
 0x2f2   : > { %v1140_v20 = vpop.permute.xlu2 %1139 }
 0x2f3   : > { %v1154_v5 = vpop.permute.xlu1 %1153  ;;  %v5081_v41 = vpop.permute.xlu0 %1094  ;;  %v1516_v1 = vsel %vm1509_vm11, %v4713_v59, %v1140_v20  ;;  %v1862_v59 = vrot.slane %v5098_v50, 2  ;;  %v5162_v58 = vmax.f32 %v1886_v0, %v2972_v47  ;;  %v5170_v63 = vmax.f32 %v1888_v21, %v2974_v28 }
 0x2f4   : > { %v1523_v57 = vsel %vm1509_vm11, %v1490_v7, %v1154_v5  ;;  %v1507_v6 = vsel %vm1476_vm8, %v4719_v54, %v5081_v41  ;;  %v3006_v7 = vrot.slane %v1936_v3, 9  ;;  %v1887_v5 = vrot.slane %v5105_v22, 4 }
 0x2f5   : > { %v1556_v60 = vsel %vm1542_vm10, %v1523_v57, %v1247_v31  ;;  %v2956_v27 = vrot.slane %v1862_v59, 9  ;;  %v1508_v20 = vsel %vm1476_vm8, %v4776_v24, %v5081_v41 }
 0x2f6   : > { %2936 = vmatmul.msk.f32.gmra.mxu1 %vm1584_vm12, %v1556_v60  ;;  %v2955_v60 = vrot.slane %v5098_v50, 9  ;;  %v5143_v24 = vmax.f32 %v1936_v3, %v3006_v7  ;;  %v2973_v41 = vrot.slane %v1887_v5, 9 }
 0x2f7   : > { %v5148_v37 = vmax.f32 %v1862_v59, %v2956_v27 }
 0x2f8   : > { %v5146_v46 = vmax.f32 %v5098_v50, %v2955_v60 }
 0x2f9   : > { %v1753_v15 = vpop.f32.mrf.mxu2 }
 0x2fa   : > { %v1233_v9 = vpop.permute.xlu2 %1232  ;;  %v1754_v54 = vadd.f32 %v5076_v52, %v1753_v15 }
 0x2fb   : > { %v1231_v33 = vpop.permute.xlu1 %1230  ;;  %v1172_v51 = vpop.permute.xlu0 %1171  ;;  %v1549_v23 = vsel %vm1542_vm10, %v1516_v1, %v1233_v9  ;;  %v5164_v1 = vmax.f32 %v1887_v5, %v2973_v41 }
 0x2fc   : > { %v1548_v17 = vsel %vm1542_vm10, %v1515_v2, %v1231_v33  ;;  %v1532_v49 = vsel %vm1509_vm11, %v1499_v36, %v1172_v51  ;;  %v5133_v44 = vmax.f32 %v1754_v54, 0.0  ;;  %v2957_v36 = vrot.slane %v1863_v39, 9 }
 0x2fd   : > { %2928 = vmatmul.msk.f32.gmra.mxu0 %vm1584_vm12, %v1548_v17  ;;  %v1565_v40 = vsel %vm1542_vm10, %v1532_v49, %v1265_v18  ;;  %v2958_v51 = vrot.slane %v1864_v53, 9  ;;  %v2971_v17 = vrot.slane %v5105_v22, 9 }
 0x2fe   : > { %2945 = vmatmul.msk.f32.gmra.mxu2 %vm1584_vm12, %v1565_v40  ;;  %v1913_v34 = vrot.slane %v5133_v44, 2  ;;  %v1914_v9 = vrot.slane %v5133_v44, 4  ;;  %v1915_v42 = vrot.slane %v5133_v44, 6  ;;  %v5155_v13 = vmax.f32 %v1863_v39, %v2957_v36 }
 0x2ff   : > { %v5157_v8 = vmax.f32 %v1864_v53, %v2958_v51  ;;  %v5160_v50 = vmax.f32 %v5105_v22, %v2971_v17 }
 0x300   : > { %v1777_v31 = vpop.f32.mrf.mxu3  ;;  %v2993_v22 = vrot.slane %v1914_v9, 9  ;;  %v2994_v59 = vrot.slane %v1915_v42, 9 }
 0x301   : > { %v1778_v57 = vadd.f32 %v5076_v52, %v1777_v31 }
 0x302   : > { %v1705_v18 = vpop.f32.mrf.mxu0  ;;  %v5183_v21 = vmax.f32 %v1914_v9, %v2993_v22 }
 0x303   : > { %v1188_v14 = vpop.permute.xlu1 %1187  ;;  %v1281_v19 = vpop.permute.xlu0 %1280  ;;  %v1706_v56 = vadd.f32 %v5076_v52, %v1705_v18  ;;  %v1823_v62 = vmax.f32 %v1778_v57, 0.0 }
 0x304   : > { %v1540_v11 = vsel %vm1509_vm11, %v1507_v6, %v1188_v14  ;;  %v1541_v2 = vsel %vm1509_vm11, %v1508_v20, %v1188_v14  ;;  %v2991_v6 = vrot.slane %v5133_v44, 9 }
 0x305   : > { %2929 = vmatmul.msk.f32.gmra.mxu0 %vm1584_vm12, %v1549_v23  ;;  %v1573_v35 = vsel %vm1542_vm10, %v1540_v11, %v1281_v19  ;;  %v1574_v40 = vsel %vm1542_vm10, %v1541_v2, %v1281_v19  ;;  %v1799_v25 = vmax.f32 %v1706_v56, 0.0  ;;  %v1937_v15 = vrot.slane %v1823_v62, 2 }
 0x306   : > { %2953 = vmatmul.msk.f32.gmra.mxu3 %vm1584_vm12, %v1573_v35  ;;  %v2992_v11 = vrot.slane %v1913_v34, 9  ;;  %v1938_v19 = vrot.slane %v1823_v62, 4  ;;  %v1939_v23 = vrot.slane %v1823_v62, 6  ;;  %v3007_v0 = vrot.slane %v1823_v62, 9 }
 0x307   : > { %v1865_v54 = vrot.slane %v1799_v25, 2  ;;  %v1866_v35 = vrot.slane %v1799_v25, 4  ;;  %v1867_v43 = vrot.slane %v1799_v25, 6  ;;  %v3008_v18 = vrot.slane %v1937_v15, 9 }
 0x308   : > { %v5179_v57 = vmax.f32 %v1913_v34, %v2992_v11  ;;  %v3009_v60 = vrot.slane %v1938_v19, 9  ;;  %v3010_v27 = vrot.slane %v1939_v23, 9  ;;  %v2959_v56 = vrot.slane %v1799_v25, 9 }
 0x309   : > { %v2960_v2 = vrot.slane %v1865_v54, 9  ;;  %v2962_v36 = vrot.slane %v1867_v43, 9  ;;  %v5189_v41 = vmax.f32 %v1823_v62, %v3007_v0  ;;  %v5191_v34 = vmax.f32 %v1937_v15, %v3008_v18 }
 0x30a   : > { %v1729_v7 = vpop.f32.mrf.mxu1  ;;  %v5194_v28 = vmax.f32 %v1938_v19, %v3009_v60  ;;  %v5196_v9 = vmax.f32 %v1939_v23, %v3010_v27 }
 0x30b   : > { %v1063_v33 = vpop.permute.xlu1 %1062  ;;  %v1156_v49 = vpop.permute.xlu0 %1155  ;;  %v1730_v51 = vadd.f32 %v5076_v52, %v1729_v7  ;;  %v5202_v11 = vmax.f32 %v1865_v54, %v2960_v2  ;;  %v5206_v15 = vmax.f32 %v1867_v43, %v2962_v36 }
 0x30c   : > { %v1491_v14 = vsel %vm1476_vm8, %v4415_v10, %v1063_v33  ;;  %v5176_v10 = vmax.f32 %v5133_v44, %v2991_v6  ;;  %v2961_v33 = vrot.slane %v1866_v35, 9  ;;  %v1267_v43 = vpop.permute.xlu2 %1266 }
 0x30d   : > { %v1524_v29 = vsel %vm1509_vm11, %v1491_v14, %v1156_v49  ;;  %v5187_v49 = vmax.f32 %v1915_v42, %v2994_v59  ;;  %v5208_v59 = vmax.f32 %v1730_v51, 0.0 }
 0x30e   : > { %2954 = vmatmul.msk.f32.gmra.mxu3 %vm1584_vm12, %v1574_v40  ;;  %v5204_v22 = vmax.f32 %v1866_v35, %v2961_v33 }
 0x30f   : > { %v1891_v36 = vrot.slane %v5208_v59, 6 }
 0x311   : > { %v1780_v4 = vpop.f32.mrf.mxu3 }
 0x312   : > { %v1781_v3 = vadd.f32 %v5076_v52, %v1780_v4  ;;  %v5200_v4 = vmax.f32 %v1799_v25, %v2959_v56 }
 0x313   : > { %v1081_v31 = vpop.permute.xlu1 %1080  ;;  %v1249_v53 = vpop.permute.xlu0 %1248 }
 0x314   : > { %v5173_v39 = vmax.f32 %v1781_v3, 0.0  ;;  %v1557_v5 = vsel %vm1542_vm10, %v1524_v29, %v1249_v53  ;;  %v1500_v23 = vsel %vm1476_vm8, %v4519_v12, %v1081_v31 }
 0x315   : > { %2937 = vmatmul.msk.f32.gmra.mxu1 %vm1584_vm12, %v1557_v5 }
 0x316   : > { %v1940_v20 = vrot.slane %v5173_v39, 2  ;;  %v1941_v44 = vrot.slane %v5173_v39, 4  ;;  %v1942_v6 = vrot.slane %v5173_v39, 6  ;;  %v3067_v14 = vrot.slane %v5173_v39, 9 }
 0x318   : > { %v3068_v17 = vrot.slane %v1940_v20, 9  ;;  %v1756_v47 = vpop.f32.mrf.mxu2  ;;  %v3069_v42 = vrot.slane %v1941_v44, 9  ;;  %v3070_v54 = vrot.slane %v1942_v6, 9  ;;  %v2550_v18 = vmax.f32 %v5173_v39, %v3067_v14 }
 0x319   : > { %v1757_v40 = vadd.f32 %v5076_v52, %v1756_v47  ;;  %v1890_v39 = vrot.slane %v5208_v59, 4 }
 0x31a   : > { %v2551_v19 = vmax.f32 %v1940_v20, %v3068_v17  ;;  %v2552_v5 = vmax.f32 %v1941_v44, %v3069_v42  ;;  %v1889_v20 = vrot.slane %v5208_v59, 2  ;;  %v2553_v17 = vmax.f32 %v1942_v6, %v3070_v54 }
 0x31b   : > { %v1816_v3 = vmax.f32 %v1757_v40, 0.0  ;;  %v1174_v62 = vpop.permute.xlu1 %1173  ;;  %v1732_v0 = vpop.f32.mrf.mxu1  ;;  %v2614_v47 = vmax.f32 %v5125_v32, %v2550_v18 }
 0x31c   : > { %v1533_v35 = vsel %vm1509_vm11, %v1500_v23, %v1174_v62  ;;  %v2615_v2 = vmax.f32 %v5135_v26, %v2551_v19  ;;  %v1733_v12 = vadd.f32 %v5076_v52, %v1732_v0  ;;  %v1065_v31 = vpop.permute.xlu0 %1064  ;;  %v2616_v42 = vmax.f32 %v5141_v45, %v2552_v5 }
 0x31d   : > { %v1916_v29 = vrot.slane %v1816_v3, 2  ;;  %v1917_v53 = vrot.slane %v1816_v3, 4  ;;  %v3051_v25 = vrot.slane %v1816_v3, 9  ;;  %v1918_v7 = vrot.slane %v1816_v3, 6 }
 0x31e   : > { %v1566_v33 = vsel %vm1542_vm10, %v1533_v35, %v1267_v43  ;;  %v1808_v14 = vmax.f32 %v1733_v12, 0.0  ;;  %v2976_v32 = vrot.slane %v1889_v20, 9  ;;  %v2977_v0 = vrot.slane %v1890_v39, 9 }
 0x31f   : > { %v3052_v60 = vrot.slane %v1916_v29, 9  ;;  %v3053_v27 = vrot.slane %v1917_v53, 9  ;;  %v2534_v56 = vmax.f32 %v1816_v3, %v3051_v25  ;;  %2946 = vmatmul.msk.f32.gmra.mxu2 %vm1584_vm12, %v1566_v33  ;;  %v3054_v40 = vrot.slane %v1918_v7, 9 }
 0x320   : > { %v1892_v6 = vrot.slane %v1808_v14, 2  ;;  %v2742_v54 = vperm.slane %v2614_v47, 0  ;;  %v2744_v5 = vperm.slane %v2616_v42, 0  ;;  %v3035_v12 = vrot.slane %v1808_v14, 9 }
 0x321   : > { %v2535_v51 = vmax.f32 %v1916_v29, %v3052_v60  ;;  %v2536_v44 = vmax.f32 %v1917_v53, %v3053_v27  ;;  %v2598_v3 = vmax.f32 %v5110_v55, %v2534_v56  ;;  %v2975_v29 = vrot.slane %v5208_v59, 9 }
 0x322   : > { %v1708_v26 = vpop.f32.mrf.mxu0  ;;  %v2743_v53 = vperm.slane %v2615_v2, 0  ;;  %v1893_v55 = vrot.slane %v1808_v14, 4  ;;  %v2537_v18 = vmax.f32 %v1918_v7, %v3054_v40  ;;  %v1894_v60 = vrot.slane %v1808_v14, 6  ;;  %v1158_v7 = vpop.permute.xlu2 %1157 }
 0x323   : > { %v2599_v62 = vmax.f32 %v5115_v30, %v2535_v51  ;;  %v1709_v19 = vadd.f32 %v5076_v52, %v1708_v26  ;;  %v1142_v23 = vpop.permute.xlu1 %1141  ;;  %v2600_v25 = vmax.f32 %v5117_v48, %v2536_v44  ;;  %v2617_v30 = vmax.f32 %v5143_v24, %v2553_v17 }
 0x324   : > { %v2726_v43 = vperm.slane %v2598_v3, 0  ;;  %v3036_v48 = vrot.slane %v1892_v6, 9  ;;  %v5237_v27 = vrot.slane %v1891_v36, 9  ;;  %v2807_v56 = vsel %vm2758_vm13, %v2743_v53, %v2742_v54  ;;  %v1235_v42 = vpop.permute.xlu0 %1234 }
 0x325   : > { %v2727_v45 = vperm.slane %v2599_v62, 0  ;;  %v5233_v35 = vmax.f32 %v1709_v19, 0.0  ;;  %v2728_v2 = vperm.slane %v2600_v25, 0  ;;  %v3037_v51 = vrot.slane %v1893_v55, 9 }
 0x326   : > { %v1492_v24 = vsel %vm1476_vm8, %v4525_v16, %v1065_v31  ;;  %v5245_v17 = vmax.f32 %v5208_v59, %v2975_v29  ;;  %v2601_v47 = vmax.f32 %v5119_v38, %v2537_v18  ;;  %v1517_v26 = vsel %vm1509_vm11, %v4850_v61, %v1142_v23 }
 0x327   : > { %v2793_v33 = vsel %vm2758_vm13, %v2727_v45, %v2726_v43  ;;  %v1868_v44 = vrot.slane %v5233_v35, 2  ;;  %v1869_v40 = vrot.slane %v5233_v35, 4  ;;  %v2745_v3 = vperm.slane %v2617_v30, 0 }
 0x328   : > { %v2808_v62 = vsel %vm2760_vm14, %v2744_v5, %v2807_v56  ;;  %v3038_v19 = vrot.slane %v1894_v60, 9  ;;  %v2519_v53 = vmax.f32 %v1892_v6, %v3036_v48  ;;  %v2794_v25 = vsel %vm2760_vm14, %v2728_v2, %v2793_v33 }
 0x329   : > { %v1759_v16 = vpop.f32.mrf.mxu2  ;;  %v5253_v45 = vmax.f32 %v1808_v14, %v3035_v12  ;;  %v1525_v29 = vsel %vm1509_vm11, %v1492_v24, %v1158_v7  ;;  %v1870_v38 = vrot.slane %v5233_v35, 6  ;;  %v5257_v54 = vmax.f32 %v1893_v55, %v3037_v51 }
 0x32a   : > { %v3019_v61 = vrot.slane %v5233_v35, 9  ;;  %v3020_v23 = vrot.slane %v1868_v44, 9  ;;  %v1550_v30 = vsel %vm1542_vm10, %v1517_v26, %v1235_v42  ;;  %v2729_v18 = vperm.slane %v2601_v47, 0 }
 0x32b   : > { %v1251_v31 = vpop.permute.xlu1 %1250  ;;  %v3021_v5 = vrot.slane %v1869_v40, 9  ;;  %2930 = vmatmul.msk.f32.gmra.mxu0 %vm1584_vm12, %v1550_v30  ;;  %v1760_v6 = vadd.f32 %v5076_v52, %v1759_v16  ;;  %v5266_v43 = vmax.f32 %v1889_v20, %v2976_v32  ;;  %v5270_v55 = vmax.f32 %v1890_v39, %v2977_v0 }
 0x32c   : > { %v1558_v14 = vsel %vm1542_vm10, %v1525_v29, %v1251_v31  ;;  %v5272_v48 = vmax.f32 %v1894_v60, %v3038_v19  ;;  %v2583_v56 = vmax.f32 %v5162_v58, %v2519_v53  ;;  %v5277_v2 = vsel %vm2762_vm15, %v2745_v3, %v2808_v62 }
 0x32d   : > { %2938 = vmatmul.msk.f32.gmra.mxu1 %vm1584_vm12, %v1558_v14  ;;  %v2795_v12 = vsel %vm2762_vm15, %v2729_v18, %v2794_v25  ;;  %v3022_v33 = vrot.slane %v1870_v38, 9  ;;  %v1817_v51 = vmax.f32 %v1760_v6, 0.0  ;;  %v2582_v20 = vmax.f32 %v5160_v50, %v5253_v45 }
 0x32e   : > { %v2584_v39 = vmax.f32 %v5164_v1, %v5257_v54  ;;  %v2502_v32 = vmax.f32 %v5233_v35, %v3019_v61  ;;  %v2503_v0 = vmax.f32 %v1868_v44, %v3020_v23  ;;  %v2504_v60 = vmax.f32 %v1869_v40, %v3021_v5 }
 0x32f   : > { %v1919_v24 = vrot.slane %v1817_v51, 2  ;;  %v1920_v7 = vrot.slane %v1817_v51, 4  ;;  %v1921_v47 = vrot.slane %v1817_v51, 6  ;;  %v2585_v26 = vmax.f32 %v5170_v63, %v5272_v48 }
 0x330   : > { %v5287_v42 = vperm.slane %v2583_v56, 0  ;;  %v3055_v3 = vrot.slane %v1817_v51, 9  ;;  %v5290_v19 = vmax.f32 %v1870_v38, %v3022_v33  ;;  %v2566_v40 = vmax.f32 %v5146_v46, %v2502_v32 }
 0x331   : > { %v1783_v58 = vpop.f32.mrf.mxu3  ;;  %v3056_v35 = vrot.slane %v1919_v24, 9  ;;  %v3057_v44 = vrot.slane %v1920_v7, 9  ;;  %v3058_v53 = vrot.slane %v1921_v47, 9  ;;  %v2567_v16 = vmax.f32 %v5148_v37, %v2503_v0 }
 0x332   : > { %v1784_v62 = vadd.f32 %v5076_v52, %v1783_v58  ;;  %v2538_v31 = vmax.f32 %v1817_v51, %v3055_v3  ;;  %v2568_v29 = vmax.f32 %v5155_v13, %v2504_v60  ;;  %v2713_v59 = vperm.slane %v2585_v26, 0 }
 0x333   : > { %v2539_v61 = vmax.f32 %v1919_v24, %v3056_v35  ;;  %v2540_v23 = vmax.f32 %v1920_v7, %v3057_v44  ;;  %v2541_v30 = vmax.f32 %v1921_v47, %v3058_v53  ;;  %v2695_v0 = vperm.slane %v2567_v16, 0 }
 0x334   : > { %v1825_v25 = vmax.f32 %v1784_v62, 0.0  ;;  %v2602_v18 = vmax.f32 %v5176_v10, %v2538_v31 }
 0x335   : > { %v2603_v14 = vmax.f32 %v5179_v57, %v2539_v61  ;;  %v2604_v46 = vmax.f32 %v5183_v21, %v2540_v23  ;;  %v2605_v37 = vmax.f32 %v5187_v49, %v2541_v30  ;;  %v2694_v30 = vperm.slane %v2566_v40, 0 }
 0x336   : > { %v1943_v38 = vrot.slane %v1825_v25, 2  ;;  %v1944_v5 = vrot.slane %v1825_v25, 4  ;;  %v1945_v6 = vrot.slane %v1825_v25, 6  ;;  %v3071_v56 = vrot.slane %v1825_v25, 9 }
 0x337   : > { %v2730_v33 = vperm.slane %v2602_v18, 0  ;;  %v2731_v58 = vperm.slane %v2603_v14, 0  ;;  %v2732_v60 = vperm.slane %v2604_v46, 0  ;;  %v2733_v21 = vperm.slane %v2605_v37, 0 }
 0x338   : > { %v3072_v13 = vrot.slane %v1943_v38, 9  ;;  %v3073_v51 = vrot.slane %v1944_v5, 9  ;;  %v3074_v32 = vrot.slane %v1945_v6, 9  ;;  %v2554_v10 = vmax.f32 %v1825_v25, %v3071_v56 }
 0x339   : > { %v2796_v7 = vsel %vm2764_vm0, %v2730_v33, %v2795_v12  ;;  %v2569_v12 = vmax.f32 %v5157_v8, %v5290_v19  ;;  %v2696_v18 = vperm.slane %v2568_v29, 0  ;;  %v2759_v8 = vsel %vm2758_vm13, %v2695_v0, %v2694_v30 }
 0x33a   : > { %v1711_v24 = vpop.f32.mrf.mxu0  ;;  %v2555_v47 = vmax.f32 %v1943_v38, %v3072_v13  ;;  %v2556_v57 = vmax.f32 %v1944_v5, %v3073_v51  ;;  %v2557_v3 = vmax.f32 %v1945_v6, %v3074_v32  ;;  %v2797_v49 = vsel %vm2766_vm1, %v2731_v58, %v2796_v7 }
 0x33b   : > { %v2618_v62 = vmax.f32 %v5189_v41, %v2554_v10  ;;  %v1712_v35 = vadd.f32 %v5076_v52, %v1711_v24  ;;  %v2798_v44 = vsel %vm2768_vm2, %v2732_v60, %v2797_v49  ;;  %v2712_v32 = vperm.slane %v2584_v39, 0 }
 0x33c   : > { %v2619_v53 = vmax.f32 %v5191_v34, %v2555_v47  ;;  %v2620_v16 = vmax.f32 %v5194_v28, %v2556_v57  ;;  %v2621_v31 = vmax.f32 %v5196_v9, %v2557_v3  ;;  %v2799_v25 = vsel %vm2770_vm3, %v2733_v21, %v2798_v44 }
 0x33d   : > { %v2746_v61 = vperm.slane %v2618_v62, 0  ;;  %v1801_v23 = vmax.f32 %v1712_v35, 0.0  ;;  %2833 = vst [vmem:[%s5313_s7 + $0x20] sm:$0xff] %v2799_v25  ;;  %v2761_v24 = vsel %vm2760_vm14, %v2696_v18, %v2759_v8 }
 0x33e   : > { %v2747_v41 = vperm.slane %v2619_v53, 0  ;;  %v2748_v38 = vperm.slane %v2620_v16, 0  ;;  %v2749_v19 = vperm.slane %v2621_v31, 0 }
 0x33f   : > { %v2810_v34 = vsel %vm2764_vm0, %v2746_v61, %v5277_v2  ;;  %v1871_v28 = vrot.slane %v1801_v23, 2  ;;  %v1872_v9 = vrot.slane %v1801_v23, 4  ;;  %v1873_v5 = vrot.slane %v1801_v23, 6 }
 0x340   : > { %v2811_v6 = vsel %vm2766_vm1, %v2747_v41, %v2810_v34  ;;  %v3023_v40 = vrot.slane %v1801_v23, 9  ;;  %v2710_v2 = vperm.slane %v2582_v20, 0  ;;  %v2697_v20 = vperm.slane %v2569_v12, 0 }
 0x341   : > { %v2812_v29 = vsel %vm2768_vm2, %v2748_v38, %v2811_v6  ;;  %v3024_v14 = vrot.slane %v1871_v28, 9  ;;  %v3025_v46 = vrot.slane %v1872_v9, 9  ;;  %v3026_v37 = vrot.slane %v1873_v5, 9 }
 0x342   : > { %v1735_v56 = vpop.f32.mrf.mxu1  ;;  %v2813_v33 = vsel %vm2770_vm3, %v2749_v19, %v2812_v29  ;;  %v2506_v13 = vmax.f32 %v1801_v23, %v3023_v40  ;;  %v2779_v10 = vsel %vm2758_vm13, %v5287_v42, %v2710_v2  ;;  %v2763_v21 = vsel %vm2762_vm15, %v2697_v20, %v2761_v24 }
 0x343   : > { %v1736_v51 = vadd.f32 %v5076_v52, %v1735_v56  ;;  %2835 = vst [vmem:[%s5313_s7 + $0x30] sm:$0xff] %v2813_v33  ;;  %v2507_v0 = vmax.f32 %v1871_v28, %v3024_v14  ;;  %v2508_v58 = vmax.f32 %v1872_v9, %v3025_v46  ;;  %v2509_v60 = vmax.f32 %v1873_v5, %v3026_v37 }
 0x344   : > { %v2570_v50 = vmax.f32 %v5200_v4, %v2506_v13  ;;  %v2780_v23 = vsel %vm2760_vm14, %v2712_v32, %v2779_v10 }
 0x345   : > { %v1809_v45 = vmax.f32 %v1736_v51, 0.0  ;;  %v2571_v7 = vmax.f32 %v5202_v11, %v2507_v0  ;;  %v2572_v47 = vmax.f32 %v5204_v22, %v2508_v58  ;;  %v2573_v1 = vmax.f32 %v5206_v15, %v2509_v60 }
 0x346   : > { %v2698_v54 = vperm.slane %v2570_v50, 0  ;;  %v2269_v11 = vmax.f32 %v1891_v36, %v5237_v27  ;;  %v2781_v34 = vsel %vm2762_vm15, %v2713_v59, %v2780_v23 }
 0x347   : > { %v1895_v39 = vrot.slane %v1809_v45, 2  ;;  %v1896_v57 = vrot.slane %v1809_v45, 4  ;;  %v1897_v3 = vrot.slane %v1809_v45, 6  ;;  %v2699_v49 = vperm.slane %v2571_v7, 0 }
 0x348   : > { %v2700_v42 = vperm.slane %v2572_v47, 0  ;;  %v3039_v62 = vrot.slane %v1809_v45, 9  ;;  %v2765_v35 = vsel %vm2764_vm0, %v2698_v54, %v2763_v21  ;;  %v2701_v22 = vperm.slane %v2573_v1, 0 }
 0x349   : > { %v3040_v4 = vrot.slane %v1895_v39, 9  ;;  %v3041_v44 = vrot.slane %v1896_v57, 9  ;;  %v3042_v53 = vrot.slane %v1897_v3, 9  ;;  %v2767_v15 = vsel %vm2766_vm1, %v2699_v49, %v2765_v35  ;;  %v1786_v48 = vpop.f32.mrf.mxu3 }
 0x34a   : > { %v2522_v16 = vmax.f32 %v1809_v45, %v3039_v62  ;;  %v2769_v31 = vsel %vm2768_vm2, %v2700_v42, %v2767_v15 }
 0x34b   : > { %v2523_v12 = vmax.f32 %v1895_v39, %v3040_v4  ;;  %v2524_v25 = vmax.f32 %v1896_v57, %v3041_v44  ;;  %v2525_v61 = vmax.f32 %v1897_v3, %v3042_v53  ;;  %v2771_v30 = vsel %vm2770_vm3, %v2701_v22, %v2769_v31 }
 0x34c   : > { %v2586_v18 = vmax.f32 %v5245_v17, %v2522_v16  ;;  %2829 = vst [vmem:[%s5313_s7] sm:$0xff] %v2771_v30 }
 0x34d   : > { %v2587_v36 = vmax.f32 %v5266_v43, %v2523_v12  ;;  %v2588_v27 = vmax.f32 %v5270_v55, %v2524_v25  ;;  %v2589_v41 = vmax.f32 %v2269_v11, %v2525_v61  ;;  %v1787_v43 = vadd.f32 %v5076_v52, %v1786_v48 }
 0x34e   : > { %v2714_v38 = vperm.slane %v2586_v18, 0 }
 0x34f   : > { %v2715_v28 = vperm.slane %v2587_v36, 0  ;;  %v2716_v9 = vperm.slane %v2588_v27, 0  ;;  %v2717_v8 = vperm.slane %v2589_v41, 0  ;;  %v1826_v6 = vmax.f32 %v1787_v43, 0.0 }
 0x350   : > { %v2782_v5 = vsel %vm2764_vm0, %v2714_v38, %v2781_v34  ;;  %v1762_v55 = vpop.f32.mrf.mxu2 }
 0x351   : > { %v2783_v17 = vsel %vm2766_vm1, %v2715_v28, %v2782_v5  ;;  %v1763_v40 = vadd.f32 %v5076_v52, %v1762_v55  ;;  %v1946_v14 = vrot.slane %v1826_v6, 2  ;;  %v1947_v56 = vrot.slane %v1826_v6, 4 }
 0x352   : > { %v2784_v19 = vsel %vm2768_vm2, %v2716_v9, %v2783_v17  ;;  %v1948_v2 = vrot.slane %v1826_v6, 6  ;;  %v3011_v32 = vrot.slane %v1826_v6, 9 }
 0x353   : > { %v2785_v63 = vsel %vm2770_vm3, %v2717_v8, %v2784_v19  ;;  %v1714_v26 = vpop.f32.mrf.mxu0  ;;  %v1818_v46 = vmax.f32 %v1763_v40, 0.0  ;;  %v3012_v0 = vrot.slane %v1946_v14, 9  ;;  %v3013_v60 = vrot.slane %v1947_v56, 9 }
 0x354   : > { %2831 = vst [vmem:[%s5313_s7 + $0x10] sm:$0xff] %v2785_v63  ;;  %v1715_v29 = vadd.f32 %v5076_v52, %v1714_v26  ;;  %v3014_v10 = vrot.slane %v1948_v2, 9  ;;  %v5364_v57 = vmax.f32 %v1826_v6, %v3011_v32 }
 0x355   : > { %v1922_v58 = vrot.slane %v1818_v46, 2  ;;  %v1923_v24 = vrot.slane %v1818_v46, 4  ;;  %v1924_v20 = vrot.slane %v1818_v46, 6  ;;  %v2995_v7 = vrot.slane %v1818_v46, 9 }
 0x356   : > { %v1802_v33 = vmax.f32 %v1715_v29, 0.0  ;;  %v5366_v3 = vmax.f32 %v1946_v14, %v3012_v0  ;;  %v5369_v42 = vmax.f32 %v1947_v56, %v3013_v60  ;;  %v5371_v62 = vmax.f32 %v1948_v2, %v3014_v10 }
 0x357   : > { %v2996_v21 = vrot.slane %v1922_v58, 9  ;;  %v2997_v35 = vrot.slane %v1923_v24, 9  ;;  %v2998_v53 = vrot.slane %v1924_v20, 9  ;;  %v5373_v11 = vmax.f32 %v1818_v46, %v2995_v7 }
 0x358   : > { %v1874_v47 = vrot.slane %v1802_v33, 2  ;;  %v1875_v1 = vrot.slane %v1802_v33, 4  ;;  %v1876_v54 = vrot.slane %v1802_v33, 6  ;;  %v2963_v22 = vrot.slane %v1802_v33, 9 }
 0x359   : > { %v5375_v23 = vmax.f32 %v1922_v58, %v2996_v21  ;;  %v5377_v36 = vmax.f32 %v1923_v24, %v2997_v35  ;;  %v5379_v34 = vmax.f32 %v1924_v20, %v2998_v53 }
 0x35a   : > { %v1738_v37 = vpop.f32.mrf.mxu1  ;;  %v2964_v15 = vrot.slane %v1874_v47, 9  ;;  %v2965_v16 = vrot.slane %v1875_v1, 9  ;;  %v2966_v31 = vrot.slane %v1876_v54, 9  ;;  %v5381_v28 = vmax.f32 %v1802_v33, %v2963_v22 }
 0x35b   : > { %v1739_v51 = vadd.f32 %v5076_v52, %v1738_v37 }
 0x35c   : > { %v5383_v9 = vmax.f32 %v1874_v47, %v2964_v15  ;;  %v5386_v8 = vmax.f32 %v1875_v1, %v2965_v16  ;;  %v5388_v17 = vmax.f32 %v1876_v54, %v2966_v31 }
 0x35d   : > { %v1810_v39 = vmax.f32 %v1739_v51, 0.0 }
 0x35f   : > { %v1898_v12 = vrot.slane %v1810_v39, 2  ;;  %v1899_v25 = vrot.slane %v1810_v39, 4  ;;  %v1900_v30 = vrot.slane %v1810_v39, 6  ;;  %v2979_v18 = vrot.slane %v1810_v39, 9 }
 0x361   : > { %v2980_v19 = vrot.slane %v1898_v12, 9  ;;  %v2981_v63 = vrot.slane %v1899_v25, 9  ;;  %v2982_v48 = vrot.slane %v1900_v30, 9  ;;  %v5390_v43 = vmax.f32 %v1810_v39, %v2979_v18 }
 0x363   : > { %v5395_v51 = vmax.f32 %v1898_v12, %v2980_v19  ;;  %v5397_v32 = vmax.f32 %v1899_v25, %v2981_v63  ;;  %v5401_v60 = vmax.f32 %v1900_v30, %v2982_v48 }
 0x369   : > { %v1765_v13 = vpop.f32.mrf.mxu2 }
 0x36a   : > { %v1766_v50 = vadd.f32 %v5076_v52, %v1765_v13 }
 0x36c   : > { %v1819_v4 = vmax.f32 %v1766_v50, 0.0 }
 0x36e   : > { %v1925_v27 = vrot.slane %v1819_v4, 2  ;;  %v1926_v41 = vrot.slane %v1819_v4, 4  ;;  %v1927_v38 = vrot.slane %v1819_v4, 6  ;;  %v2999_v6 = vrot.slane %v1819_v4, 9 }
 0x370   : > { %v1789_v45 = vpop.f32.mrf.mxu3  ;;  %v3000_v40 = vrot.slane %v1925_v27, 9  ;;  %v3001_v29 = vrot.slane %v1926_v41, 9  ;;  %v3002_v14 = vrot.slane %v1927_v38, 9 }
 0x371   : > { %v1790_v49 = vadd.f32 %v5076_v52, %v1789_v45  ;;  %v5403_v45 = vmax.f32 %v1819_v4, %v2999_v6 }
 0x372   : > { %v5405_v20 = vmax.f32 %v1925_v27, %v3000_v40  ;;  %v5407_v7 = vmax.f32 %v1926_v41, %v3001_v29  ;;  %v5409_v1 = vmax.f32 %v1927_v38, %v3002_v14 }
 0x373   : > { %v1741_v61 = vpop.f32.mrf.mxu1  ;;  %v1827_v59 = vmax.f32 %v1790_v49, 0.0 }
 0x374   : > { %v1742_v5 = vadd.f32 %v5076_v52, %v1741_v61 }
 0x375   : > { %v1949_v55 = vrot.slane %v1827_v59, 2  ;;  %v1950_v26 = vrot.slane %v1827_v59, 4  ;;  %v1951_v37 = vrot.slane %v1827_v59, 6  ;;  %v3015_v56 = vrot.slane %v1827_v59, 9 }
 0x376   : > { %v5392_v2 = vmax.f32 %v1742_v5, 0.0 }
 0x377   : > { %v3016_v10 = vrot.slane %v1949_v55, 9  ;;  %v3017_v24 = vrot.slane %v1950_v26, 9  ;;  %v3018_v54 = vrot.slane %v1951_v37, 9  ;;  %v5411_v39 = vmax.f32 %v1827_v59, %v3015_v56 }
 0x378   : > { %v1901_v21 = vrot.slane %v5392_v2, 2  ;;  %v1903_v49 = vrot.slane %v5392_v2, 6  ;;  %v2983_v22 = vrot.slane %v5392_v2, 9 }
 0x379   : > { %v5420_v53 = vmax.f32 %v1950_v26, %v3017_v24  ;;  %v5423_v30 = vmax.f32 %v1951_v37, %v3018_v54 }
 0x37a   : > { %v1717_v44 = vpop.f32.mrf.mxu0  ;;  %v2984_v18 = vrot.slane %v1901_v21, 9  ;;  %v5427_v38 = vrot.slane %v1903_v49, 9  ;;  %v5431_v63 = vmax.f32 %v5392_v2, %v2983_v22 }
 0x37b   : > { %v1718_v0 = vadd.f32 %v5076_v52, %v1717_v44  ;;  %v5418_v44 = vmax.f32 %v1949_v55, %v3016_v10 }
 0x37d   : > { %v5416_v35 = vmax.f32 %v1718_v0, 0.0 }
 0x37f   : > { %v5750_v5 = vrot.slane %v5416_v35, 2  ;;  %v5749_v48 = vrot.slane %v5416_v35, 4  ;;  %v5748_v55 = vrot.slane %v5416_v35, 6 }
 0x381   : > { %v1768_v33 = vpop.f32.mrf.mxu2  ;;  %v5452_v10 = vrot.slane %v5750_v5, 9 }
 0x382   : > { %v1720_v46 = vpop.f32.mrf.mxu0  ;;  %v1769_v58 = vadd.f32 %v5076_v52, %v1768_v33  ;;  %v5444_v33 = vld [vmem:[%s5623_s2] ss:$0 sm:$0xff] }
 0x383   : > { %v1721_v13 = vadd.f32 %v5076_v52, %v1720_v46  ;;  %v1902_v52 = vrot.slane %v5392_v2, 4  ;;  %v5437_v46 = vmax.f32 %v1901_v21, %v2984_v18 }
 0x384   : > { %v1820_v47 = vmax.f32 %v1769_v58, 0.0 }
 0x385   : > { %v1804_v50 = vmax.f32 %v1721_v13, 0.0  ;;  %v2985_v41 = vrot.slane %v1902_v52, 9 }
 0x386   : > { %v1928_v16 = vrot.slane %v1820_v47, 2  ;;  %v1929_v31 = vrot.slane %v1820_v47, 4  ;;  %v1930_v59 = vrot.slane %v1820_v47, 6  ;;  %v3059_v27 = vrot.slane %v1820_v47, 9 }
 0x387   : > { %v1880_v4 = vrot.slane %v1804_v50, 2  ;;  %v1881_v15 = vrot.slane %v1804_v50, 4  ;;  %v1882_v12 = vrot.slane %v1804_v50, 6  ;;  %v3027_v25 = vrot.slane %v1804_v50, 9 }
 0x388   : > { %v3060_v6 = vrot.slane %v1928_v16, 9  ;;  %v3061_v40 = vrot.slane %v1929_v31, 9  ;;  %v3062_v37 = vrot.slane %v1930_v59, 9  ;;  %v5439_v56 = vmax.f32 %v1820_v47, %v3059_v27 }
 0x389   : > { %v1792_v61 = vpop.f32.mrf.mxu3  ;;  %v3028_v19 = vrot.slane %v1880_v4, 9  ;;  %v3029_v26 = vrot.slane %v1881_v15, 9  ;;  %v3030_v29 = vrot.slane %v1882_v12, 9  ;;  %v5435_v14 = vmax.f32 %v1804_v50, %v3027_v25 }
 0x38a   : > { %v1793_v13 = vadd.f32 %v5444_v33, %v1792_v61  ;;  %v5447_v0 = vmax.f32 %v1902_v52, %v2985_v41  ;;  %v5456_v50 = vrot.slane %v5749_v48, 9  ;;  %v5460_v47 = vrot.slane %v5748_v55, 9 }
 0x38b   : > { %v2511_v24 = vmax.f32 %v1880_v4, %v3028_v19  ;;  %v5462_v54 = vmax.f32 %v1881_v15, %v3029_v26  ;;  %v2543_v52 = vmax.f32 %v1928_v16, %v3060_v6  ;;  %v5464_v22 = vmax.f32 %v1929_v31, %v3061_v40 }
 0x38c   : > { %v1828_v21 = vmax.f32 %v1793_v13, 0.0  ;;  %v5466_v25 = vmax.f32 %v1882_v12, %v3030_v29  ;;  %v2574_v61 = vmax.f32 %v5381_v28, %v5435_v14  ;;  %v5470_v18 = vmax.f32 %v1930_v59, %v3062_v37 }
 0x38d   : > { %v2606_v27 = vmax.f32 %v5373_v11, %v5439_v56  ;;  %v2575_v15 = vmax.f32 %v5383_v9, %v2511_v24  ;;  %v2576_v12 = vmax.f32 %v5386_v8, %v5462_v54  ;;  %v2607_v40 = vmax.f32 %v5375_v23, %v2543_v52 }
 0x38e   : > { %v1952_v41 = vrot.slane %v1828_v21, 2  ;;  %v1953_v19 = vrot.slane %v1828_v21, 4  ;;  %v1954_v26 = vrot.slane %v1828_v21, 6  ;;  %v3075_v16 = vrot.slane %v1828_v21, 9 }
 0x38f   : > { %v2608_v13 = vmax.f32 %v5377_v36, %v5464_v22  ;;  %v2609_v11 = vmax.f32 %v5379_v34, %v5470_v18  ;;  %v6129_v34 = vrot.slane %v5416_v35, 4  ;;  %v6130_v18 = vrot.slane %v5416_v35, 6 }
 0x390   : > { %v3076_v6 = vrot.slane %v1952_v41, 9  ;;  %v3077_v28 = vrot.slane %v1953_v19, 9  ;;  %v3078_v29 = vrot.slane %v1954_v26, 9  ;;  %v2558_v14 = vmax.f32 %v1828_v21, %v3075_v16 }
 0x391   : > { %v1795_v4 = vpop.f32.mrf.mxu3 }
 0x392   : > { %v1744_v55 = vpop.f32.mrf.mxu1  ;;  %v1796_v31 = vadd.f32 %v5444_v33, %v1795_v4  ;;  %v2559_v9 = vmax.f32 %v1952_v41, %v3076_v6  ;;  %v2560_v24 = vmax.f32 %v1953_v19, %v3077_v28  ;;  %v2561_v4 = vmax.f32 %v1954_v26, %v3078_v29 }
 0x393   : > { %v1745_v59 = vadd.f32 %v5444_v33, %v1744_v55  ;;  %v2622_v5 = vmax.f32 %v5364_v57, %v2558_v14  ;;  %v2703_v26 = vperm.slane %v2575_v15, 0 }
 0x394   : > { %v1829_v37 = vmax.f32 %v1796_v31, 0.0  ;;  %v2623_v58 = vmax.f32 %v5366_v3, %v2559_v9  ;;  %v2624_v55 = vmax.f32 %v5369_v42, %v2560_v24  ;;  %v2625_v21 = vmax.f32 %v5371_v62, %v2561_v4 }
 0x395   : > { %v5482_v48 = vmax.f32 %v1745_v59, 0.0  ;;  %v2750_v16 = vperm.slane %v2622_v5, 0 }
 0x396   : > { %v1955_v8 = vrot.slane %v1829_v37, 2  ;;  %v1956_v54 = vrot.slane %v1829_v37, 4  ;;  %v1957_v23 = vrot.slane %v1829_v37, 6  ;;  %v3079_v52 = vrot.slane %v1829_v37, 9 }
 0x397   : > { %v2751_v22 = vperm.slane %v2623_v58, 0  ;;  %v2752_v41 = vperm.slane %v2624_v55, 0  ;;  %v1904_v59 = vrot.slane %v5482_v48, 2  ;;  %v2753_v29 = vperm.slane %v2625_v21, 0 }
 0x398   : > { %v3080_v31 = vrot.slane %v1955_v8, 9  ;;  %v3081_v36 = vrot.slane %v1956_v54, 9  ;;  %v3082_v19 = vrot.slane %v1957_v23, 9  ;;  %v2562_v6 = vmax.f32 %v1829_v37, %v3079_v52 }
 0x399   : > { %v2814_v3 = vsel %vm2758_vm13, %v2751_v22, %v2750_v16  ;;  %v1905_v9 = vrot.slane %v5482_v48, 4  ;;  %v1906_v4 = vrot.slane %v5482_v48, 6  ;;  %v3043_v55 = vrot.slane %v5482_v48, 9 }
 0x39a   : > { %v2563_v28 = vmax.f32 %v1955_v8, %v3080_v31  ;;  %v2564_v57 = vmax.f32 %v1956_v54, %v3081_v36  ;;  %v2565_v42 = vmax.f32 %v1957_v23, %v3082_v19  ;;  %v2626_v14 = vmax.f32 %v5411_v39, %v2562_v6 }
 0x39b   : > { %v2815_v62 = vsel %vm2760_vm14, %v2752_v41, %v2814_v3  ;;  %v3044_v39 = vrot.slane %v1904_v59, 9  ;;  %v2735_v23 = vperm.slane %v2607_v40, 0  ;;  %v2702_v52 = vperm.slane %v2574_v61, 0 }
 0x39c   : > { %v2627_v5 = vmax.f32 %v5418_v44, %v2563_v28  ;;  %v2628_v58 = vmax.f32 %v5420_v53, %v2564_v57  ;;  %v2816_v15 = vsel %vm2762_vm15, %v2753_v29, %v2815_v62  ;;  %v2629_v37 = vmax.f32 %v5423_v30, %v2565_v42 }
 0x39d   : > { %v2754_v24 = vperm.slane %v2626_v14, 0  ;;  %v2577_v44 = vmax.f32 %v5388_v17, %v5466_v25  ;;  %v3045_v30 = vrot.slane %v1905_v9, 9  ;;  %v2527_v31 = vmax.f32 %v1904_v59, %v3044_v39 }
 0x39e   : > { %v2755_v8 = vperm.slane %v2627_v5, 0  ;;  %v2756_v54 = vperm.slane %v2628_v58, 0  ;;  %v2757_v21 = vperm.slane %v2629_v37, 0  ;;  %v2734_v36 = vperm.slane %v2606_v27, 0 }
 0x39f   : > { %v2817_v53 = vsel %vm2764_vm0, %v2754_v24, %v2816_v15  ;;  %v2736_v22 = vperm.slane %v2608_v13, 0  ;;  %v2704_v41 = vperm.slane %v2576_v12, 0  ;;  %v2772_v19 = vsel %vm2758_vm13, %v2703_v26, %v2702_v52 }
 0x3a0   : > { %v2818_v16 = vsel %vm2766_vm1, %v2755_v8, %v2817_v53  ;;  %v3046_v25 = vrot.slane %v1906_v4, 9  ;;  %v2526_v61 = vmax.f32 %v5482_v48, %v3043_v55  ;;  %v5513_v28 = vmax.f32 %v1903_v49, %v5427_v38 }
 0x3a1   : > { %v2819_v40 = vsel %vm2768_vm2, %v2756_v54, %v2818_v16  ;;  %v2800_v56 = vsel %vm2758_vm13, %v2735_v23, %v2734_v36  ;;  %v6127_v12 = vrot.slane %v5416_v35, 9  ;;  %v6128_v48 = vrot.slane %v5416_v35, 2 }
 0x3a2   : > { %v2820_v17 = vsel %vm2770_vm3, %v2757_v21, %v2819_v40  ;;  %v1771_v6 = vpop.f32.mrf.mxu2  ;;  %v2528_v2 = vmax.f32 %v1905_v9, %v3045_v30  ;;  %v2591_v49 = vmax.f32 %v5395_v51, %v2527_v31  ;;  %v5534_v38 = vmax.f32 %v6129_v34, %v5456_v50 }
 0x3a3   : > { %2836 = vst [vmem:[%s5313_s7 + $0x38] sm:$0xff] %v2820_v17  ;;  %v1772_v27 = vadd.f32 %v5444_v33, %v1771_v6  ;;  %v5523_v13 = vmax.f32 %v5416_v35, %v6127_v12  ;;  %v5528_v26 = vmax.f32 %v6128_v48, %v5452_v10  ;;  %v5539_v57 = vmax.f32 %v6130_v18, %v5460_v47 }
 0x3a4   : > { %v2773_v59 = vsel %vm2760_vm14, %v2704_v41, %v2772_v19  ;;  %v2801_v3 = vsel %vm2760_vm14, %v2736_v22, %v2800_v56  ;;  %v2705_v10 = vperm.slane %v2577_v44, 0  ;;  %v5543_v42 = vmax.f32 %v1906_v4, %v3046_v25 }
 0x3a5   : > { %v1821_v29 = vmax.f32 %v1772_v27, 0.0  ;;  %v2590_v51 = vmax.f32 %v5390_v43, %v2526_v61  ;;  %v2737_v14 = vperm.slane %v2609_v11, 0  ;;  %v2592_v35 = vmax.f32 %v5397_v32, %v2528_v2 }
 0x3a6   : > { %v5547_v58 = vsel %vm2762_vm15, %v2705_v10, %v2773_v59  ;;  %v2719_v47 = vperm.slane %v2591_v49, 0  ;;  %v2593_v43 = vmax.f32 %v5401_v60, %v5543_v42 }
 0x3a7   : > { %v1931_v62 = vrot.slane %v1821_v29, 2  ;;  %v1932_v5 = vrot.slane %v1821_v29, 4  ;;  %v1933_v50 = vrot.slane %v1821_v29, 6  ;;  %v3063_v9 = vrot.slane %v1821_v29, 9 }
 0x3a8   : > { %v2802_v15 = vsel %vm2762_vm15, %v2737_v14, %v2801_v3  ;;  %v1723_v4 = vpop.f32.mrf.mxu0  ;;  %v2718_v54 = vperm.slane %v2590_v51, 0  ;;  %v2720_v21 = vperm.slane %v2592_v35, 0 }
 0x3a9   : > { %v3064_v37 = vrot.slane %v1931_v62, 9  ;;  %v3065_v24 = vrot.slane %v1932_v5, 9  ;;  %v3066_v8 = vrot.slane %v1933_v50, 9  ;;  %v2546_v55 = vmax.f32 %v1821_v29, %v3063_v9 }
 0x3aa   : > { %v1724_v39 = vadd.f32 %v5444_v33, %v1723_v4  ;;  %v1747_v23 = vpop.f32.mrf.mxu1  ;;  %v2786_v16 = vsel %vm2758_vm13, %v2719_v47, %v2718_v54 }
 0x3ab   : > { %v2547_v44 = vmax.f32 %v1931_v62, %v3064_v37  ;;  %v2548_v52 = vmax.f32 %v1932_v5, %v3065_v24  ;;  %v2549_v53 = vmax.f32 %v1933_v50, %v3066_v8  ;;  %v1748_v32 = vadd.f32 %v5444_v33, %v1747_v23 }
 0x3ac   : > { %v2610_v30 = vmax.f32 %v5403_v45, %v2546_v55  ;;  %v1805_v31 = vmax.f32 %v1724_v39, 0.0  ;;  %v2787_v9 = vsel %vm2760_vm14, %v2720_v21, %v2786_v16 }
 0x3ad   : > { %v2611_v36 = vmax.f32 %v5405_v20, %v2547_v44  ;;  %v2612_v60 = vmax.f32 %v5407_v7, %v2548_v52  ;;  %v2613_v22 = vmax.f32 %v5409_v1, %v2549_v53  ;;  %v1813_v41 = vmax.f32 %v1748_v32, 0.0 }
 0x3ae   : > { %v2738_v40 = vperm.slane %v2610_v30, 0  ;;  %v1883_v19 = vrot.slane %v1805_v31, 2  ;;  %v1884_v17 = vrot.slane %v1805_v31, 4  ;;  %v1885_v25 = vrot.slane %v1805_v31, 6 }
 0x3af   : > { %v2739_v61 = vperm.slane %v2611_v36, 0  ;;  %v2740_v6 = vperm.slane %v2612_v60, 0  ;;  %v2741_v33 = vperm.slane %v2613_v22, 0  ;;  %v3031_v11 = vrot.slane %v1805_v31, 9 }
 0x3b0   : > { %v2803_v56 = vsel %vm2764_vm0, %v2738_v40, %v2802_v15  ;;  %v3032_v45 = vrot.slane %v1883_v19, 9  ;;  %v3033_v27 = vrot.slane %v1884_v17, 9  ;;  %v3034_v12 = vrot.slane %v1885_v25, 9 }
 0x3b1   : > { %v2804_v20 = vsel %vm2766_vm1, %v2739_v61, %v2803_v56  ;;  %v2514_v7 = vmax.f32 %v1805_v31, %v3031_v11  ;;  %v1907_v1 = vrot.slane %v1813_v41, 2  ;;  %v1908_v48 = vrot.slane %v1813_v41, 4 }
 0x3b2   : > { %v2805_v2 = vsel %vm2768_vm2, %v2740_v6, %v2804_v20  ;;  %v2515_v49 = vmax.f32 %v1883_v19, %v3032_v45  ;;  %v2516_v34 = vmax.f32 %v1884_v17, %v3033_v27  ;;  %v2517_v18 = vmax.f32 %v1885_v25, %v3034_v12 }
 0x3b3   : > { %v2806_v59 = vsel %vm2770_vm3, %v2741_v33, %v2805_v2  ;;  %v2578_v29 = vmax.f32 %v5523_v13, %v2514_v7  ;;  %v1909_v3 = vrot.slane %v1813_v41, 6  ;;  %v3047_v10 = vrot.slane %v1813_v41, 9 }
 0x3b4   : > { %2834 = vst [vmem:[%s5313_s7 + $0x28] sm:$0xff] %v2806_v59  ;;  %v2579_v42 = vmax.f32 %v5528_v26, %v2515_v49  ;;  %v2580_v51 = vmax.f32 %v5534_v38, %v2516_v34  ;;  %v2581_v14 = vmax.f32 %v5539_v57, %v2517_v18  ;;  %v3048_v62 = vrot.slane %v1907_v1, 9 }
 0x3b5   : > { %v2706_v5 = vperm.slane %v2578_v29, 0  ;;  %v3049_v50 = vrot.slane %v1908_v48, 9  ;;  %v3050_v35 = vrot.slane %v1909_v3, 9  ;;  %v2530_v47 = vmax.f32 %v1813_v41, %v3047_v10 }
 0x3b6   : > { %v2707_v15 = vperm.slane %v2579_v42, 0  ;;  %v2708_v13 = vperm.slane %v2580_v51, 0  ;;  %v2531_v37 = vmax.f32 %v1907_v1, %v3048_v62  ;;  %v2721_v57 = vperm.slane %v2593_v43, 0 }
 0x3b7   : > { %v2775_v24 = vsel %vm2764_vm0, %v2706_v5, %v5547_v58  ;;  %v2532_v26 = vmax.f32 %v1908_v48, %v3049_v50  ;;  %v2533_v8 = vmax.f32 %v1909_v3, %v3050_v35  ;;  %v2594_v38 = vmax.f32 %v5431_v63, %v2530_v47 }
 0x3b8   : > { %v2709_v4 = vperm.slane %v2581_v14, 0  ;;  %v2776_v54 = vsel %vm2766_vm1, %v2707_v15, %v2775_v24  ;;  %v2595_v55 = vmax.f32 %v5437_v46, %v2531_v37  ;;  %v2788_v63 = vsel %vm2762_vm15, %v2721_v57, %v2787_v9 }
 0x3b9   : > { %v2777_v39 = vsel %vm2768_vm2, %v2708_v13, %v2776_v54  ;;  %v2596_v23 = vmax.f32 %v5447_v0, %v2532_v26  ;;  %v2597_v58 = vmax.f32 %v5513_v28, %v2533_v8  ;;  %v2722_v44 = vperm.slane %v2594_v38, 0 }
 0x3ba   : > { %v2778_v52 = vsel %vm2770_vm3, %v2709_v4, %v2777_v39  ;;  %v2723_v43 = vperm.slane %v2595_v55, 0 }
 0x3bb   : > { %2830 = vst [vmem:[%s5313_s7 + $0x8] sm:$0xff] %v2778_v52  ;;  %v2724_v53 = vperm.slane %v2596_v23, 0  ;;  %v2789_v46 = vsel %vm2764_vm0, %v2722_v44, %v2788_v63  ;;  %v2725_v32 = vperm.slane %v2597_v58, 0 }
 0x3bc   : > { %v2790_v0 = vsel %vm2766_vm1, %v2723_v43, %v2789_v46 }
 0x3bd   : > { %v2791_v28 = vsel %vm2768_vm2, %v2724_v53, %v2790_v0 }
 0x3be   : > { %v2792_v21 = vsel %vm2770_vm3, %v2725_v32, %v2791_v28 }
 0x3bf   : > { %2832 = vst [vmem:[%s5313_s7 + $0x18] sm:$0xff] %v2792_v21 }
 0x3c0   : > { %3183 = shalt.err (!%p3180_p3)
}
 0x3c1   : > { %s3229_s5 = smov 128  }
 0x3c2   : > { %3105 = dma.vmem_to_hbm [thread:$0]  (%p3288_p5), %s2851_s19, 1024, %s2853_s20, %s2838_s24, %s3229_s5, %s3229_s5, %s3222_s30  }
 0x3c3 PF: > { %p3111_p4 = scmp.ge.s32.totalorder %s3218_s15, 2  ;;  %s2867_s7 = sand.u32 1, %s3206_s12  }
 0x3c4   : > { %s2868_s8 = scalar_lea.sflag [#allocation3], %s2867_s7 }
 0x3c5   : > { %p3108_p7 = pnand %p3111_p4, %p3292_p6 }
 0x3c7   : > { %p3109_p8 = pneg %p3108_p7 }
 0x3c9   : > { %3201 = dma.done.wait (%p3109_p8), %s2868_s8, 1024  }
 0x3ca   : > { %3203 = vsyncadd (%p3109_p8), %s2868_s8, 4294966272  ;;  %p13_p9 = scmp.ge.s32.totalorder %s3275_s18, 4   ;;  %s6131_s12 = smov %s3210_s13 }
 0x3cb   : > { %s6132_s13 = smov %s3214_s14  ;;  %s6133_s14 = smov %s3286_s21 }
 0x3cc   : > { %s6134_s15 = smov %s3275_s18  ;;  %15 = sbr.rel (!%p13_p9) target bundleno = 3 (0x3), region = 67 }
 0x3d1   :  { %2874 = vsyncpa [#allocation3], 1 }
 0x3d2   :  { %2876 = vsyncpa [#allocation3 + $0x1], 1 }

</bundles_post_ra>
